<compile_context>
chip_gen: v7x
topology: tpu7x:2x2x1
jax: 0.10.0
libtpu: 0.0.40
codegen_flags: <defaults>
</compile_context>

<pallas_src>
import functools

import jax
import jax.numpy as jnp
from jax.experimental import pallas as pl
from jax.experimental.pallas import tpu as pltpu


def _win_slice(start, size, stride):
    """Window slice along one spatial dim (stride==1 -> contiguous pl.ds)."""
    if stride == 1:
        return pl.ds(start, size)
    return pl.ds(start, size, stride)


# ----------------------------------------------------------------------------
# Pallas kernel: fused Conv3d (tap accumulation) + BatchNorm (scale/shift) + ReLU
# ----------------------------------------------------------------------------
def _conv3d_bn_relu_kernel(x_ref, w_ref, scale_ref, shift_ref, o_ref, *,
                           ksize, strides, out_dims, d_tile):
    # x_ref:     (Dp, Hp, Wp, Cin)   padded channels-last volume for batch n (bf16, VMEM-resident)
    # w_ref:     (taps, Cin, Cout)   conv weight, tap-major (f32)
    # scale_ref: (1, Cout)           gamma / sqrt(running_var + eps)
    # shift_ref: (1, Cout)           beta - running_mean * scale
    # o_ref:     (Cout, d_tile*Ho*Wo)  lane-dense output block (f32)
    kd, kh, kw = ksize
    sd, sh, sw = strides
    Do, Ho, Wo = out_dims
    cin = x_ref.shape[-1]
    cout = o_ref.shape[0]
    m_tile = d_tile * Ho * Wo

    # first input-depth coordinate covered by this output-depth tile
    d0 = pl.program_id(1) * (d_tile * sd)

    acc = jnp.zeros((m_tile, cout), jnp.float32)
    t = 0
    for i in range(kd):
        for j in range(kh):
            for k in range(kw):
                # (d_tile, Ho, Wo, Cin) window of the VMEM-resident padded volume
                win = x_ref[_win_slice(d0 + i, d_tile, sd),
                            _win_slice(j, Ho, sh),
                            _win_slice(k, Wo, sw), :]
                # upcast on-chip (HBM stream stays bf16); collapse leading dims only
                a = win.astype(jnp.float32).reshape(m_tile, cin)
                acc = acc + jnp.dot(a, w_ref[t],
                                    preferred_element_type=jnp.float32)
                t += 1

    y = acc * scale_ref[...] + shift_ref[...]
    y = jnp.maximum(y, 0.0)
    # single in-kernel transpose so the store is lane-dense (spatial on lanes)
    o_ref[...] = jnp.transpose(y, (1, 0)).astype(o_ref.dtype)


# ----------------------------------------------------------------------------
# MyConv3d forward: Conv3d(bias=False) + BatchNorm3d(eps=1e-4, eval) + ReLU
# ----------------------------------------------------------------------------
def my_conv3d_forward(x, weight, gamma, beta, running_mean, running_var, *,
                      stride, padding, eps=1e-4, input_dtype=jnp.bfloat16):
    """x: (N, Cin, D, H, W); weight: (Cout, Cin, kd, kh, kw). Returns NCDHW (f32)."""
    N, Cin, D, H, W = x.shape
    Cout, Cin_w, kd, kh, kw = weight.shape
    assert Cin_w == Cin
    sd, sh, sw = stride
    pd, ph, pw = padding
    Dp, Hp, Wp = D + 2 * pd, H + 2 * ph, W + 2 * pw
    Do = (Dp - kd) // sd + 1
    Ho = (Hp - kh) // sh + 1
    Wo = (Wp - kw) // sw + 1
    M = Do * Ho * Wo
    n_taps = kd * kh * kw

    # Padded, channels-last, bf16 input (one XLA pass; this is the dominant HBM stream).
    xp = jnp.pad(x, ((0, 0), (0, 0), (pd, pd), (ph, ph), (pw, pw)))
    xp = jnp.transpose(xp, (0, 2, 3, 4, 1)).astype(input_dtype)   # (N, Dp, Hp, Wp, Cin)

    # Weight -> (taps, Cin, Cout), tap order (i, j, k) row-major (tiny; keep f32).
    wr = jnp.transpose(weight, (2, 3, 4, 1, 0)).reshape(n_taps, Cin, Cout)
    wr = wr.astype(jnp.float32)

    scale_v = gamma / jnp.sqrt(running_var + eps)                 # (Cout,)
    shift_v = beta - running_mean * scale_v                       # (Cout,)
    scale = scale_v.reshape(1, Cout).astype(jnp.float32)
    shift = shift_v.reshape(1, Cout).astype(jnp.float32)

    # Output-depth tiling: as many tiles as possible while the flattened output block
    # stays a multiple of 128 lanes (or a single full-extent block).
    d_tile = Do
    for nt in range(Do, 0, -1):
        if Do % nt:
            continue
        td = Do // nt
        if nt == 1 or (td * Ho * Wo) % 128 == 0:
            d_tile = td
            break
    n_d_tiles = Do // d_tile
    m_tile = d_tile * Ho * Wo

    # VMEM budget (double-buffered blocks + scratch headroom), capped for v7x (64 MiB phys).
    x_block_bytes = Dp * Hp * Wp * Cin * jnp.dtype(input_dtype).itemsize
    o_block_bytes = Cout * m_tile * 4
    w_bytes = n_taps * Cin * Cout * 4
    win_bytes = d_tile * Ho * Wo * Cin * 4
    est_vmem = 2 * x_block_bytes + 2 * o_block_bytes + w_bytes + 8 * win_bytes + (1 << 20)
    vmem_limit = int(min(48 * 2 ** 20, max(2 * est_vmem, 4 * 2 ** 20)))

    flops = 2 * N * M * (Cin * n_taps) * Cout
    bytes_accessed = (xp.size * xp.dtype.itemsize + wr.size * 4
                      + scale.size * 4 + shift.size * 4 + N * Cout * M * 4)

    kernel = functools.partial(
        _conv3d_bn_relu_kernel,
        ksize=(kd, kh, kw), strides=(sd, sh, sw),
        out_dims=(Do, Ho, Wo), d_tile=d_tile)

    out_flat = pl.pallas_call(
        kernel,
        out_shape=jax.ShapeDtypeStruct((N, Cout, M), jnp.float32),
        grid=(N, n_d_tiles),
        in_specs=[
            # full padded volume per batch element; resident across the depth-tile axis
            pl.BlockSpec((None, Dp, Hp, Wp, Cin), lambda n, dt: (n, 0, 0, 0, 0)),
            pl.BlockSpec((n_taps, Cin, Cout), lambda n, dt: (0, 0, 0)),
            pl.BlockSpec((1, Cout), lambda n, dt: (0, 0)),
            pl.BlockSpec((1, Cout), lambda n, dt: (0, 0)),
        ],
        out_specs=pl.BlockSpec((None, Cout, m_tile), lambda n, dt: (n, 0, dt)),
        compiler_params=pltpu.CompilerParams(
            dimension_semantics=("parallel", "parallel"),
            vmem_limit_bytes=vmem_limit,
        ),
        cost_estimate=pl.CostEstimate(
            flops=flops, transcendentals=0, bytes_accessed=bytes_accessed),
    )(xp, wr, scale, shift)

    # (N, Cout, Do*Ho*Wo) -> (N, Cout, Do, Ho, Wo): a free trailing-dim split, no transpose.
    return out_flat.reshape(N, Cout, Do, Ho, Wo)


# ----------------------------------------------------------------------------
# Reference (pure JAX, f32) for sanity check
# ----------------------------------------------------------------------------
def _reference(x, weight, gamma, beta, running_mean, running_var, *,
               stride, padding, eps=1e-4):
    y = jax.lax.conv_general_dilated(
        x, weight,
        window_strides=stride,
        padding=[(p, p) for p in padding],
        dimension_numbers=("NCDHW", "OIDHW", "NCDHW"),
    )
    scale = (gamma / jnp.sqrt(running_var + eps)).reshape(1, -1, 1, 1, 1)
    shift = (beta - running_mean * gamma / jnp.sqrt(running_var + eps)).reshape(1, -1, 1, 1, 1)
    return jnp.maximum(y * scale + shift, 0.0)


if __name__ == "__main__":
    key = jax.random.PRNGKey(0)
    k1, k2, k3, k4, k5, k6 = jax.random.split(key, 6)

    # Small shapes consistent with MyConv3d(in_channels=4, out_channels=8,
    # kernel_size=3, stride=1, padding=1).
    N, Cin, D, H, W = 2, 4, 4, 8, 8
    Cout, ks = 8, (3, 3, 3)
    stride, padding = (1, 1, 1), (1, 1, 1)

    x = jax.random.normal(k1, (N, Cin, D, H, W), jnp.float32)
    weight = jax.random.normal(k2, (Cout, Cin) + ks, jnp.float32) * 0.1
    gamma = jax.random.uniform(k3, (Cout,), jnp.float32, 0.5, 1.5)
    beta = jax.random.normal(k4, (Cout,), jnp.float32) * 0.1
    running_mean = jax.random.normal(k5, (Cout,), jnp.float32) * 0.1
    running_var = jax.random.uniform(k6, (Cout,), jnp.float32, 0.5, 1.5)

    fwd = jax.jit(functools.partial(my_conv3d_forward, stride=stride, padding=padding))
    out = fwd(x, weight, gamma, beta, running_mean, running_var)
    jax.block_until_ready(out)

    ref = _reference(x, weight, gamma, beta, running_mean, running_var,
                     stride=stride, padding=padding)
    assert out.shape == (N, Cout, D, H, W), out.shape
    max_err = float(jnp.max(jnp.abs(out - ref)))
    # bf16 input stream (f32 accumulation) -> loosened tolerance vs f32 reference.
    assert jnp.allclose(out, ref, atol=5e-2, rtol=5e-2), max_err

    print("KERNEL_OK")
</pallas_src>

<mosaic_0001>
module attributes {stable_mosaic.version = 11 : i64} {
  func.func @_conv3d_bn_relu_kernel(%arg0: i32, %arg1: i32, %arg2: memref<1x6x10x10x4xbf16, #tpu.memory_space<vmem>>, %arg3: memref<27x4x8xf32, #tpu.memory_space<vmem>>, %arg4: memref<1x8xf32, #tpu.memory_space<vmem>>, %arg5: memref<1x8xf32, #tpu.memory_space<vmem>>, %arg6: memref<1x8x128xf32, #tpu.memory_space<vmem>>) attributes {dimension_semantics = [#tpu.dimension_semantics<parallel>, #tpu.dimension_semantics<parallel>], iteration_bounds = array<i64: 2, 2>, scalar_prefetch = 0 : i64, scratch_operands = 0 : i64, tpu.core_type = #tpu.core_type<tc>, window_params = [{transform_indices = @transform_0, window_bounds = array<i64: 1, 6, 10, 10, 4>}, {pipeline_mode = #tpu.pipeline_mode<synchronous>, transform_indices = @transform_1, window_bounds = array<i64: 27, 4, 8>}, {pipeline_mode = #tpu.pipeline_mode<synchronous>, transform_indices = @transform_2, window_bounds = array<i64: 1, 8>}, {pipeline_mode = #tpu.pipeline_mode<synchronous>, transform_indices = @transform_3, window_bounds = array<i64: 1, 8>}, {transform_indices = @transform_4, window_bounds = array<i64: 1, 8, 128>}]} {
    %c2_i32 = arith.constant 2 : i32
    %0 = arith.muli %arg1, %c2_i32 : i32
    %cst = arith.constant 0.000000e+00 : f32
    %1 = vector.broadcast %cst : f32 to vector<128x8xf32>
    %c0_i32 = arith.constant 0 : i32
    %2 = arith.addi %0, %c0_i32 : i32
    %c0 = arith.constant 0 : index
    %3 = arith.index_cast %2 : i32 to index
    %c0_0 = arith.constant 0 : index
    %c0_1 = arith.constant 0 : index
    %c0_2 = arith.constant 0 : index
    %4 = vector.load %arg2[%c0, %3, %c0_0, %c0_1, %c0_2] : memref<1x6x10x10x4xbf16, #tpu.memory_space<vmem>>, vector<1x2x8x8x4xbf16>
    %5 = vector.shape_cast %4 : vector<1x2x8x8x4xbf16> to vector<2x8x8x4xbf16>
    %6 = arith.extf %5 : vector<2x8x8x4xbf16> to vector<2x8x8x4xf32>
    %7 = vector.shape_cast %6 : vector<2x8x8x4xf32> to vector<128x4xf32>
    %c0_3 = arith.constant 0 : index
    %c0_4 = arith.constant 0 : index
    %c0_5 = arith.constant 0 : index
    %8 = vector.load %arg3[%c0_3, %c0_4, %c0_5] : memref<27x4x8xf32, #tpu.memory_space<vmem>>, vector<1x4x8xf32>
    %9 = vector.shape_cast %8 : vector<1x4x8xf32> to vector<4x8xf32>
    %cst_6 = arith.constant dense<0.000000e+00> : vector<128x8xf32>
    %10 = tpu.matmul %7, %9, %cst_6 {dimension_numbers = #tpu.dot_dimension_numbers<[1], [0], [0], [1], [0, 0, 1, 1], [], []>} : vector<128x4xf32>, vector<4x8xf32>, vector<128x8xf32> -> vector<128x8xf32>
    %11 = arith.addf %1, %10 : vector<128x8xf32>
    %c0_i32_7 = arith.constant 0 : i32
    %12 = arith.addi %0, %c0_i32_7 : i32
    %c0_8 = arith.constant 0 : index
    %13 = arith.index_cast %12 : i32 to index
    %c0_9 = arith.constant 0 : index
    %c1 = arith.constant 1 : index
    %c0_10 = arith.constant 0 : index
    %14 = vector.load %arg2[%c0_8, %13, %c0_9, %c1, %c0_10] : memref<1x6x10x10x4xbf16, #tpu.memory_space<vmem>>, vector<1x2x8x8x4xbf16>
    %15 = vector.shape_cast %14 : vector<1x2x8x8x4xbf16> to vector<2x8x8x4xbf16>
    %16 = arith.extf %15 : vector<2x8x8x4xbf16> to vector<2x8x8x4xf32>
    %17 = vector.shape_cast %16 : vector<2x8x8x4xf32> to vector<128x4xf32>
    %c1_11 = arith.constant 1 : index
    %c0_12 = arith.constant 0 : index
    %c0_13 = arith.constant 0 : index
    %18 = vector.load %arg3[%c1_11, %c0_12, %c0_13] : memref<27x4x8xf32, #tpu.memory_space<vmem>>, vector<1x4x8xf32>
    %19 = vector.shape_cast %18 : vector<1x4x8xf32> to vector<4x8xf32>
    %cst_14 = arith.constant dense<0.000000e+00> : vector<128x8xf32>
    %20 = tpu.matmul %17, %19, %cst_14 {dimension_numbers = #tpu.dot_dimension_numbers<[1], [0], [0], [1], [0, 0, 1, 1], [], []>} : vector<128x4xf32>, vector<4x8xf32>, vector<128x8xf32> -> vector<128x8xf32>
    %21 = arith.addf %11, %20 : vector<128x8xf32>
    %c0_i32_15 = arith.constant 0 : i32
    %22 = arith.addi %0, %c0_i32_15 : i32
    %c0_16 = arith.constant 0 : index
    %23 = arith.index_cast %22 : i32 to index
    %c0_17 = arith.constant 0 : index
    %c2 = arith.constant 2 : index
    %c0_18 = arith.constant 0 : index
    %24 = vector.load %arg2[%c0_16, %23, %c0_17, %c2, %c0_18] : memref<1x6x10x10x4xbf16, #tpu.memory_space<vmem>>, vector<1x2x8x8x4xbf16>
    %25 = vector.shape_cast %24 : vector<1x2x8x8x4xbf16> to vector<2x8x8x4xbf16>
    %26 = arith.extf %25 : vector<2x8x8x4xbf16> to vector<2x8x8x4xf32>
    %27 = vector.shape_cast %26 : vector<2x8x8x4xf32> to vector<128x4xf32>
    %c2_19 = arith.constant 2 : index
    %c0_20 = arith.constant 0 : index
    %c0_21 = arith.constant 0 : index
    %28 = vector.load %arg3[%c2_19, %c0_20, %c0_21] : memref<27x4x8xf32, #tpu.memory_space<vmem>>, vector<1x4x8xf32>
    %29 = vector.shape_cast %28 : vector<1x4x8xf32> to vector<4x8xf32>
    %cst_22 = arith.constant dense<0.000000e+00> : vector<128x8xf32>
    %30 = tpu.matmul %27, %29, %cst_22 {dimension_numbers = #tpu.dot_dimension_numbers<[1], [0], [0], [1], [0, 0, 1, 1], [], []>} : vector<128x4xf32>, vector<4x8xf32>, vector<128x8xf32> -> vector<128x8xf32>
    %31 = arith.addf %21, %30 : vector<128x8xf32>
    %c0_i32_23 = arith.constant 0 : i32
    %32 = arith.addi %0, %c0_i32_23 : i32
    %c0_24 = arith.constant 0 : index
    %33 = arith.index_cast %32 : i32 to index
    %c1_25 = arith.constant 1 : index
    %c0_26 = arith.constant 0 : index
    %c0_27 = arith.constant 0 : index
    %34 = vector.load %arg2[%c0_24, %33, %c1_25, %c0_26, %c0_27] : memref<1x6x10x10x4xbf16, #tpu.memory_space<vmem>>, vector<1x2x8x8x4xbf16>
    %35 = vector.shape_cast %34 : vector<1x2x8x8x4xbf16> to vector<2x8x8x4xbf16>
    %36 = arith.extf %35 : vector<2x8x8x4xbf16> to vector<2x8x8x4xf32>
    %37 = vector.shape_cast %36 : vector<2x8x8x4xf32> to vector<128x4xf32>
    %c3 = arith.constant 3 : index
    %c0_28 = arith.constant 0 : index
    %c0_29 = arith.constant 0 : index
    %38 = vector.load %arg3[%c3, %c0_28, %c0_29] : memref<27x4x8xf32, #tpu.memory_space<vmem>>, vector<1x4x8xf32>
    %39 = vector.shape_cast %38 : vector<1x4x8xf32> to vector<4x8xf32>
    %cst_30 = arith.constant dense<0.000000e+00> : vector<128x8xf32>
    %40 = tpu.matmul %37, %39, %cst_30 {dimension_numbers = #tpu.dot_dimension_numbers<[1], [0], [0], [1], [0, 0, 1, 1], [], []>} : vector<128x4xf32>, vector<4x8xf32>, vector<128x8xf32> -> vector<128x8xf32>
    %41 = arith.addf %31, %40 : vector<128x8xf32>
    %c0_i32_31 = arith.constant 0 : i32
    %42 = arith.addi %0, %c0_i32_31 : i32
    %c0_32 = arith.constant 0 : index
    %43 = arith.index_cast %42 : i32 to index
    %c1_33 = arith.constant 1 : index
    %c1_34 = arith.constant 1 : index
    %c0_35 = arith.constant 0 : index
    %44 = vector.load %arg2[%c0_32, %43, %c1_33, %c1_34, %c0_35] : memref<1x6x10x10x4xbf16, #tpu.memory_space<vmem>>, vector<1x2x8x8x4xbf16>
    %45 = vector.shape_cast %44 : vector<1x2x8x8x4xbf16> to vector<2x8x8x4xbf16>
    %46 = arith.extf %45 : vector<2x8x8x4xbf16> to vector<2x8x8x4xf32>
    %47 = vector.shape_cast %46 : vector<2x8x8x4xf32> to vector<128x4xf32>
    %c4 = arith.constant 4 : index
    %c0_36 = arith.constant 0 : index
    %c0_37 = arith.constant 0 : index
    %48 = vector.load %arg3[%c4, %c0_36, %c0_37] : memref<27x4x8xf32, #tpu.memory_space<vmem>>, vector<1x4x8xf32>
    %49 = vector.shape_cast %48 : vector<1x4x8xf32> to vector<4x8xf32>
    %cst_38 = arith.constant dense<0.000000e+00> : vector<128x8xf32>
    %50 = tpu.matmul %47, %49, %cst_38 {dimension_numbers = #tpu.dot_dimension_numbers<[1], [0], [0], [1], [0, 0, 1, 1], [], []>} : vector<128x4xf32>, vector<4x8xf32>, vector<128x8xf32> -> vector<128x8xf32>
    %51 = arith.addf %41, %50 : vector<128x8xf32>
    %c0_i32_39 = arith.constant 0 : i32
    %52 = arith.addi %0, %c0_i32_39 : i32
    %c0_40 = arith.constant 0 : index
    %53 = arith.index_cast %52 : i32 to index
    %c1_41 = arith.constant 1 : index
    %c2_42 = arith.constant 2 : index
    %c0_43 = arith.constant 0 : index
    %54 = vector.load %arg2[%c0_40, %53, %c1_41, %c2_42, %c0_43] : memref<1x6x10x10x4xbf16, #tpu.memory_space<vmem>>, vector<1x2x8x8x4xbf16>
    %55 = vector.shape_cast %54 : vector<1x2x8x8x4xbf16> to vector<2x8x8x4xbf16>
    %56 = arith.extf %55 : vector<2x8x8x4xbf16> to vector<2x8x8x4xf32>
    %57 = vector.shape_cast %56 : vector<2x8x8x4xf32> to vector<128x4xf32>
    %c5 = arith.constant 5 : index
    %c0_44 = arith.constant 0 : index
    %c0_45 = arith.constant 0 : index
    %58 = vector.load %arg3[%c5, %c0_44, %c0_45] : memref<27x4x8xf32, #tpu.memory_space<vmem>>, vector<1x4x8xf32>
    %59 = vector.shape_cast %58 : vector<1x4x8xf32> to vector<4x8xf32>
    %cst_46 = arith.constant dense<0.000000e+00> : vector<128x8xf32>
    %60 = tpu.matmul %57, %59, %cst_46 {dimension_numbers = #tpu.dot_dimension_numbers<[1], [0], [0], [1], [0, 0, 1, 1], [], []>} : vector<128x4xf32>, vector<4x8xf32>, vector<128x8xf32> -> vector<128x8xf32>
    %61 = arith.addf %51, %60 : vector<128x8xf32>
    %c0_i32_47 = arith.constant 0 : i32
    %62 = arith.addi %0, %c0_i32_47 : i32
    %c0_48 = arith.constant 0 : index
    %63 = arith.index_cast %62 : i32 to index
    %c2_49 = arith.constant 2 : index
    %c0_50 = arith.constant 0 : index
    %c0_51 = arith.constant 0 : index
    %64 = vector.load %arg2[%c0_48, %63, %c2_49, %c0_50, %c0_51] : memref<1x6x10x10x4xbf16, #tpu.memory_space<vmem>>, vector<1x2x8x8x4xbf16>
    %65 = vector.shape_cast %64 : vector<1x2x8x8x4xbf16> to vector<2x8x8x4xbf16>
    %66 = arith.extf %65 : vector<2x8x8x4xbf16> to vector<2x8x8x4xf32>
    %67 = vector.shape_cast %66 : vector<2x8x8x4xf32> to vector<128x4xf32>
    %c6 = arith.constant 6 : index
    %c0_52 = arith.constant 0 : index
    %c0_53 = arith.constant 0 : index
    %68 = vector.load %arg3[%c6, %c0_52, %c0_53] : memref<27x4x8xf32, #tpu.memory_space<vmem>>, vector<1x4x8xf32>
    %69 = vector.shape_cast %68 : vector<1x4x8xf32> to vector<4x8xf32>
    %cst_54 = arith.constant dense<0.000000e+00> : vector<128x8xf32>
    %70 = tpu.matmul %67, %69, %cst_54 {dimension_numbers = #tpu.dot_dimension_numbers<[1], [0], [0], [1], [0, 0, 1, 1], [], []>} : vector<128x4xf32>, vector<4x8xf32>, vector<128x8xf32> -> vector<128x8xf32>
    %71 = arith.addf %61, %70 : vector<128x8xf32>
    %c0_i32_55 = arith.constant 0 : i32
    %72 = arith.addi %0, %c0_i32_55 : i32
    %c0_56 = arith.constant 0 : index
    %73 = arith.index_cast %72 : i32 to index
    %c2_57 = arith.constant 2 : index
    %c1_58 = arith.constant 1 : index
    %c0_59 = arith.constant 0 : index
    %74 = vector.load %arg2[%c0_56, %73, %c2_57, %c1_58, %c0_59] : memref<1x6x10x10x4xbf16, #tpu.memory_space<vmem>>, vector<1x2x8x8x4xbf16>
    %75 = vector.shape_cast %74 : vector<1x2x8x8x4xbf16> to vector<2x8x8x4xbf16>
    %76 = arith.extf %75 : vector<2x8x8x4xbf16> to vector<2x8x8x4xf32>
    %77 = vector.shape_cast %76 : vector<2x8x8x4xf32> to vector<128x4xf32>
    %c7 = arith.constant 7 : index
    %c0_60 = arith.constant 0 : index
    %c0_61 = arith.constant 0 : index
    %78 = vector.load %arg3[%c7, %c0_60, %c0_61] : memref<27x4x8xf32, #tpu.memory_space<vmem>>, vector<1x4x8xf32>
    %79 = vector.shape_cast %78 : vector<1x4x8xf32> to vector<4x8xf32>
    %cst_62 = arith.constant dense<0.000000e+00> : vector<128x8xf32>
    %80 = tpu.matmul %77, %79, %cst_62 {dimension_numbers = #tpu.dot_dimension_numbers<[1], [0], [0], [1], [0, 0, 1, 1], [], []>} : vector<128x4xf32>, vector<4x8xf32>, vector<128x8xf32> -> vector<128x8xf32>
    %81 = arith.addf %71, %80 : vector<128x8xf32>
    %c0_i32_63 = arith.constant 0 : i32
    %82 = arith.addi %0, %c0_i32_63 : i32
    %c0_64 = arith.constant 0 : index
    %83 = arith.index_cast %82 : i32 to index
    %c2_65 = arith.constant 2 : index
    %c2_66 = arith.constant 2 : index
    %c0_67 = arith.constant 0 : index
    %84 = vector.load %arg2[%c0_64, %83, %c2_65, %c2_66, %c0_67] : memref<1x6x10x10x4xbf16, #tpu.memory_space<vmem>>, vector<1x2x8x8x4xbf16>
    %85 = vector.shape_cast %84 : vector<1x2x8x8x4xbf16> to vector<2x8x8x4xbf16>
    %86 = arith.extf %85 : vector<2x8x8x4xbf16> to vector<2x8x8x4xf32>
    %87 = vector.shape_cast %86 : vector<2x8x8x4xf32> to vector<128x4xf32>
    %c8 = arith.constant 8 : index
    %c0_68 = arith.constant 0 : index
    %c0_69 = arith.constant 0 : index
    %88 = vector.load %arg3[%c8, %c0_68, %c0_69] : memref<27x4x8xf32, #tpu.memory_space<vmem>>, vector<1x4x8xf32>
    %89 = vector.shape_cast %88 : vector<1x4x8xf32> to vector<4x8xf32>
    %cst_70 = arith.constant dense<0.000000e+00> : vector<128x8xf32>
    %90 = tpu.matmul %87, %89, %cst_70 {dimension_numbers = #tpu.dot_dimension_numbers<[1], [0], [0], [1], [0, 0, 1, 1], [], []>} : vector<128x4xf32>, vector<4x8xf32>, vector<128x8xf32> -> vector<128x8xf32>
    %91 = arith.addf %81, %90 : vector<128x8xf32>
    %c1_i32 = arith.constant 1 : i32
    %92 = arith.addi %0, %c1_i32 : i32
    %c0_71 = arith.constant 0 : index
    %93 = arith.index_cast %92 : i32 to index
    %c0_72 = arith.constant 0 : index
    %c0_73 = arith.constant 0 : index
    %c0_74 = arith.constant 0 : index
    %94 = vector.load %arg2[%c0_71, %93, %c0_72, %c0_73, %c0_74] : memref<1x6x10x10x4xbf16, #tpu.memory_space<vmem>>, vector<1x2x8x8x4xbf16>
    %95 = vector.shape_cast %94 : vector<1x2x8x8x4xbf16> to vector<2x8x8x4xbf16>
    %96 = arith.extf %95 : vector<2x8x8x4xbf16> to vector<2x8x8x4xf32>
    %97 = vector.shape_cast %96 : vector<2x8x8x4xf32> to vector<128x4xf32>
    %c9 = arith.constant 9 : index
    %c0_75 = arith.constant 0 : index
    %c0_76 = arith.constant 0 : index
    %98 = vector.load %arg3[%c9, %c0_75, %c0_76] : memref<27x4x8xf32, #tpu.memory_space<vmem>>, vector<1x4x8xf32>
    %99 = vector.shape_cast %98 : vector<1x4x8xf32> to vector<4x8xf32>
    %cst_77 = arith.constant dense<0.000000e+00> : vector<128x8xf32>
    %100 = tpu.matmul %97, %99, %cst_77 {dimension_numbers = #tpu.dot_dimension_numbers<[1], [0], [0], [1], [0, 0, 1, 1], [], []>} : vector<128x4xf32>, vector<4x8xf32>, vector<128x8xf32> -> vector<128x8xf32>
    %101 = arith.addf %91, %100 : vector<128x8xf32>
    %c1_i32_78 = arith.constant 1 : i32
    %102 = arith.addi %0, %c1_i32_78 : i32
    %c0_79 = arith.constant 0 : index
    %103 = arith.index_cast %102 : i32 to index
    %c0_80 = arith.constant 0 : index
    %c1_81 = arith.constant 1 : index
    %c0_82 = arith.constant 0 : index
    %104 = vector.load %arg2[%c0_79, %103, %c0_80, %c1_81, %c0_82] : memref<1x6x10x10x4xbf16, #tpu.memory_space<vmem>>, vector<1x2x8x8x4xbf16>
    %105 = vector.shape_cast %104 : vector<1x2x8x8x4xbf16> to vector<2x8x8x4xbf16>
    %106 = arith.extf %105 : vector<2x8x8x4xbf16> to vector<2x8x8x4xf32>
    %107 = vector.shape_cast %106 : vector<2x8x8x4xf32> to vector<128x4xf32>
    %c10 = arith.constant 10 : index
    %c0_83 = arith.constant 0 : index
    %c0_84 = arith.constant 0 : index
    %108 = vector.load %arg3[%c10, %c0_83, %c0_84] : memref<27x4x8xf32, #tpu.memory_space<vmem>>, vector<1x4x8xf32>
    %109 = vector.shape_cast %108 : vector<1x4x8xf32> to vector<4x8xf32>
    %cst_85 = arith.constant dense<0.000000e+00> : vector<128x8xf32>
    %110 = tpu.matmul %107, %109, %cst_85 {dimension_numbers = #tpu.dot_dimension_numbers<[1], [0], [0], [1], [0, 0, 1, 1], [], []>} : vector<128x4xf32>, vector<4x8xf32>, vector<128x8xf32> -> vector<128x8xf32>
    %111 = arith.addf %101, %110 : vector<128x8xf32>
    %c1_i32_86 = arith.constant 1 : i32
    %112 = arith.addi %0, %c1_i32_86 : i32
    %c0_87 = arith.constant 0 : index
    %113 = arith.index_cast %112 : i32 to index
    %c0_88 = arith.constant 0 : index
    %c2_89 = arith.constant 2 : index
    %c0_90 = arith.constant 0 : index
    %114 = vector.load %arg2[%c0_87, %113, %c0_88, %c2_89, %c0_90] : memref<1x6x10x10x4xbf16, #tpu.memory_space<vmem>>, vector<1x2x8x8x4xbf16>
    %115 = vector.shape_cast %114 : vector<1x2x8x8x4xbf16> to vector<2x8x8x4xbf16>
    %116 = arith.extf %115 : vector<2x8x8x4xbf16> to vector<2x8x8x4xf32>
    %117 = vector.shape_cast %116 : vector<2x8x8x4xf32> to vector<128x4xf32>
    %c11 = arith.constant 11 : index
    %c0_91 = arith.constant 0 : index
    %c0_92 = arith.constant 0 : index
    %118 = vector.load %arg3[%c11, %c0_91, %c0_92] : memref<27x4x8xf32, #tpu.memory_space<vmem>>, vector<1x4x8xf32>
    %119 = vector.shape_cast %118 : vector<1x4x8xf32> to vector<4x8xf32>
    %cst_93 = arith.constant dense<0.000000e+00> : vector<128x8xf32>
    %120 = tpu.matmul %117, %119, %cst_93 {dimension_numbers = #tpu.dot_dimension_numbers<[1], [0], [0], [1], [0, 0, 1, 1], [], []>} : vector<128x4xf32>, vector<4x8xf32>, vector<128x8xf32> -> vector<128x8xf32>
    %121 = arith.addf %111, %120 : vector<128x8xf32>
    %c1_i32_94 = arith.constant 1 : i32
    %122 = arith.addi %0, %c1_i32_94 : i32
    %c0_95 = arith.constant 0 : index
    %123 = arith.index_cast %122 : i32 to index
    %c1_96 = arith.constant 1 : index
    %c0_97 = arith.constant 0 : index
    %c0_98 = arith.constant 0 : index
    %124 = vector.load %arg2[%c0_95, %123, %c1_96, %c0_97, %c0_98] : memref<1x6x10x10x4xbf16, #tpu.memory_space<vmem>>, vector<1x2x8x8x4xbf16>
    %125 = vector.shape_cast %124 : vector<1x2x8x8x4xbf16> to vector<2x8x8x4xbf16>
    %126 = arith.extf %125 : vector<2x8x8x4xbf16> to vector<2x8x8x4xf32>
    %127 = vector.shape_cast %126 : vector<2x8x8x4xf32> to vector<128x4xf32>
    %c12 = arith.constant 12 : index
    %c0_99 = arith.constant 0 : index
    %c0_100 = arith.constant 0 : index
    %128 = vector.load %arg3[%c12, %c0_99, %c0_100] : memref<27x4x8xf32, #tpu.memory_space<vmem>>, vector<1x4x8xf32>
    %129 = vector.shape_cast %128 : vector<1x4x8xf32> to vector<4x8xf32>
    %cst_101 = arith.constant dense<0.000000e+00> : vector<128x8xf32>
    %130 = tpu.matmul %127, %129, %cst_101 {dimension_numbers = #tpu.dot_dimension_numbers<[1], [0], [0], [1], [0, 0, 1, 1], [], []>} : vector<128x4xf32>, vector<4x8xf32>, vector<128x8xf32> -> vector<128x8xf32>
    %131 = arith.addf %121, %130 : vector<128x8xf32>
    %c1_i32_102 = arith.constant 1 : i32
    %132 = arith.addi %0, %c1_i32_102 : i32
    %c0_103 = arith.constant 0 : index
    %133 = arith.index_cast %132 : i32 to index
    %c1_104 = arith.constant 1 : index
    %c1_105 = arith.constant 1 : index
    %c0_106 = arith.constant 0 : index
    %134 = vector.load %arg2[%c0_103, %133, %c1_104, %c1_105, %c0_106] : memref<1x6x10x10x4xbf16, #tpu.memory_space<vmem>>, vector<1x2x8x8x4xbf16>
    %135 = vector.shape_cast %134 : vector<1x2x8x8x4xbf16> to vector<2x8x8x4xbf16>
    %136 = arith.extf %135 : vector<2x8x8x4xbf16> to vector<2x8x8x4xf32>
    %137 = vector.shape_cast %136 : vector<2x8x8x4xf32> to vector<128x4xf32>
    %c13 = arith.constant 13 : index
    %c0_107 = arith.constant 0 : index
    %c0_108 = arith.constant 0 : index
    %138 = vector.load %arg3[%c13, %c0_107, %c0_108] : memref<27x4x8xf32, #tpu.memory_space<vmem>>, vector<1x4x8xf32>
    %139 = vector.shape_cast %138 : vector<1x4x8xf32> to vector<4x8xf32>
    %cst_109 = arith.constant dense<0.000000e+00> : vector<128x8xf32>
    %140 = tpu.matmul %137, %139, %cst_109 {dimension_numbers = #tpu.dot_dimension_numbers<[1], [0], [0], [1], [0, 0, 1, 1], [], []>} : vector<128x4xf32>, vector<4x8xf32>, vector<128x8xf32> -> vector<128x8xf32>
    %141 = arith.addf %131, %140 : vector<128x8xf32>
    %c1_i32_110 = arith.constant 1 : i32
    %142 = arith.addi %0, %c1_i32_110 : i32
    %c0_111 = arith.constant 0 : index
    %143 = arith.index_cast %142 : i32 to index
    %c1_112 = arith.constant 1 : index
    %c2_113 = arith.constant 2 : index
    %c0_114 = arith.constant 0 : index
    %144 = vector.load %arg2[%c0_111, %143, %c1_112, %c2_113, %c0_114] : memref<1x6x10x10x4xbf16, #tpu.memory_space<vmem>>, vector<1x2x8x8x4xbf16>
    %145 = vector.shape_cast %144 : vector<1x2x8x8x4xbf16> to vector<2x8x8x4xbf16>
    %146 = arith.extf %145 : vector<2x8x8x4xbf16> to vector<2x8x8x4xf32>
    %147 = vector.shape_cast %146 : vector<2x8x8x4xf32> to vector<128x4xf32>
    %c14 = arith.constant 14 : index
    %c0_115 = arith.constant 0 : index
    %c0_116 = arith.constant 0 : index
    %148 = vector.load %arg3[%c14, %c0_115, %c0_116] : memref<27x4x8xf32, #tpu.memory_space<vmem>>, vector<1x4x8xf32>
    %149 = vector.shape_cast %148 : vector<1x4x8xf32> to vector<4x8xf32>
    %cst_117 = arith.constant dense<0.000000e+00> : vector<128x8xf32>
    %150 = tpu.matmul %147, %149, %cst_117 {dimension_numbers = #tpu.dot_dimension_numbers<[1], [0], [0], [1], [0, 0, 1, 1], [], []>} : vector<128x4xf32>, vector<4x8xf32>, vector<128x8xf32> -> vector<128x8xf32>
    %151 = arith.addf %141, %150 : vector<128x8xf32>
    %c1_i32_118 = arith.constant 1 : i32
    %152 = arith.addi %0, %c1_i32_118 : i32
    %c0_119 = arith.constant 0 : index
    %153 = arith.index_cast %152 : i32 to index
    %c2_120 = arith.constant 2 : index
    %c0_121 = arith.constant 0 : index
    %c0_122 = arith.constant 0 : index
    %154 = vector.load %arg2[%c0_119, %153, %c2_120, %c0_121, %c0_122] : memref<1x6x10x10x4xbf16, #tpu.memory_space<vmem>>, vector<1x2x8x8x4xbf16>
    %155 = vector.shape_cast %154 : vector<1x2x8x8x4xbf16> to vector<2x8x8x4xbf16>
    %156 = arith.extf %155 : vector<2x8x8x4xbf16> to vector<2x8x8x4xf32>
    %157 = vector.shape_cast %156 : vector<2x8x8x4xf32> to vector<128x4xf32>
    %c15 = arith.constant 15 : index
    %c0_123 = arith.constant 0 : index
    %c0_124 = arith.constant 0 : index
    %158 = vector.load %arg3[%c15, %c0_123, %c0_124] : memref<27x4x8xf32, #tpu.memory_space<vmem>>, vector<1x4x8xf32>
    %159 = vector.shape_cast %158 : vector<1x4x8xf32> to vector<4x8xf32>
    %cst_125 = arith.constant dense<0.000000e+00> : vector<128x8xf32>
    %160 = tpu.matmul %157, %159, %cst_125 {dimension_numbers = #tpu.dot_dimension_numbers<[1], [0], [0], [1], [0, 0, 1, 1], [], []>} : vector<128x4xf32>, vector<4x8xf32>, vector<128x8xf32> -> vector<128x8xf32>
    %161 = arith.addf %151, %160 : vector<128x8xf32>
    %c1_i32_126 = arith.constant 1 : i32
    %162 = arith.addi %0, %c1_i32_126 : i32
    %c0_127 = arith.constant 0 : index
    %163 = arith.index_cast %162 : i32 to index
    %c2_128 = arith.constant 2 : index
    %c1_129 = arith.constant 1 : index
    %c0_130 = arith.constant 0 : index
    %164 = vector.load %arg2[%c0_127, %163, %c2_128, %c1_129, %c0_130] : memref<1x6x10x10x4xbf16, #tpu.memory_space<vmem>>, vector<1x2x8x8x4xbf16>
    %165 = vector.shape_cast %164 : vector<1x2x8x8x4xbf16> to vector<2x8x8x4xbf16>
    %166 = arith.extf %165 : vector<2x8x8x4xbf16> to vector<2x8x8x4xf32>
    %167 = vector.shape_cast %166 : vector<2x8x8x4xf32> to vector<128x4xf32>
    %c16 = arith.constant 16 : index
    %c0_131 = arith.constant 0 : index
    %c0_132 = arith.constant 0 : index
    %168 = vector.load %arg3[%c16, %c0_131, %c0_132] : memref<27x4x8xf32, #tpu.memory_space<vmem>>, vector<1x4x8xf32>
    %169 = vector.shape_cast %168 : vector<1x4x8xf32> to vector<4x8xf32>
    %cst_133 = arith.constant dense<0.000000e+00> : vector<128x8xf32>
    %170 = tpu.matmul %167, %169, %cst_133 {dimension_numbers = #tpu.dot_dimension_numbers<[1], [0], [0], [1], [0, 0, 1, 1], [], []>} : vector<128x4xf32>, vector<4x8xf32>, vector<128x8xf32> -> vector<128x8xf32>
    %171 = arith.addf %161, %170 : vector<128x8xf32>
    %c1_i32_134 = arith.constant 1 : i32
    %172 = arith.addi %0, %c1_i32_134 : i32
    %c0_135 = arith.constant 0 : index
    %173 = arith.index_cast %172 : i32 to index
    %c2_136 = arith.constant 2 : index
    %c2_137 = arith.constant 2 : index
    %c0_138 = arith.constant 0 : index
    %174 = vector.load %arg2[%c0_135, %173, %c2_136, %c2_137, %c0_138] : memref<1x6x10x10x4xbf16, #tpu.memory_space<vmem>>, vector<1x2x8x8x4xbf16>
    %175 = vector.shape_cast %174 : vector<1x2x8x8x4xbf16> to vector<2x8x8x4xbf16>
    %176 = arith.extf %175 : vector<2x8x8x4xbf16> to vector<2x8x8x4xf32>
    %177 = vector.shape_cast %176 : vector<2x8x8x4xf32> to vector<128x4xf32>
    %c17 = arith.constant 17 : index
    %c0_139 = arith.constant 0 : index
    %c0_140 = arith.constant 0 : index
    %178 = vector.load %arg3[%c17, %c0_139, %c0_140] : memref<27x4x8xf32, #tpu.memory_space<vmem>>, vector<1x4x8xf32>
    %179 = vector.shape_cast %178 : vector<1x4x8xf32> to vector<4x8xf32>
    %cst_141 = arith.constant dense<0.000000e+00> : vector<128x8xf32>
    %180 = tpu.matmul %177, %179, %cst_141 {dimension_numbers = #tpu.dot_dimension_numbers<[1], [0], [0], [1], [0, 0, 1, 1], [], []>} : vector<128x4xf32>, vector<4x8xf32>, vector<128x8xf32> -> vector<128x8xf32>
    %181 = arith.addf %171, %180 : vector<128x8xf32>
    %c2_i32_142 = arith.constant 2 : i32
    %182 = arith.addi %0, %c2_i32_142 : i32
    %c0_143 = arith.constant 0 : index
    %183 = arith.index_cast %182 : i32 to index
    %c0_144 = arith.constant 0 : index
    %c0_145 = arith.constant 0 : index
    %c0_146 = arith.constant 0 : index
    %184 = vector.load %arg2[%c0_143, %183, %c0_144, %c0_145, %c0_146] : memref<1x6x10x10x4xbf16, #tpu.memory_space<vmem>>, vector<1x2x8x8x4xbf16>
    %185 = vector.shape_cast %184 : vector<1x2x8x8x4xbf16> to vector<2x8x8x4xbf16>
    %186 = arith.extf %185 : vector<2x8x8x4xbf16> to vector<2x8x8x4xf32>
    %187 = vector.shape_cast %186 : vector<2x8x8x4xf32> to vector<128x4xf32>
    %c18 = arith.constant 18 : index
    %c0_147 = arith.constant 0 : index
    %c0_148 = arith.constant 0 : index
    %188 = vector.load %arg3[%c18, %c0_147, %c0_148] : memref<27x4x8xf32, #tpu.memory_space<vmem>>, vector<1x4x8xf32>
    %189 = vector.shape_cast %188 : vector<1x4x8xf32> to vector<4x8xf32>
    %cst_149 = arith.constant dense<0.000000e+00> : vector<128x8xf32>
    %190 = tpu.matmul %187, %189, %cst_149 {dimension_numbers = #tpu.dot_dimension_numbers<[1], [0], [0], [1], [0, 0, 1, 1], [], []>} : vector<128x4xf32>, vector<4x8xf32>, vector<128x8xf32> -> vector<128x8xf32>
    %191 = arith.addf %181, %190 : vector<128x8xf32>
    %c2_i32_150 = arith.constant 2 : i32
    %192 = arith.addi %0, %c2_i32_150 : i32
    %c0_151 = arith.constant 0 : index
    %193 = arith.index_cast %192 : i32 to index
    %c0_152 = arith.constant 0 : index
    %c1_153 = arith.constant 1 : index
    %c0_154 = arith.constant 0 : index
    %194 = vector.load %arg2[%c0_151, %193, %c0_152, %c1_153, %c0_154] : memref<1x6x10x10x4xbf16, #tpu.memory_space<vmem>>, vector<1x2x8x8x4xbf16>
    %195 = vector.shape_cast %194 : vector<1x2x8x8x4xbf16> to vector<2x8x8x4xbf16>
    %196 = arith.extf %195 : vector<2x8x8x4xbf16> to vector<2x8x8x4xf32>
    %197 = vector.shape_cast %196 : vector<2x8x8x4xf32> to vector<128x4xf32>
    %c19 = arith.constant 19 : index
    %c0_155 = arith.constant 0 : index
    %c0_156 = arith.constant 0 : index
    %198 = vector.load %arg3[%c19, %c0_155, %c0_156] : memref<27x4x8xf32, #tpu.memory_space<vmem>>, vector<1x4x8xf32>
    %199 = vector.shape_cast %198 : vector<1x4x8xf32> to vector<4x8xf32>
    %cst_157 = arith.constant dense<0.000000e+00> : vector<128x8xf32>
    %200 = tpu.matmul %197, %199, %cst_157 {dimension_numbers = #tpu.dot_dimension_numbers<[1], [0], [0], [1], [0, 0, 1, 1], [], []>} : vector<128x4xf32>, vector<4x8xf32>, vector<128x8xf32> -> vector<128x8xf32>
    %201 = arith.addf %191, %200 : vector<128x8xf32>
    %c2_i32_158 = arith.constant 2 : i32
    %202 = arith.addi %0, %c2_i32_158 : i32
    %c0_159 = arith.constant 0 : index
    %203 = arith.index_cast %202 : i32 to index
    %c0_160 = arith.constant 0 : index
    %c2_161 = arith.constant 2 : index
    %c0_162 = arith.constant 0 : index
    %204 = vector.load %arg2[%c0_159, %203, %c0_160, %c2_161, %c0_162] : memref<1x6x10x10x4xbf16, #tpu.memory_space<vmem>>, vector<1x2x8x8x4xbf16>
    %205 = vector.shape_cast %204 : vector<1x2x8x8x4xbf16> to vector<2x8x8x4xbf16>
    %206 = arith.extf %205 : vector<2x8x8x4xbf16> to vector<2x8x8x4xf32>
    %207 = vector.shape_cast %206 : vector<2x8x8x4xf32> to vector<128x4xf32>
    %c20 = arith.constant 20 : index
    %c0_163 = arith.constant 0 : index
    %c0_164 = arith.constant 0 : index
    %208 = vector.load %arg3[%c20, %c0_163, %c0_164] : memref<27x4x8xf32, #tpu.memory_space<vmem>>, vector<1x4x8xf32>
    %209 = vector.shape_cast %208 : vector<1x4x8xf32> to vector<4x8xf32>
    %cst_165 = arith.constant dense<0.000000e+00> : vector<128x8xf32>
    %210 = tpu.matmul %207, %209, %cst_165 {dimension_numbers = #tpu.dot_dimension_numbers<[1], [0], [0], [1], [0, 0, 1, 1], [], []>} : vector<128x4xf32>, vector<4x8xf32>, vector<128x8xf32> -> vector<128x8xf32>
    %211 = arith.addf %201, %210 : vector<128x8xf32>
    %c2_i32_166 = arith.constant 2 : i32
    %212 = arith.addi %0, %c2_i32_166 : i32
    %c0_167 = arith.constant 0 : index
    %213 = arith.index_cast %212 : i32 to index
    %c1_168 = arith.constant 1 : index
    %c0_169 = arith.constant 0 : index
    %c0_170 = arith.constant 0 : index
    %214 = vector.load %arg2[%c0_167, %213, %c1_168, %c0_169, %c0_170] : memref<1x6x10x10x4xbf16, #tpu.memory_space<vmem>>, vector<1x2x8x8x4xbf16>
    %215 = vector.shape_cast %214 : vector<1x2x8x8x4xbf16> to vector<2x8x8x4xbf16>
    %216 = arith.extf %215 : vector<2x8x8x4xbf16> to vector<2x8x8x4xf32>
    %217 = vector.shape_cast %216 : vector<2x8x8x4xf32> to vector<128x4xf32>
    %c21 = arith.constant 21 : index
    %c0_171 = arith.constant 0 : index
    %c0_172 = arith.constant 0 : index
    %218 = vector.load %arg3[%c21, %c0_171, %c0_172] : memref<27x4x8xf32, #tpu.memory_space<vmem>>, vector<1x4x8xf32>
    %219 = vector.shape_cast %218 : vector<1x4x8xf32> to vector<4x8xf32>
    %cst_173 = arith.constant dense<0.000000e+00> : vector<128x8xf32>
    %220 = tpu.matmul %217, %219, %cst_173 {dimension_numbers = #tpu.dot_dimension_numbers<[1], [0], [0], [1], [0, 0, 1, 1], [], []>} : vector<128x4xf32>, vector<4x8xf32>, vector<128x8xf32> -> vector<128x8xf32>
    %221 = arith.addf %211, %220 : vector<128x8xf32>
    %c2_i32_174 = arith.constant 2 : i32
    %222 = arith.addi %0, %c2_i32_174 : i32
    %c0_175 = arith.constant 0 : index
    %223 = arith.index_cast %222 : i32 to index
    %c1_176 = arith.constant 1 : index
    %c1_177 = arith.constant 1 : index
    %c0_178 = arith.constant 0 : index
    %224 = vector.load %arg2[%c0_175, %223, %c1_176, %c1_177, %c0_178] : memref<1x6x10x10x4xbf16, #tpu.memory_space<vmem>>, vector<1x2x8x8x4xbf16>
    %225 = vector.shape_cast %224 : vector<1x2x8x8x4xbf16> to vector<2x8x8x4xbf16>
    %226 = arith.extf %225 : vector<2x8x8x4xbf16> to vector<2x8x8x4xf32>
    %227 = vector.shape_cast %226 : vector<2x8x8x4xf32> to vector<128x4xf32>
    %c22 = arith.constant 22 : index
    %c0_179 = arith.constant 0 : index
    %c0_180 = arith.constant 0 : index
    %228 = vector.load %arg3[%c22, %c0_179, %c0_180] : memref<27x4x8xf32, #tpu.memory_space<vmem>>, vector<1x4x8xf32>
    %229 = vector.shape_cast %228 : vector<1x4x8xf32> to vector<4x8xf32>
    %cst_181 = arith.constant dense<0.000000e+00> : vector<128x8xf32>
    %230 = tpu.matmul %227, %229, %cst_181 {dimension_numbers = #tpu.dot_dimension_numbers<[1], [0], [0], [1], [0, 0, 1, 1], [], []>} : vector<128x4xf32>, vector<4x8xf32>, vector<128x8xf32> -> vector<128x8xf32>
    %231 = arith.addf %221, %230 : vector<128x8xf32>
    %c2_i32_182 = arith.constant 2 : i32
    %232 = arith.addi %0, %c2_i32_182 : i32
    %c0_183 = arith.constant 0 : index
    %233 = arith.index_cast %232 : i32 to index
    %c1_184 = arith.constant 1 : index
    %c2_185 = arith.constant 2 : index
    %c0_186 = arith.constant 0 : index
    %234 = vector.load %arg2[%c0_183, %233, %c1_184, %c2_185, %c0_186] : memref<1x6x10x10x4xbf16, #tpu.memory_space<vmem>>, vector<1x2x8x8x4xbf16>
    %235 = vector.shape_cast %234 : vector<1x2x8x8x4xbf16> to vector<2x8x8x4xbf16>
    %236 = arith.extf %235 : vector<2x8x8x4xbf16> to vector<2x8x8x4xf32>
    %237 = vector.shape_cast %236 : vector<2x8x8x4xf32> to vector<128x4xf32>
    %c23 = arith.constant 23 : index
    %c0_187 = arith.constant 0 : index
    %c0_188 = arith.constant 0 : index
    %238 = vector.load %arg3[%c23, %c0_187, %c0_188] : memref<27x4x8xf32, #tpu.memory_space<vmem>>, vector<1x4x8xf32>
    %239 = vector.shape_cast %238 : vector<1x4x8xf32> to vector<4x8xf32>
    %cst_189 = arith.constant dense<0.000000e+00> : vector<128x8xf32>
    %240 = tpu.matmul %237, %239, %cst_189 {dimension_numbers = #tpu.dot_dimension_numbers<[1], [0], [0], [1], [0, 0, 1, 1], [], []>} : vector<128x4xf32>, vector<4x8xf32>, vector<128x8xf32> -> vector<128x8xf32>
    %241 = arith.addf %231, %240 : vector<128x8xf32>
    %c2_i32_190 = arith.constant 2 : i32
    %242 = arith.addi %0, %c2_i32_190 : i32
    %c0_191 = arith.constant 0 : index
    %243 = arith.index_cast %242 : i32 to index
    %c2_192 = arith.constant 2 : index
    %c0_193 = arith.constant 0 : index
    %c0_194 = arith.constant 0 : index
    %244 = vector.load %arg2[%c0_191, %243, %c2_192, %c0_193, %c0_194] : memref<1x6x10x10x4xbf16, #tpu.memory_space<vmem>>, vector<1x2x8x8x4xbf16>
    %245 = vector.shape_cast %244 : vector<1x2x8x8x4xbf16> to vector<2x8x8x4xbf16>
    %246 = arith.extf %245 : vector<2x8x8x4xbf16> to vector<2x8x8x4xf32>
    %247 = vector.shape_cast %246 : vector<2x8x8x4xf32> to vector<128x4xf32>
    %c24 = arith.constant 24 : index
    %c0_195 = arith.constant 0 : index
    %c0_196 = arith.constant 0 : index
    %248 = vector.load %arg3[%c24, %c0_195, %c0_196] : memref<27x4x8xf32, #tpu.memory_space<vmem>>, vector<1x4x8xf32>
    %249 = vector.shape_cast %248 : vector<1x4x8xf32> to vector<4x8xf32>
    %cst_197 = arith.constant dense<0.000000e+00> : vector<128x8xf32>
    %250 = tpu.matmul %247, %249, %cst_197 {dimension_numbers = #tpu.dot_dimension_numbers<[1], [0], [0], [1], [0, 0, 1, 1], [], []>} : vector<128x4xf32>, vector<4x8xf32>, vector<128x8xf32> -> vector<128x8xf32>
    %251 = arith.addf %241, %250 : vector<128x8xf32>
    %c2_i32_198 = arith.constant 2 : i32
    %252 = arith.addi %0, %c2_i32_198 : i32
    %c0_199 = arith.constant 0 : index
    %253 = arith.index_cast %252 : i32 to index
    %c2_200 = arith.constant 2 : index
    %c1_201 = arith.constant 1 : index
    %c0_202 = arith.constant 0 : index
    %254 = vector.load %arg2[%c0_199, %253, %c2_200, %c1_201, %c0_202] : memref<1x6x10x10x4xbf16, #tpu.memory_space<vmem>>, vector<1x2x8x8x4xbf16>
    %255 = vector.shape_cast %254 : vector<1x2x8x8x4xbf16> to vector<2x8x8x4xbf16>
    %256 = arith.extf %255 : vector<2x8x8x4xbf16> to vector<2x8x8x4xf32>
    %257 = vector.shape_cast %256 : vector<2x8x8x4xf32> to vector<128x4xf32>
    %c25 = arith.constant 25 : index
    %c0_203 = arith.constant 0 : index
    %c0_204 = arith.constant 0 : index
    %258 = vector.load %arg3[%c25, %c0_203, %c0_204] : memref<27x4x8xf32, #tpu.memory_space<vmem>>, vector<1x4x8xf32>
    %259 = vector.shape_cast %258 : vector<1x4x8xf32> to vector<4x8xf32>
    %cst_205 = arith.constant dense<0.000000e+00> : vector<128x8xf32>
    %260 = tpu.matmul %257, %259, %cst_205 {dimension_numbers = #tpu.dot_dimension_numbers<[1], [0], [0], [1], [0, 0, 1, 1], [], []>} : vector<128x4xf32>, vector<4x8xf32>, vector<128x8xf32> -> vector<128x8xf32>
    %261 = arith.addf %251, %260 : vector<128x8xf32>
    %c2_i32_206 = arith.constant 2 : i32
    %262 = arith.addi %0, %c2_i32_206 : i32
    %c0_207 = arith.constant 0 : index
    %263 = arith.index_cast %262 : i32 to index
    %c2_208 = arith.constant 2 : index
    %c2_209 = arith.constant 2 : index
    %c0_210 = arith.constant 0 : index
    %264 = vector.load %arg2[%c0_207, %263, %c2_208, %c2_209, %c0_210] : memref<1x6x10x10x4xbf16, #tpu.memory_space<vmem>>, vector<1x2x8x8x4xbf16>
    %265 = vector.shape_cast %264 : vector<1x2x8x8x4xbf16> to vector<2x8x8x4xbf16>
    %266 = arith.extf %265 : vector<2x8x8x4xbf16> to vector<2x8x8x4xf32>
    %267 = vector.shape_cast %266 : vector<2x8x8x4xf32> to vector<128x4xf32>
    %c26 = arith.constant 26 : index
    %c0_211 = arith.constant 0 : index
    %c0_212 = arith.constant 0 : index
    %268 = vector.load %arg3[%c26, %c0_211, %c0_212] : memref<27x4x8xf32, #tpu.memory_space<vmem>>, vector<1x4x8xf32>
    %269 = vector.shape_cast %268 : vector<1x4x8xf32> to vector<4x8xf32>
    %cst_213 = arith.constant dense<0.000000e+00> : vector<128x8xf32>
    %270 = tpu.matmul %267, %269, %cst_213 {dimension_numbers = #tpu.dot_dimension_numbers<[1], [0], [0], [1], [0, 0, 1, 1], [], []>} : vector<128x4xf32>, vector<4x8xf32>, vector<128x8xf32> -> vector<128x8xf32>
    %271 = arith.addf %261, %270 : vector<128x8xf32>
    %c0_214 = arith.constant 0 : index
    %c0_215 = arith.constant 0 : index
    %272 = vector.load %arg4[%c0_214, %c0_215] : memref<1x8xf32, #tpu.memory_space<vmem>>, vector<1x8xf32>
    %273 = vector.broadcast %272 : vector<1x8xf32> to vector<128x8xf32>
    %274 = arith.mulf %271, %273 : vector<128x8xf32>
    %c0_216 = arith.constant 0 : index
    %c0_217 = arith.constant 0 : index
    %275 = vector.load %arg5[%c0_216, %c0_217] : memref<1x8xf32, #tpu.memory_space<vmem>>, vector<1x8xf32>
    %276 = vector.broadcast %275 : vector<1x8xf32> to vector<128x8xf32>
    %277 = arith.addf %274, %276 : vector<128x8xf32>
    %cst_218 = arith.constant 0.000000e+00 : f32
    %278 = vector.broadcast %cst_218 : f32 to vector<128x8xf32>
    %279 = arith.maximumf %277, %278 : vector<128x8xf32>
    %280 = tpu.transpose %279, [1, 0] : vector<128x8xf32> -> vector<8x128xf32>
    %c0_219 = arith.constant 0 : index
    %c0_220 = arith.constant 0 : index
    %c0_221 = arith.constant 0 : index
    %281 = vector.load %arg6[%c0_219, %c0_220, %c0_221] : memref<1x8x128xf32, #tpu.memory_space<vmem>>, vector<1x8x128xf32>
    %282 = vector.shape_cast %281 : vector<1x8x128xf32> to vector<8x128xf32>
    %283 = vector.shape_cast %280 : vector<8x128xf32> to vector<1x8x128xf32>
    tpu.vector_store %arg6[%c0_219, %c0_220, %c0_221], %283 {strides = array<i32>} : memref<1x8x128xf32, #tpu.memory_space<vmem>>, vector<1x8x128xf32>,
    return
  }
  func.func @transform_0(%arg0: i32, %arg1: i32) -> (i32, i32, i32, i32, i32) {
    %c0_i32 = arith.constant 0 : i32
    %c0_i32_0 = arith.constant 0 : i32
    %c0_i32_1 = arith.constant 0 : i32
    %c0_i32_2 = arith.constant 0 : i32
    %c0_i32_3 = arith.constant 0 : i32
    return %arg0, %c0_i32, %c0_i32_0, %c0_i32_1, %c0_i32_2 : i32, i32, i32, i32, i32
  }
  func.func @transform_1(%arg0: i32, %arg1: i32) -> (i32, i32, i32) {
    %c0_i32 = arith.constant 0 : i32
    %c0_i32_0 = arith.constant 0 : i32
    %c0_i32_1 = arith.constant 0 : i32
    %c0_i32_2 = arith.constant 0 : i32
    return %c0_i32, %c0_i32_0, %c0_i32_1 : i32, i32, i32
  }
  func.func @transform_2(%arg0: i32, %arg1: i32) -> (i32, i32) {
    %c0_i32 = arith.constant 0 : i32
    %c0_i32_0 = arith.constant 0 : i32
    %c0_i32_1 = arith.constant 0 : i32
    return %c0_i32, %c0_i32_0 : i32, i32
  }
  func.func @transform_3(%arg0: i32, %arg1: i32) -> (i32, i32) {
    %c0_i32 = arith.constant 0 : i32
    %c0_i32_0 = arith.constant 0 : i32
    %c0_i32_1 = arith.constant 0 : i32
    return %c0_i32, %c0_i32_0 : i32, i32
  }
  func.func @transform_4(%arg0: i32, %arg1: i32) -> (i32, i32, i32) {
    %c0_i32 = arith.constant 0 : i32
    %c0_i32_0 = arith.constant 0 : i32
    return %arg0, %c0_i32, %arg1 : i32, i32, i32
  }
}

</mosaic_0001>

<bundles_post_ra>
// kernel: my_conv3d_forward.1
= control target key start
LH: loop header
LB: loop body
LE: loop exit
PB: predicated region body
PF: predicated region fallthrough
CT: control target
= control target key end

     0   :  { %s11039_s15 = smov 0   ;;  %s11041_s16 = smov 0   ;;  %s13843_s0 = inlined_call_operand.vmem [shape: bf16[2,6,10,10,4], index: 0, kind: input, shape index: {}]   ;;  %s13844_s1 = inlined_call_operand.vmem [shape: f32[27,4,8], index: 1, kind: input, shape index: {}]   ;;  %s13845_s2 = inlined_call_operand.vmem [shape: f32[1,8], index: 2, kind: input, shape index: {}]   ;;  %s13846_s3 = inlined_call_operand.vmem [shape: f32[1,8], index: 3, kind: input, shape index: {}]   ;;  %s13847_s4 = inlined_call_operand.vmem [shape: f32[2,8,256], index: 4, kind: output, shape index: {}]  }
   0x1   :  { %s11043_s17 = smov 0   ;;  %s11045_s18 = smov 0  }
   0x2   :  { %s11047_s19 = smov 0  }
   0x3 LB: > { %s23_s20 = sadd.s32 1, %s11004_s17  ;;  %s26_s21 = sadd.s32 1, %s11008_s18  ;;  %s11012_s19 = sphi %s11047_s19, %s14_s19   ;;  %s11008_s18 = sphi %s11045_s18, %s13925_s18   ;;  %s11004_s17 = sphi %s11043_s17, %s13924_s17   ;;  %s11000_s16 = sphi %s11041_s16, %s13923_s16   ;;  %s10996_s15 = sphi %s11039_s15, %s13922_s15  }
   0x4   : > { %p24_p0 = scmp.ge.s32.totalorder %s23_s20, 2  ;;  %p8326_p1 = scmp.ge.s32.totalorder %s11012_s19, 1 }
   0x5   : > { %p176_p2 = scmp.lt.s32.totalorder %s11012_s19, 5 }
   0x6   : > { %s13927_s20 = smov (%p24_p0, %s23_s20), 0  ;;  %s13929_s21 = smov (!%p24_p0, %s26_s21), %s11008_s18 }
   0x7   : > { %p177_p3 = pnand %p8326_p1, %p176_p2  ;;  %p28_p4 = scmp.ge.s32.totalorder %s13929_s21, 2 }
   0x8   : > { %vm403_vm0 = vcmask (!%p177_p3), 1043456   ;;  %v8813_v0 = vld [vmem:[%s13844_s1 + $0x34] sm:$0xf] (!%p177_p3)  ;;  %v8333_v1 = vld [vmem:[%s13844_s1 + $0x4] sm:$0xf] (!%p177_p3)  ;;  %p205_p5 = scmp.lt.s32.totalorder (!%p177_p3), %s11000_s16, 1 }
   0x9   : > { %s13931_s21 = smov (%p28_p4, %s13929_s21), 0  ;;  %180 = sbr.rel (%p177_p3) target bundleno = 785 (0x311), region = 36 }
   0xa   : > { %10150 = vmatprep.subr.msk.mxu0 (!%p177_p3), %vm403_vm0, %v8813_v0  ;;  %9812 = vmatprep.subr.msk.mxu1 (!%p177_p3), %vm403_vm0, %v8333_v1  ;;  %v11082_v2 = vld [vmem:[%s13844_s1 + $0x38] sm:$0xf] (!%p177_p3)  ;;  %v254_v3 = vld [vmem:[%s13844_s1] sm:$0xf] (!%p177_p3)  ;;  %s9352_s30 = smul.u32 (!%p177_p3), 160, %s10996_s15  ;;  %vm319_vm1 = vcmask (!%p177_p3), 1046528  }
   0xb   : > { %10151 = vmatpush3.msk.msra.mxu0 (!%p177_p3), %vm403_vm0, %v8813_v0  ;;  %9813 = vmatpush3.msk.msra.mxu1 (!%p177_p3), %vm403_vm0, %v8333_v1  ;;  %vm370_vm2 = vcmask (!%p177_p3), 31744   ;;  %v11165_v39 = vld [vmem:[%s13844_s1 + $0x8] sm:$0xf] (!%p177_p3)  ;;  %v11181_v46 = vld [vmem:[%s13844_s1 + $0x3c] sm:$0xf] (!%p177_p3)  ;;  %vm780_vm3 = vcmask (!%p177_p3), 1045504  }
   0xc   : > { %10176 = vmatprep.subr.msk.mxu0 (!%p177_p3), %vm403_vm0, %v11082_v2  ;;  %9838 = vmatprep.subr.msk.mxu1 (!%p177_p3), %vm403_vm0, %v254_v3  ;;  %p212_p6 = scmp.lt.s32.totalorder (!%p177_p3), %s10996_s15, 1 }
  0x10   : > { %s13933_s16 = smov (!%p205_p5, %s11000_s16), 1  ;;  %s13935_s15 = smov (!%p212_p6, %s10996_s15), 1 }
  0x11   : > { %s10932_s5 = smul.u32 480, %s13933_s16  ;;  %s8328_s6 = sshll.u32 %s13933_s16, 1 }
  0x12   : > { %s215_s7 = sadd.s32 %s8328_s6, %s13935_s15 }
  0x13   : > { %s209_s8 = scalar_lea.vmem %s13843_s0, %s10932_s5 }
  0x14   : > { %s11099_s9 = scalar_lea.vmem %s209_s8, %s9352_s30  ;;  %s8329_s8 = sshll.u32 %s215_s7, 3 }
  0x15   : > { %v11102_v4 = vld [vmem:[%s11099_s9] ss:$88 sps:$4 sm:$0xff]   ;;  %v11105_v5 = vld [vmem:[%s11099_s9 + $0x4] sm:$0x1]  ;;  %v11108_v6 = vld [vmem:[%s11099_s9 + $0x5c] sm:$0x1]  ;;  %s217_s12 = scalar_lea.vmem %s13847_s4, %s8329_s8 }
  0x16   : > { %v238_v7 = vunpack.c.l.bf16 %v11102_v4  ;;  %v13856_v8 = vunpack.c.l.bf16 %v11105_v5  ;;  %v3964_v9 = vunpack.c.h.bf16 %v11102_v4  ;;  %v3965_v10 = vunpack.c.l.bf16 %v11108_v6  ;;  %v11115_v11 = vld [vmem:[%s11099_s9 + $0x8] ss:$88 sps:$4 sm:$0xff]   ;;  %v11118_v12 = vld [vmem:[%s11099_s9 + $0xc] sm:$0x1]  ;;  %v8784_v13 = vld [vmem:[%s11099_s9 + $0x64] sm:$0x1] }
  0x17   : > { %v239_v14 = vunpack.c.l.bf16 %v11115_v11  ;;  %v13855_v15 = vunpack.c.l.bf16 %v11118_v12  ;;  %v3966_v16 = vunpack.c.h.bf16 %v11115_v11  ;;  %v3967_v17 = vunpack.c.l.bf16 %v8784_v13  ;;  %v11125_v18 = vld [vmem:[%s11099_s9 + $0x10] ss:$88 sps:$4 sm:$0xff]   ;;  %v11128_v19 = vld [vmem:[%s11099_s9 + $0x14] sm:$0x1]  ;;  %v11131_v20 = vld [vmem:[%s11099_s9 + $0x6c] sm:$0x1] }
  0x18   : > { %v320_v21 = vrot.slane %v238_v7, 1  ;;  %v321_v22 = vrot.slane %v13856_v8, 1  ;;  %v4028_v23 = vrot.slane %v3964_v9, 1  ;;  %v4029_v24 = vrot.slane %v3965_v10, 1  ;;  %v11140_v25 = vld [vmem:[%s11099_s9 + $0x18] ss:$88 sps:$4 sm:$0xff]  }
  0x19   : > { %v323_v26 = vrot.slane %v239_v14, 1  ;;  %v324_v27 = vrot.slane %v13855_v15, 1  ;;  %v4031_v28 = vrot.slane %v3966_v16, 1  ;;  %v11147_v29 = vld [vmem:[%s11099_s9 + $0x1c] sm:$0x1]  ;;  %v4032_v32 = vrot.slane %v3967_v17, 1 }
  0x1a   : > { %v322_v30 = vsel %vm319_vm1, %v320_v21, %v321_v22  ;;  %v4030_v31 = vsel %vm319_vm1, %v4028_v23, %v4029_v24  ;;  %v11151_v33 = vrot.slane %v3967_v17, 2  ;;  %v240_v35 = vunpack.c.l.bf16 %v11125_v18  ;;  %v11160_v38 = vld [vmem:[%s11099_s9 + $0x74] sm:$0x1]  ;;  %v11173_v44 = vld [vmem:[%s11099_s9 + $0x20] ss:$88 sps:$4 sm:$0xff]  }
  0x1b   : > { %9814 = vmatprep.mubr.msk.f32.mxu1 %vm370_vm2, %v322_v30  ;;  %10152 = vmatprep.mubr.msk.f32.mxu0 %vm370_vm2, %v4030_v31  ;;  %v325_v34 = vsel %vm319_vm1, %v323_v26, %v324_v27  ;;  %v13853_v36 = vunpack.c.l.bf16 %v11128_v19  ;;  %v3968_v37 = vunpack.c.h.bf16 %v11125_v18  ;;  %v4033_v40 = vsel %vm319_vm1, %v4031_v28, %v4032_v32  ;;  %v11176_v45 = vld [vmem:[%s11099_s9 + $0x24] sm:$0x1]  ;;  %v11190_v51 = vld [vmem:[%s11099_s9 + $0x7c] sm:$0x1]  ;;  %v11203_v56 = vld [vmem:[%s11099_s9 + $0x28] ss:$88 sps:$4 sm:$0xff]  }
  0x1c   : > { %9815 = vmatmul.mubr.msk.f32.vlgmr.msra.gmra.mrb[0].mxu1 %vm370_vm2, %v325_v34  ;;  %v3969_v41 = vunpack.c.l.bf16 %v11131_v20  ;;  %v241_v42 = vunpack.c.l.bf16 %v11140_v25  ;;  %v13852_v43 = vunpack.c.l.bf16 %v11147_v29  ;;  %10153 = vmatmul.mubr.msk.f32.vlgmr.msra.gmra.mrb[0].mxu0 %vm370_vm2, %v4033_v40  ;;  %v326_v47 = vrot.slane %v240_v35, 1  ;;  %v11211_v61 = vld [vmem:[%s11099_s9 + $0x2c] sm:$0x1]  ;;  %v11233_v17 = vld [vmem:[%s11099_s9 + $0x30] ss:$88 sps:$4 sm:$0xff]  }
  0x1d   : > { %v327_v48 = vrot.slane %v13853_v36, 1  ;;  %v4034_v49 = vrot.slane %v3968_v37, 1  ;;  %v3970_v50 = vunpack.c.h.bf16 %v11140_v25  ;;  %9839 = vmatpush3.msk.msra.mxu1 %vm403_vm0, %v254_v3  ;;  %10177 = vmatpush3.msk.msra.mxu0 %vm403_vm0, %v11082_v2  ;;  %v3971_v55 = vunpack.c.l.bf16 %v11160_v38  ;;  %v11222_v2 = vld [vmem:[%s11099_s9 + $0x84] sm:$0x1]  ;;  %v11236_v21 = vld [vmem:[%s11099_s9 + $0x34] sm:$0x1] }
  0x1e   : > { %v4035_v52 = vrot.slane %v3969_v41, 1  ;;  %v329_v53 = vrot.slane %v241_v42, 1  ;;  %v330_v54 = vrot.slane %v13852_v43, 1  ;;  %9864 = vmatprep.subr.msk.mxu1 %vm403_vm0, %v11165_v39  ;;  %v242_v59 = vunpack.c.l.bf16 %v11173_v44  ;;  %10202 = vmatprep.subr.msk.mxu0 %vm403_vm0, %v11181_v46  ;;  %v11242_v27 = vld [vmem:[%s11099_s9 + $0x8c] sm:$0x1] }
  0x1f   : > { %v328_v57 = vsel %vm319_vm1, %v326_v47, %v327_v48  ;;  %v4037_v58 = vrot.slane %v3970_v50, 1  ;;  %v13851_v60 = vunpack.c.l.bf16 %v11176_v45  ;;  %v4038_v0 = vrot.slane %v3971_v55, 1  ;;  %v11252_v34 = vld [vmem:[%s11099_s9 + $0x38] ss:$88 sps:$4 sm:$0xff]   ;;  %v11333_v15 = vld [vmem:[%s11099_s9 + $0x6c] sm:$0x1] }
  0x20   : > { %9817 = vmatprep.mubr.msk.f32.mxu1 %vm370_vm2, %v328_v57  ;;  %v4036_v62 = vsel %vm319_vm1, %v4034_v49, %v4035_v52  ;;  %v331_v63 = vsel %vm319_vm1, %v329_v53, %v330_v54  ;;  %v3972_v1 = vunpack.c.h.bf16 %v11173_v44  ;;  %v332_v3 = vrot.slane %v242_v59, 1  ;;  %v11260_v49 = vld [vmem:[%s11099_s9 + $0x3c] sm:$0x1]  ;;  %v11268_v57 = vld [vmem:[%s11099_s9 + $0x94] sm:$0x1] }
  0x21   : > { %10155 = vmatprep.mubr.msk.f32.mxu0 %vm370_vm2, %v4036_v62  ;;  %9818 = vmatmul.mubr.msk.f32.gmra.mrb[2].mxu1 %vm370_vm2, %v331_v63  ;;  %v333_v9 = vrot.slane %v13851_v60, 1  ;;  %v3973_v13 = vunpack.c.l.bf16 %v11190_v51  ;;  %v243_v16 = vunpack.c.l.bf16 %v11203_v56  ;;  %v4039_v22 = vsel %vm319_vm1, %v4037_v58, %v4038_v0  ;;  %v11362_v20 = vld [vmem:[%s13844_s1 + $0x40] sm:$0xf]  ;;  %v11399_v51 = vld [vmem:[%s11099_s9 + $0x84] sm:$0x1] }
  0x22   : > { %v4040_v23 = vrot.slane %v3972_v1, 1  ;;  %v13849_v24 = vunpack.c.l.bf16 %v11211_v61  ;;  %v3974_v26 = vunpack.c.h.bf16 %v11203_v56  ;;  %10156 = vmatmul.mubr.msk.f32.gmra.mrb[2].mxu0 %vm370_vm2, %v4039_v22  ;;  %v3975_v32 = vunpack.c.l.bf16 %v11222_v2  ;;  %v11278_v1 = vld [vmem:[%s11099_s9 + $0x50] ss:$8 sps:$4 sm:$0xff]   ;;  %v8836_v38 = vld [vmem:[%s11099_s9 + $0x80] sm:$0xe] }
  0x23   : > { %v334_v28 = vsel %vm319_vm1, %v332_v3, %v333_v9  ;;  %v4041_v30 = vrot.slane %v3973_v13, 1  ;;  %v335_v31 = vrot.slane %v243_v16, 1  ;;  %v244_v47 = vunpack.c.l.bf16 %v11233_v17  ;;  %v11281_v3 = vld [vmem:[%s11099_s9 + $0x54] sm:$0x1] }
  0x24   : > { %9820 = vmatprep.mubr.msk.f32.mxu1 %vm370_vm2, %v334_v28  ;;  %v336_v37 = vrot.slane %v13849_v24, 1  ;;  %v4043_v40 = vrot.slane %v3974_v26, 1  ;;  %v13848_v48 = vunpack.c.l.bf16 %v11236_v21  ;;  %v4044_v52 = vrot.slane %v3975_v32, 1  ;;  %v8831_v28 = vld [vmem:[%s11099_s9 + $0x58] sm:$0xe] }
  0x25   : > { %v4042_v50 = vsel %vm319_vm1, %v4040_v23, %v4041_v30  ;;  %v3976_v53 = vunpack.c.h.bf16 %v11233_v17  ;;  %v3977_v54 = vunpack.c.l.bf16 %v11242_v27  ;;  %v338_v62 = vrot.slane %v244_v47, 1  ;;  %v8872_v17 = vld [vmem:[%s11099_s9 + $0x80] ss:$8 sps:$4 sm:$0xff]  }
  0x26   : > { %10158 = vmatprep.mubr.msk.f32.mxu0 %vm370_vm2, %v4042_v50  ;;  %v337_v58 = vsel %vm319_vm1, %v335_v31, %v336_v37  ;;  %v339_v63 = vrot.slane %v13848_v48, 1  ;;  %v245_v0 = vunpack.c.l.bf16 %v11252_v34  ;;  %v4045_v9 = vsel %vm319_vm1, %v4043_v40, %v4044_v52  ;;  %v11296_v50 = vld [vmem:[%s11099_s9 + $0x5c] sm:$0x1] }
  0x27   : > { %9821 = vmatmul.mubr.msk.f32.gmra.mrb[4].mxu1 %vm370_vm2, %v337_v58  ;;  %v4046_v22 = vrot.slane %v3976_v53, 1  ;;  %v4047_v23 = vrot.slane %v3977_v54, 1  ;;  %v13850_v26 = vunpack.c.l.bf16 %v11260_v49  ;;  %10159 = vmatmul.mubr.msk.f32.gmra.mrb[4].mxu0 %vm370_vm2, %v4045_v9  ;;  %v3978_v37 = vunpack.c.h.bf16 %v11252_v34  ;;  %v11306_v9 = vld [vmem:[%s11099_s9 + $0x60] ss:$8 sps:$4 sm:$0xff]   ;;  %v11566_v34 = vld [vmem:[%s13844_s1 + $0x44] sm:$0xf] }
  0x28   : > { %v340_v30 = vsel %vm319_vm1, %v338_v62, %v339_v63  ;;  %v341_v31 = vrot.slane %v245_v0, 1  ;;  %v3979_v40 = vunpack.c.l.bf16 %v11268_v57  ;;  %v246_v58 = vunpack.c.l.bf16 %v11278_v1  ;;  %v8832_v63 = vld [vmem:[%s11099_s9 + $0x60] sm:$0xe] }
  0x29   : > { %9823 = vmatprep.mubr.msk.f32.mxu1 %vm370_vm2, %v340_v30  ;;  %v4048_v52 = vsel %vm319_vm1, %v4046_v22, %v4047_v23  ;;  %v342_v53 = vrot.slane %v13850_v26, 1  ;;  %v13854_v62 = vunpack.c.l.bf16 %v11281_v3  ;;  %v4049_v48 = vrot.slane %v3978_v37, 1  ;;  %v11314_v23 = vld [vmem:[%s11099_s9 + $0x64] sm:$0x1] }
  0x2a   : > { %10161 = vmatprep.mubr.msk.f32.mxu0 %vm370_vm2, %v4048_v52  ;;  %v4050_v24 = vrot.slane %v3979_v40, 1  ;;  %v4290_v30 = vunpack.c.l.bf16 %v8831_v28  ;;  %v4323_v22 = vrot.slane %v3965_v10, 2  ;;  %v344_v60 = vrot.slane %v246_v58, 1  ;;  %v8833_v52 = vld [vmem:[%s11099_s9 + $0x68] sm:$0xe] }
  0x2b   : > { %v343_v26 = vsel %vm319_vm1, %v341_v31, %v342_v53  ;;  %v345_v43 = vrot.slane %v13854_v62, 1  ;;  %v13873_v37 = vunpack.c.h.bf16 %v11278_v1  ;;  %v13857_v28 = vunpack.c.l.bf16 %v11296_v50 }
  0x2c   : > { %9824 = vmatmul.mubr.msk.f32.gmra.mrb[6].mxu1 %vm370_vm2, %v343_v26  ;;  %v4051_v6 = vsel %vm319_vm1, %v4049_v48, %v4050_v24  ;;  %v4322_v10 = vrot.slane %v4290_v30, 2  ;;  %v4291_v36 = vunpack.c.l.bf16 %v8832_v63  ;;  %v13858_v62 = vunpack.c.l.bf16 %v11306_v9  ;;  %v11341_v30 = vld [vmem:[%s11099_s9 + $0x70] ss:$8 sps:$4 sm:$0xff]  }
  0x2d   : > { %10162 = vmatmul.mubr.msk.f32.gmra.mrb[6].mxu0 %vm370_vm2, %v4051_v6  ;;  %v346_v31 = vsel %vm319_vm1, %v344_v60, %v345_v43  ;;  %v347_v53 = vrot.slane %v13873_v37, 1  ;;  %v13861_v26 = vunpack.c.l.bf16 %v11314_v23  ;;  %v348_v48 = vrot.slane %v13857_v28, 1  ;;  %v8834_v60 = vld [vmem:[%s11099_s9 + $0x70] sm:$0xe]  ;;  %v8846_v37 = vld [vmem:[%s11099_s9 + $0xe0] sm:$0xe] }
  0x2e   : > { %9826 = vmatprep.mubr.msk.f32.mxu1 %vm370_vm2, %v346_v31  ;;  %v4324_v24 = vsel %vm780_vm3, %v4322_v10, %v4323_v22  ;;  %v4325_v63 = vrot.slane %v4291_v36, 2  ;;  %v4292_v43 = vunpack.c.l.bf16 %v8833_v52  ;;  %v350_v6 = vrot.slane %v13858_v62, 1  ;;  %v11352_v31 = vld [vmem:[%s11099_s9 + $0x74] sm:$0x1]  ;;  %v8835_v62 = vld [vmem:[%s11099_s9 + $0x78] sm:$0xe] }
  0x2f   : > { %10178 = vmatprep.mubr.msk.f32.mxu0 %vm370_vm2, %v4324_v24  ;;  %v351_v8 = vrot.slane %v13861_v26, 1  ;;  %v4329_v22 = vrot.slane %v3969_v41, 2  ;;  %v13870_v10 = vunpack.c.h.bf16 %v11306_v9  ;;  %v349_v36 = vsel %vm319_vm1, %v347_v53, %v348_v48 }
  0x30   : > { %v4327_v52 = vsel %vm780_vm3, %v4325_v63, %v11151_v33  ;;  %v4328_v24 = vrot.slane %v4292_v43, 2  ;;  %v13859_v28 = vunpack.c.l.bf16 %v11333_v15  ;;  %9827 = vmatmul.mubr.msk.f32.gmra.mrb[8].mxu1 %vm370_vm2, %v349_v36  ;;  %v4293_v33 = vunpack.c.l.bf16 %v8834_v60  ;;  %v11372_v63 = vld [vmem:[%s11099_s9 + $0x7c] sm:$0x1] }
  0x31   : > { %10179 = vmatmul.mubr.msk.f32.vlgmr.msra.gmra.mrb[0].mxu0 %vm370_vm2, %v4327_v52  ;;  %v352_v41 = vsel %vm319_vm1, %v350_v6, %v351_v8  ;;  %v353_v53 = vrot.slane %v13870_v10, 1  ;;  %v4332_v48 = vrot.slane %v3971_v55, 2  ;;  %v13862_v6 = vunpack.c.l.bf16 %v11341_v30  ;;  %v11474_v10 = vld [vmem:[%s11099_s9 + $0xd4] sm:$0x1] }
  0x32   : > { %10203 = vmatpush3.msk.msra.mxu0 %vm403_vm0, %v11181_v46  ;;  %9829 = vmatprep.mubr.msk.f32.mxu1 %vm370_vm2, %v352_v41  ;;  %v4330_v43 = vsel %vm780_vm3, %v4328_v24, %v4329_v22  ;;  %v354_v8 = vrot.slane %v13859_v28, 1  ;;  %v13860_v60 = vunpack.c.l.bf16 %v11352_v31  ;;  %v4331_v55 = vrot.slane %v4293_v33, 2  ;;  %v11388_v22 = vld [vmem:[%s11099_s9 + $0x80] ss:$8 sps:$4 sm:$0xff]  }
  0x33   : > { %10181 = vmatprep.mubr.msk.f32.mxu0 %vm370_vm2, %v4330_v43  ;;  %v4294_v36 = vunpack.c.l.bf16 %v8835_v62  ;;  %v4335_v46 = vrot.slane %v3973_v13, 2  ;;  %v13869_v52 = vunpack.c.h.bf16 %v11341_v30  ;;  %10228 = vmatprep.subr.msk.mxu0 %vm403_vm0, %v11362_v20  ;;  %v356_v41 = vrot.slane %v13862_v6, 1  ;;  %v8837_v13 = vld [vmem:[%s11099_s9 + $0x88] sm:$0xe] }
  0x34   : > { %v355_v24 = vsel %vm319_vm1, %v353_v53, %v354_v8  ;;  %v357_v33 = vrot.slane %v13860_v60, 1  ;;  %v13863_v62 = vunpack.c.l.bf16 %v11372_v63  ;;  %v4333_v43 = vsel %vm780_vm3, %v4331_v55, %v4332_v48  ;;  %v11414_v48 = vld [vmem:[%s11099_s9 + $0x8c] sm:$0x1] }
  0x35   : > { %9830 = vmatmul.mubr.msk.f32.gmra.mrb[10].mxu1 %vm370_vm2, %v355_v24  ;;  %v4334_v28 = vrot.slane %v4294_v36, 2  ;;  %v359_v53 = vrot.slane %v13869_v52, 1  ;;  %v4295_v8 = vunpack.c.l.bf16 %v8836_v38  ;;  %10182 = vmatmul.mubr.msk.f32.gmra.mrb[2].mxu0 %vm370_vm2, %v4333_v43  ;;  %v4338_v24 = vrot.slane %v3975_v32, 2  ;;  %v11421_v43 = vld [vmem:[%s11099_s9 + $0xac] sm:$0x1] }
  0x36   : > { %v358_v60 = vsel %vm319_vm1, %v356_v41, %v357_v33  ;;  %v360_v26 = vrot.slane %v13863_v62, 1  ;;  %v13865_v6 = vunpack.c.l.bf16 %v11388_v22  ;;  %v13864_v36 = vunpack.c.l.bf16 %v11399_v51  ;;  %v8838_v33 = vld [vmem:[%s11099_s9 + $0x90] sm:$0xe] }
  0x37   : > { %9832 = vmatprep.mubr.msk.f32.mxu1 %vm370_vm2, %v358_v60  ;;  %v4336_v55 = vsel %vm780_vm3, %v4334_v28, %v4335_v46  ;;  %v4337_v38 = vrot.slane %v4295_v8, 2  ;;  %v4296_v41 = vunpack.c.l.bf16 %v8837_v13  ;;  %v4341_v28 = vrot.slane %v3977_v54, 2  ;;  %v8839_v46 = vld [vmem:[%s11099_s9 + $0xa8] sm:$0xe]  ;;  %v8840_v62 = vld [vmem:[%s11099_s9 + $0xb0] sm:$0xe] }
  0x38   : > { %10184 = vmatprep.mubr.msk.f32.mxu0 %vm370_vm2, %v4336_v55  ;;  %v361_v2 = vsel %vm319_vm1, %v359_v53, %v360_v26  ;;  %v362_v32 = vrot.slane %v13865_v6, 1  ;;  %v13866_v60 = vunpack.c.h.bf16 %v11388_v22  ;;  %v363_v8 = vrot.slane %v13864_v36, 1  ;;  %v11437_v53 = vld [vmem:[%s11099_s9 + $0xb4] sm:$0x1] }
  0x39   : > { %9833 = vmatmul.mubr.msk.f32.gmra.mrb[12].mxu1 %vm370_vm2, %v361_v2  ;;  %v4339_v13 = vsel %vm780_vm3, %v4337_v38, %v4338_v24  ;;  %v4340_v55 = vrot.slane %v4296_v41, 2  ;;  %v13867_v26 = vunpack.c.l.bf16 %v11414_v48  ;;  %v4297_v54 = vunpack.c.l.bf16 %v8838_v33  ;;  %v11447_v2 = vld [vmem:[%s11099_s9 + $0xbc] sm:$0x1]  ;;  %v8841_v41 = vld [vmem:[%s11099_s9 + $0xb8] sm:$0xe] }
  0x3a   : > { %10185 = vmatmul.mubr.msk.f32.gmra.mrb[4].mxu0 %vm370_vm2, %v4339_v13  ;;  %v365_v27 = vrot.slane %v13866_v60, 1  ;;  %v4344_v24 = vrot.slane %v3979_v40, 2  ;;  %v13868_v38 = vunpack.c.l.bf16 %v11421_v43  ;;  %v364_v36 = vsel %vm319_vm1, %v362_v32, %v363_v8  ;;  %v11460_v8 = vld [vmem:[%s11099_s9 + $0xc4] sm:$0x1] }
  0x3b   : > { %v4342_v6 = vsel %vm780_vm3, %v4340_v55, %v4341_v28  ;;  %v366_v13 = vrot.slane %v13867_v26, 1  ;;  %v4298_v60 = vunpack.c.l.bf16 %v8839_v46  ;;  %9835 = vmatprep.mubr.msk.f32.mxu1 %vm370_vm2, %v364_v36  ;;  %v4343_v57 = vrot.slane %v4297_v54, 2  ;;  %v8842_v28 = vld [vmem:[%s11099_s9 + $0xc0] sm:$0xe]  ;;  %v8843_v54 = vld [vmem:[%s11099_s9 + $0xc8] sm:$0xe] }
  0x3c   : > { %10187 = vmatprep.mubr.msk.f32.mxu0 %vm370_vm2, %v4342_v6  ;;  %v4347_v40 = vrot.slane %v13868_v38, 2  ;;  %v13872_v33 = vunpack.c.l.bf16 %v11437_v53  ;;  %v4299_v32 = vunpack.c.l.bf16 %v8840_v62  ;;  %v13871_v46 = vunpack.c.l.bf16 %v11447_v2  ;;  %v11466_v6 = vld [vmem:[%s11099_s9 + $0xcc] sm:$0x1] }
  0x3d   : > { %v367_v55 = vsel %vm319_vm1, %v365_v27, %v366_v13  ;;  %v4346_v26 = vrot.slane %v4298_v60, 2  ;;  %v4300_v36 = vunpack.c.l.bf16 %v8841_v41  ;;  %v4345_v38 = vsel %vm780_vm3, %v4343_v57, %v4344_v24  ;;  %v8844_v27 = vld [vmem:[%s11099_s9 + $0xd0] sm:$0xe]  ;;  %v11486_v57 = vld [vmem:[%s11099_s9 + $0xdc] sm:$0x1] }
  0x3e   : > { %9836 = vmatmul.mubr.msk.f32.gmra.mrb[14].mxu1 %vm370_vm2, %v367_v55  ;;  %v4349_v52 = vrot.slane %v4299_v32, 2  ;;  %v4350_v62 = vrot.slane %v13872_v33, 2  ;;  %10188 = vmatmul.mubr.msk.f32.gmra.mrb[6].mxu0 %vm370_vm2, %v4345_v38  ;;  %v4353_v24 = vrot.slane %v13871_v46, 2  ;;  %v13878_v13 = vunpack.c.l.bf16 %v11460_v8  ;;  %v8845_v55 = vld [vmem:[%s11099_s9 + $0xd8] sm:$0xe] }
  0x3f   : > { %9840 = vmatprep.mubr.msk.f32.mxu1 %vm370_vm2, %v238_v7  ;;  %v4348_v60 = vsel %vm780_vm3, %v4346_v26, %v4347_v40  ;;  %v4352_v41 = vrot.slane %v4300_v36, 2  ;;  %v4301_v32 = vunpack.c.l.bf16 %v8842_v28  ;;  %v13877_v4 = vunpack.c.l.bf16 %v11466_v6  ;;  %v11497_v33 = vld [vmem:[%s11099_s9 + $0xe4] sm:$0x1] }
  0x40   : > { %10190 = vmatprep.mubr.msk.f32.mxu0 %vm370_vm2, %v4348_v60  ;;  %v4351_v38 = vsel %vm780_vm3, %v4349_v52, %v4350_v62  ;;  %v4302_v7 = vunpack.c.l.bf16 %v8843_v54  ;;  %v4356_v40 = vrot.slane %v13878_v13, 2  ;;  %v13876_v36 = vunpack.c.l.bf16 %v11474_v10  ;;  %v11509_v60 = vld [vmem:[%s13844_s1 + $0xc] sm:$0xf] }
  0x41   : > { %v4354_v26 = vsel %vm780_vm3, %v4352_v41, %v4353_v24  ;;  %v4303_v46 = vunpack.c.l.bf16 %v8844_v27  ;;  %v4355_v52 = vrot.slane %v4301_v32, 2  ;;  %v4359_v54 = vrot.slane %v13877_v4, 2 }
  0x42   : > { %9841 = vmatmul.mubr.msk.f32.vlgmr.msra.gmra.mrb[0].mxu1 %vm370_vm2, %v239_v14  ;;  %v4358_v28 = vrot.slane %v4302_v7, 2  ;;  %v13875_v62 = vunpack.c.l.bf16 %v11486_v57  ;;  %10191 = vmatmul.mubr.msk.f32.gmra.mrb[8].mxu0 %vm370_vm2, %v4351_v38  ;;  %v4304_v14 = vunpack.c.l.bf16 %v8845_v55  ;;  %v4362_v41 = vrot.slane %v13876_v36, 2  ;;  %v8868_v7 = vld [vmem:[%s11099_s9 + $0x60] ss:$8 sps:$4 sm:$0xff]   ;;  %v11857_v36 = vld [vmem:[%s11099_s9 + $0xec] sm:$0x1] }
  0x43   : > { %9843 = vmatprep.mubr.msk.f32.mxu1 %vm370_vm2, %v240_v35  ;;  %v4361_v11 = vrot.slane %v4303_v46, 2  ;;  %10193 = vmatprep.mubr.msk.f32.mxu0 %vm370_vm2, %v4354_v26  ;;  %v4357_v27 = vsel %vm780_vm3, %v4355_v52, %v4356_v40  ;;  %v13874_v24 = vunpack.c.l.bf16 %v11497_v33  ;;  %v4305_v32 = vunpack.c.l.bf16 %v8846_v37  ;;  %v733_v40 = vld [vmem:[%s11099_s9 + $0x8] sm:$0xe]  ;;  %v8874_v52 = vld [vmem:[%s11099_s9 + $0x90] ss:$8 sps:$4 sm:$0xff]  }
  0x44   : > { %9865 = vmatpush3.msk.msra.mxu1 %vm403_vm0, %v11165_v39  ;;  %v4360_v18 = vsel %vm780_vm3, %v4358_v28, %v4359_v54  ;;  %v4364_v38 = vrot.slane %v4304_v14, 2  ;;  %v4365_v35 = vrot.slane %v13875_v62, 2  ;;  %v4587_v44 = vunpack.c.l.bf16 %v8868_v7  ;;  %v734_v28 = vld [vmem:[%s11099_s9 + $0x10] sm:$0xe] }
  0x45   : > { %9890 = vmatprep.subr.msk.mxu1 %vm403_vm0, %v11509_v60  ;;  %v4363_v39 = vsel %vm780_vm3, %v4361_v11, %v4362_v41  ;;  %v4367_v37 = vrot.slane %v4305_v32, 2  ;;  %v4368_v46 = vrot.slane %v13874_v24, 2  ;;  %v4588_v56 = vunpack.c.h.bf16 %v8868_v7 }
  0x46   : > { %9844 = vmatmul.mubr.msk.f32.gmra.mrb[2].mxu1 %vm370_vm2, %v241_v42  ;;  %10194 = vmatmul.mubr.msk.f32.gmra.mrb[10].mxu0 %vm370_vm2, %v4357_v27  ;;  %v4366_v25 = vsel %vm780_vm3, %v4364_v38, %v4365_v35  ;;  %v13885_v55 = vunpack.c.h.bf16 %v11278_v1  ;;  %v4591_v1 = vunpack.c.l.bf16 %v8872_v17  ;;  %v13887_v54 = vunpack.c.h.bf16 %v11306_v9  ;;  %v735_v27 = vld [vmem:[%s11099_s9 + $0x18] sm:$0xe] }
  0x47   : > { %9846 = vmatprep.mubr.msk.f32.mxu1 %vm370_vm2, %v242_v59  ;;  %10196 = vmatprep.mubr.msk.f32.mxu0 %vm370_vm2, %v4360_v18  ;;  %v4369_v42 = vsel %vm780_vm3, %v4367_v37, %v4368_v46  ;;  %v8870_v59 = vld [vmem:[%s11099_s9 + $0x70] ss:$8 sps:$4 sm:$0xff]   ;;  %v4592_v11 = vunpack.c.h.bf16 %v8872_v17  ;;  %v749_v14 = vunpack.c.l.bf16 %v733_v40  ;;  %v4593_v41 = vunpack.c.l.bf16 %v8874_v52  ;;  %v8878_v17 = vld [vmem:[%s11099_s9 + $0xc0] ss:$8 sps:$4 sm:$0xff]  }
  0x48   : > { %v13889_v18 = vunpack.c.l.bf16 %v11105_v5  ;;  %v750_v35 = vunpack.c.l.bf16 %v734_v28  ;;  %v13890_v37 = vunpack.c.h.bf16 %v11341_v30  ;;  %v751_v46 = vunpack.c.l.bf16 %v735_v27 }
  0x49   : > { %v4594_v5 = vunpack.c.h.bf16 %v8874_v52  ;;  %v11615_v52 = vld [vmem:[%s11099_s9 + $0xd0] ss:$8 sps:$4 sm:$0xff]   ;;  %v13896_v27 = vunpack.c.l.bf16 %v11176_v45  ;;  %v4880_v4 = vunpack.c.l.bf16 %v11857_v36 }
  0x4a   : > { %9847 = vmatmul.mubr.msk.f32.gmra.mrb[4].mxu1 %vm370_vm2, %v243_v16  ;;  %10197 = vmatmul.mubr.msk.f32.gmra.mrb[12].mxu0 %vm370_vm2, %v4363_v39  ;;  %v4589_v16 = vunpack.c.l.bf16 %v8870_v59  ;;  %v782_v38 = vrot.slane %v13889_v18, 2  ;;  %v736_v39 = vld [vmem:[%s11099_s9 + $0x20] sm:$0xe] }
  0x4b   : > { %9849 = vmatprep.mubr.msk.f32.mxu1 %vm370_vm2, %v244_v47  ;;  %10199 = vmatprep.mubr.msk.f32.mxu0 %vm370_vm2, %v4366_v25  ;;  %v732_v47 = vld [vmem:[%s11099_s9] sm:$0xe]  ;;  %v13891_v25 = vunpack.c.l.bf16 %v11118_v12 }
  0x4c   : > { %v748_v26 = vunpack.c.l.bf16 %v732_v47  ;;  %v752_v47 = vunpack.c.l.bf16 %v736_v39  ;;  %v8902_v18 = vld [vmem:[%s11099_s9 + $0x60] ss:$8 sps:$4 sm:$0xff]  }
  0x4d   : > { %v785_v7 = vrot.slane %v13891_v25, 2  ;;  %v11632_v39 = vld [vmem:[%s11099_s9 + $0xe0] ss:$8 sps:$4 sm:$0xff]  }
  0x4e   : > { %9850 = vmatmul.mubr.msk.f32.gmra.mrb[6].mxu1 %vm370_vm2, %v245_v0  ;;  %10200 = vmatmul.mubr.msk.f32.gmra.mrb[14].mxu0 %vm370_vm2, %v4369_v42  ;;  %v13886_v0 = vunpack.c.l.bf16 %v11306_v9  ;;  %v781_v32 = vrot.slane %v748_v26, 2  ;;  %v8876_v9 = vld [vmem:[%s11099_s9 + $0xb0] ss:$8 sps:$4 sm:$0xff]   ;;  %v13892_v42 = vunpack.c.l.bf16 %v11388_v22  ;;  %v13895_v26 = vunpack.c.l.bf16 %v11147_v29 }
  0x4f   : > { %9852 = vmatprep.mubr.msk.f32.mxu1 %vm370_vm2, %v246_v58  ;;  %10204 = vmatprep.mubr.msk.f32.mxu0 %vm370_vm2, %v4587_v44  ;;  %v4590_v58 = vunpack.c.h.bf16 %v8870_v59  ;;  %v4595_v44 = vunpack.c.l.bf16 %v8876_v9  ;;  %v784_v59 = vrot.slane %v749_v14, 2  ;;  %v4596_v28 = vunpack.c.h.bf16 %v8876_v9 }
  0x50   : > { %v791_v40 = vrot.slane %v13895_v26, 2  ;;  %v793_v14 = vrot.slane %v752_v47, 2  ;;  %v4599_v9 = vunpack.c.l.bf16 %v11615_v52  ;;  %v13898_v47 = vunpack.c.l.bf16 %v11236_v21 }
  0x52   : > { %9853 = vmatmul.mubr.msk.f32.gmra.mrb[8].mxu1 %vm370_vm2, %v13885_v55  ;;  %10205 = vmatmul.mubr.msk.f32.vlgmr.msra.gmra.mrb[0].mxu0 %vm370_vm2, %v4588_v56  ;;  %v787_v56 = vrot.slane %v750_v35, 2  ;;  %v737_v55 = vld [vmem:[%s11099_s9 + $0x28] sm:$0xe]  ;;  %v4598_v35 = vunpack.c.h.bf16 %v8878_v17 }
  0x53   : > { %9855 = vmatprep.mubr.msk.f32.mxu1 %vm370_vm2, %v13886_v0  ;;  %10229 = vmatpush3.msk.msra.mxu0 %vm403_vm0, %v11362_v20  ;;  %v13888_v20 = vunpack.c.l.bf16 %v11341_v30  ;;  %v783_v30 = vsel %vm780_vm3, %v781_v32, %v782_v38  ;;  %v738_v0 = vld [vmem:[%s11099_s9 + $0x30] sm:$0xe]  ;;  %v11628_v38 = vld [vmem:[%s11099_s9 + $0x64] sm:$0x1] }
  0x54   : > { %10207 = vmatprep.mubr.msk.f32.mxu0 %vm370_vm2, %v4589_v16  ;;  %10254 = vmatprep.subr.msk.mxu0 %vm403_vm0, %v11566_v34  ;;  %v13893_v16 = vunpack.c.l.bf16 %v11128_v19  ;;  %v786_v19 = vsel %vm780_vm3, %v784_v59, %v785_v7  ;;  %v754_v32 = vunpack.c.l.bf16 %v738_v0  ;;  %v4601_v0 = vunpack.c.l.bf16 %v11632_v39 }
  0x56   : > { %9856 = vmatmul.mubr.msk.f32.gmra.mrb[10].mxu1 %vm370_vm2, %v13887_v54  ;;  %10208 = vmatmul.mubr.msk.f32.gmra.mrb[2].mxu0 %vm370_vm2, %v4590_v58  ;;  %v788_v12 = vrot.slane %v13893_v16, 2  ;;  %v13894_v58 = vunpack.c.h.bf16 %v11388_v22  ;;  %v4597_v54 = vunpack.c.l.bf16 %v8878_v17  ;;  %v753_v22 = vunpack.c.l.bf16 %v737_v55 }
  0x57   : > { %9858 = vmatprep.mubr.msk.f32.mxu1 %vm370_vm2, %v13888_v20  ;;  %10210 = vmatprep.mubr.msk.f32.mxu0 %vm370_vm2, %v4591_v1  ;;  %v790_v1 = vrot.slane %v751_v46, 2  ;;  %v739_v20 = vld [vmem:[%s11099_s9 + $0x38] sm:$0xe]  ;;  %v13897_v46 = vunpack.c.l.bf16 %v11211_v61  ;;  %v4850_v16 = vunpack.c.l.bf16 %v11628_v38  ;;  %v799_v17 = vrot.slane %v754_v32, 2 }
  0x58   : > { %v789_v29 = vsel %vm780_vm3, %v787_v56, %v788_v12  ;;  %v755_v7 = vunpack.c.l.bf16 %v739_v20  ;;  %v796_v59 = vrot.slane %v753_v22, 2  ;;  %v4849_v56 = vunpack.c.l.bf16 %v8902_v18  ;;  %v742_v12 = vld [vmem:[%s11099_s9 + $0x60] sm:$0xe]  ;;  %v743_v20 = vld [vmem:[%s11099_s9 + $0x68] sm:$0xe] }
  0x59   : > { %v792_v45 = vsel %vm780_vm3, %v790_v1, %v791_v40  ;;  %v797_v25 = vrot.slane %v13897_v46, 2  ;;  %v800_v55 = vrot.slane %v13898_v47, 2  ;;  %v13899_v1 = vunpack.c.l.bf16 %v11260_v49  ;;  %v744_v46 = vld [vmem:[%s11099_s9 + $0x70] sm:$0xe] }
  0x5a   : > { %9859 = vmatmul.mubr.msk.f32.gmra.mrb[12].mxu1 %vm370_vm2, %v13890_v37  ;;  %10211 = vmatmul.mubr.msk.f32.gmra.mrb[4].mxu0 %vm370_vm2, %v4592_v11  ;;  %v740_v11 = vld [vmem:[%s11099_s9 + $0x50] sm:$0xe]  ;;  %v802_v21 = vrot.slane %v755_v7, 2  ;;  %v758_v49 = vunpack.c.l.bf16 %v742_v12  ;;  %v4602_v32 = vunpack.c.h.bf16 %v11632_v39  ;;  %v13902_v12 = vunpack.c.l.bf16 %v11314_v23 }
  0x5b   : > { %9861 = vmatprep.mubr.msk.f32.mxu1 %vm370_vm2, %v13892_v42  ;;  %10213 = vmatprep.mubr.msk.f32.mxu0 %vm370_vm2, %v4593_v41  ;;  %v794_v41 = vrot.slane %v13896_v27, 2  ;;  %v11637_v37 = vld [vmem:[%s13844_s1 + $0x10] sm:$0xf]  ;;  %v756_v42 = vunpack.c.l.bf16 %v740_v11  ;;  %v803_v26 = vrot.slane %v13899_v1, 2  ;;  %v798_v11 = vsel %vm780_vm3, %v796_v59, %v797_v25  ;;  %v8910_v25 = vld [vmem:[%s11099_s9 + $0x80] ss:$8 sps:$4 sm:$0xff]  }
  0x5c   : > { %v759_v59 = vunpack.c.l.bf16 %v743_v20 }
  0x5d   : > { %v795_v61 = vsel %vm780_vm3, %v793_v14, %v794_v41  ;;  %v4914_v14 = vrot.slane %v4850_v16, 1  ;;  %v11681_v41 = vld [vmem:[%s11099_s9 + $0x7c] sm:$0x1]  ;;  %v804_v39 = vsel %vm780_vm3, %v802_v21, %v803_v26  ;;  %v11708_v26 = vld [vmem:[%s11099_s9 + $0x8c] sm:$0x1] }
  0x5e   : > { %9862 = vmatmul.mubr.msk.f32.gmra.mrb[14].mxu1 %vm370_vm2, %v13894_v58  ;;  %10214 = vmatmul.mubr.msk.f32.gmra.mrb[6].mxu0 %vm370_vm2, %v4594_v5  ;;  %v741_v5 = vld [vmem:[%s11099_s9 + $0x58] sm:$0xe]  ;;  %v4856_v1 = vunpack.c.l.bf16 %v11681_v41 }
  0x5f   : > { %9866 = vmatprep.mubr.msk.f32.mxu1 %vm370_vm2, %v783_v30  ;;  %10216 = vmatprep.mubr.msk.f32.mxu0 %vm370_vm2, %v4595_v44  ;;  %v11645_v44 = vld [vmem:[%s11099_s9 + $0x6c] sm:$0x1]  ;;  %v4600_v30 = vunpack.c.h.bf16 %v11615_v52  ;;  %v11660_v58 = vld [vmem:[%s11099_s9 + $0x70] ss:$8 sps:$4 sm:$0xff]   ;;  %v757_v40 = vunpack.c.l.bf16 %v741_v5  ;;  %v4851_v52 = vunpack.c.h.bf16 %v8902_v18  ;;  %v13901_v18 = vunpack.c.l.bf16 %v11296_v50 }
  0x60   : > { %v4853_v27 = vunpack.c.l.bf16 %v11660_v58 }
  0x61   : > { %v808_v7 = vrot.slane %v757_v40, 2  ;;  %v745_v40 = vld [vmem:[%s11099_s9 + $0x78] sm:$0xe] }
  0x62   : > { %9867 = vmatmul.mubr.msk.f32.vlgmr.msra.gmra.mrb[0].mxu1 %vm370_vm2, %v786_v19  ;;  %10217 = vmatmul.mubr.msk.f32.gmra.mrb[8].mxu0 %vm370_vm2, %v4596_v28  ;;  %v4852_v19 = vunpack.c.l.bf16 %v11645_v44  ;;  %v11666_v28 = vld [vmem:[%s11099_s9 + $0x74] sm:$0x1]  ;;  %v4919_v47 = vrot.slane %v4853_v27, 1  ;;  %v8914_v27 = vld [vmem:[%s11099_s9 + $0x90] ss:$8 sps:$4 sm:$0xff]  }
  0x63   : > { %9869 = vmatprep.mubr.msk.f32.mxu1 %vm370_vm2, %v789_v29  ;;  %10219 = vmatprep.mubr.msk.f32.mxu0 %vm370_vm2, %v4597_v54  ;;  %v805_v54 = vrot.slane %v756_v42, 2  ;;  %v4913_v29 = vrot.slane %v4849_v56, 1  ;;  %v4916_v42 = vrot.slane %v4851_v52, 1  ;;  %v811_v56 = vrot.slane %v758_v49, 2  ;;  %v11909_v44 = vld [vmem:[%s11099_s9 + $0x78] ss:$8 sps:$4 sm:$0xff]  }
  0x64   : > { %9891 = vmatpush3.msk.msra.mxu1 %vm403_vm0, %v11509_v60  ;;  %v13900_v60 = vunpack.c.l.bf16 %v11281_v3  ;;  %v801_v3 = vsel %vm780_vm3, %v799_v17, %v800_v55  ;;  %v4917_v5 = vrot.slane %v4852_v19, 1  ;;  %v4855_v55 = vunpack.c.h.bf16 %v11660_v58 }
  0x65   : > { %9916 = vmatprep.subr.msk.mxu1 %vm403_vm0, %v11637_v37  ;;  %v4915_v17 = vsel %vm319_vm1, %v4913_v29, %v4914_v14  ;;  %v4857_v52 = vunpack.c.l.bf16 %v8910_v25  ;;  %v13903_v49 = vunpack.c.l.bf16 %v11333_v15  ;;  %v4859_v29 = vunpack.c.h.bf16 %v8910_v25  ;;  %v747_v25 = vld [vmem:[%s11099_s9 + $0x88] sm:$0xe] }
  0x66   : > { %9870 = vmatmul.mubr.msk.f32.gmra.mrb[2].mxu1 %vm370_vm2, %v792_v45  ;;  %v806_v22 = vrot.slane %v13900_v60, 2  ;;  %10220 = vmatmul.mubr.msk.f32.gmra.mrb[10].mxu0 %vm370_vm2, %v4598_v35  ;;  %v809_v35 = vrot.slane %v13901_v18, 2  ;;  %v4854_v45 = vunpack.c.l.bf16 %v11666_v28  ;;  %v4918_v58 = vsel %vm319_vm1, %v4916_v42, %v4917_v5 }
  0x67   : > { %9872 = vmatprep.mubr.msk.f32.mxu1 %vm370_vm2, %v795_v61  ;;  %10222 = vmatprep.mubr.msk.f32.mxu0 %vm370_vm2, %v4599_v9  ;;  %v11694_v9 = vld [vmem:[%s11099_s9 + $0x84] sm:$0x1]  ;;  %v812_v61 = vrot.slane %v13902_v12, 2  ;;  %v815_v20 = vrot.slane %v13903_v49, 2  ;;  %v4860_v14 = vunpack.c.l.bf16 %v11708_v26  ;;  %v4922_v18 = vrot.slane %v4855_v55, 1 }
  0x68   : > { %v807_v50 = vsel %vm780_vm3, %v805_v54, %v806_v22  ;;  %v4920_v23 = vrot.slane %v4854_v45, 1  ;;  %v4858_v21 = vunpack.c.l.bf16 %v11694_v9  ;;  %v746_v54 = vld [vmem:[%s11099_s9 + $0x80] sm:$0xe]  ;;  %v810_v60 = vsel %vm780_vm3, %v808_v7, %v809_v35  ;;  %v11745_v55 = vld [vmem:[%s11099_s9 + $0x8] ss:$168 sps:$4 sm:$0xff]  }
  0x69   : > { %v814_v22 = vrot.slane %v759_v59, 2  ;;  %v4923_v15 = vrot.slane %v4856_v1, 1  ;;  %v13904_v35 = vunpack.c.l.bf16 %v11352_v31  ;;  %v762_v7 = vunpack.c.l.bf16 %v746_v54 }
  0x6a   : > { %9873 = vmatmul.mubr.msk.f32.gmra.mrb[4].mxu1 %vm370_vm2, %v798_v11  ;;  %10223 = vmatmul.mubr.msk.f32.gmra.mrb[12].mxu0 %vm370_vm2, %v4600_v30  ;;  %v760_v30 = vunpack.c.l.bf16 %v744_v46  ;;  %v761_v11 = vunpack.c.l.bf16 %v745_v40  ;;  %v4921_v42 = vsel %vm319_vm1, %v4919_v47, %v4920_v23  ;;  %v4925_v59 = vrot.slane %v4857_v52, 1  ;;  %v11758_v52 = vld [vmem:[%s11099_s9 + $0xb4] sm:$0x1] }
  0x6b   : > { %9875 = vmatprep.mubr.msk.f32.mxu1 %vm370_vm2, %v801_v3  ;;  %10225 = vmatprep.mubr.msk.f32.mxu0 %vm370_vm2, %v4601_v0  ;;  %v813_v0 = vsel %vm780_vm3, %v811_v56, %v812_v61  ;;  %v11724_v3 = vld [vmem:[%s11099_s9 + $0x94] sm:$0x1]  ;;  %v818_v46 = vrot.slane %v13904_v35, 2  ;;  %v13905_v56 = vunpack.c.l.bf16 %v11372_v63  ;;  %v4861_v12 = vunpack.c.l.bf16 %v8914_v27 }
  0x6c   : > { %v817_v5 = vrot.slane %v760_v30, 2  ;;  %v4862_v61 = vunpack.c.l.bf16 %v11724_v3  ;;  %v820_v47 = vrot.slane %v761_v11, 2  ;;  %v4928_v40 = vrot.slane %v4859_v29, 1  ;;  %v11770_v11 = vld [vmem:[%s11099_s9 + $0x10] ss:$168 sps:$4 sm:$0xff]  }
  0x6d   : > { %v821_v31 = vrot.slane %v13905_v56, 2  ;;  %v4929_v63 = vrot.slane %v4860_v14, 1  ;;  %v13906_v23 = vunpack.c.l.bf16 %v11399_v51  ;;  %v823_v54 = vrot.slane %v762_v7, 2  ;;  %v11780_v7 = vld [vmem:[%s11099_s9 + $0x18] ss:$168 sps:$4 sm:$0xff]  }
  0x6e   : > { %9876 = vmatmul.mubr.msk.f32.gmra.mrb[6].mxu1 %vm370_vm2, %v804_v39  ;;  %10226 = vmatmul.mubr.msk.f32.gmra.mrb[14].mxu0 %vm370_vm2, %v4602_v32  ;;  %v4926_v32 = vrot.slane %v4858_v21, 1  ;;  %v11738_v39 = vld [vmem:[%s11099_s9 + $0x9c] sm:$0x1]  ;;  %v4924_v51 = vsel %vm319_vm1, %v4922_v18, %v4923_v15  ;;  %v4931_v29 = vrot.slane %v4861_v12, 1  ;;  %v4865_v35 = vunpack.c.h.bf16 %v11745_v55 }
  0x6f   : > { %9878 = vmatprep.mubr.msk.f32.mxu1 %vm370_vm2, %v807_v50  ;;  %10230 = vmatprep.mubr.msk.f32.mxu0 %vm370_vm2, %v4915_v17  ;;  %v816_v50 = vsel %vm780_vm3, %v814_v22, %v815_v20  ;;  %v11750_v17 = vld [vmem:[%s13844_s1 + $0x48] sm:$0xf]  ;;  %v824_v30 = vrot.slane %v13906_v23, 2  ;;  %v4863_v22 = vunpack.c.h.bf16 %v8914_v27  ;;  %v4864_v49 = vunpack.c.l.bf16 %v11738_v39 }
  0x70   : > { %v819_v20 = vsel %vm780_vm3, %v817_v5, %v818_v46  ;;  %v4932_v27 = vrot.slane %v4862_v61, 1  ;;  %v822_v18 = vsel %vm780_vm3, %v820_v47, %v821_v31  ;;  %v4930_v15 = vsel %vm319_vm1, %v4928_v40, %v4929_v63  ;;  %v11803_v47 = vld [vmem:[%s11099_s9 + $0x20] ss:$168 sps:$4 sm:$0xff]   ;;  %v11806_v40 = vld [vmem:[%s11099_s9 + $0xcc] sm:$0x1] }
  0x71   : > { %v13907_v46 = vunpack.c.l.bf16 %v11414_v48  ;;  %v825_v5 = vsel %vm780_vm3, %v823_v54, %v824_v30  ;;  %v4867_v56 = vunpack.c.h.bf16 %v11770_v11  ;;  %v4869_v31 = vunpack.c.h.bf16 %v11780_v7 }
  0x72   : > { %9879 = vmatmul.mubr.msk.f32.gmra.mrb[8].mxu1 %vm370_vm2, %v810_v60  ;;  %10231 = vmatmul.mubr.msk.f32.vlgmr.msra.gmra.mrb[0].mxu0 %vm370_vm2, %v4918_v58  ;;  %v763_v60 = vunpack.c.l.bf16 %v747_v25  ;;  %v4927_v58 = vsel %vm319_vm1, %v4925_v59, %v4926_v32  ;;  %v11783_v25 = vld [vmem:[%s11099_s9 + $0xc4] sm:$0x1]  ;;  %v4934_v32 = vrot.slane %v4863_v22, 1  ;;  %v4933_v63 = vsel %vm319_vm1, %v4931_v29, %v4932_v27  ;;  %v11817_v22 = vld [vmem:[%s11099_s9 + $0xd4] sm:$0x1] }
  0x73   : > { %9881 = vmatprep.mubr.msk.f32.mxu1 %vm370_vm2, %v813_v0  ;;  %10255 = vmatpush3.msk.msra.mxu0 %vm403_vm0, %v11566_v34  ;;  %v11773_v0 = vld [vmem:[%s11099_s9 + $0xbc] sm:$0x1]  ;;  %v4866_v34 = vunpack.c.l.bf16 %v11758_v52  ;;  %v4870_v12 = vunpack.c.l.bf16 %v11783_v25  ;;  %v4937_v23 = vrot.slane %v4865_v35, 1  ;;  %v1046_v54 = vunpack.c.l.bf16 %v11745_v55 }
  0x74   : > { %10233 = vmatprep.mubr.msk.f32.mxu0 %vm370_vm2, %v4921_v42  ;;  %10280 = vmatprep.subr.msk.mxu0 %vm403_vm0, %v11750_v17  ;;  %v827_v42 = vrot.slane %v13907_v46, 2  ;;  %v826_v59 = vrot.slane %v763_v60, 2  ;;  %v4868_v48 = vunpack.c.l.bf16 %v11773_v0  ;;  %v11814_v60 = vld [vmem:[%s11099_s9 + $0x28] ss:$168 sps:$4 sm:$0xff]   ;;  %v4872_v55 = vunpack.c.l.bf16 %v11806_v40 }
  0x75   : > { %v4938_v30 = vrot.slane %v4866_v34, 1  ;;  %v4940_v29 = vrot.slane %v4867_v56, 1  ;;  %v4943_v35 = vrot.slane %v4869_v31, 1  ;;  %v4873_v46 = vunpack.c.h.bf16 %v11814_v60  ;;  %v11841_v56 = vld [vmem:[%s11099_s9 + $0xe4] sm:$0x1] }
  0x76   : > { %9882 = vmatmul.mubr.msk.f32.gmra.mrb[10].mxu1 %vm370_vm2, %v816_v50  ;;  %10234 = vmatmul.mubr.msk.f32.gmra.mrb[2].mxu0 %vm370_vm2, %v4924_v51  ;;  %v4935_v50 = vrot.slane %v4864_v49, 1  ;;  %v828_v51 = vsel %vm780_vm3, %v826_v59, %v827_v42  ;;  %v4941_v27 = vrot.slane %v4868_v48, 1  ;;  %v4874_v42 = vunpack.c.l.bf16 %v11817_v22  ;;  %v11835_v59 = vld [vmem:[%s11099_s9 + $0xdc] sm:$0x1] }
  0x77   : > { %9884 = vmatprep.mubr.msk.f32.mxu1 %vm370_vm2, %v819_v20  ;;  %10236 = vmatprep.mubr.msk.f32.mxu0 %vm370_vm2, %v4927_v58  ;;  %v4871_v58 = vunpack.c.h.bf16 %v11803_v47  ;;  %v1048_v31 = vunpack.c.l.bf16 %v11780_v7  ;;  %v4876_v24 = vunpack.c.l.bf16 %v11835_v59  ;;  %v4949_v62 = vrot.slane %v4873_v46, 1 }
  0x78   : > { %v4936_v20 = vsel %vm319_vm1, %v4934_v32, %v4935_v50  ;;  %v1047_v32 = vunpack.c.l.bf16 %v11770_v11  ;;  %v8393_v50 = vld [vmem:[%s11099_s9 + $0x38] ss:$168 sps:$4 sm:$0xff]   ;;  %v4942_v11 = vsel %vm319_vm1, %v4940_v29, %v4941_v27  ;;  %v13879_v7 = vunpack.c.l.bf16 %v11841_v56  ;;  %v11865_v27 = vld [vmem:[%s13844_s1 + $0x14] sm:$0xf] }
  0x79   : > { %v8952_v29 = vld [vmem:[%s11099_s9 + $0x60] sm:$0xe]  ;;  %v5220_v28 = vrot.slane %v4858_v21, 2  ;;  %v1058_v21 = vunpack.c.l.bf16 %v11909_v44  ;;  %v5226_v26 = vrot.slane %v4862_v61, 2  ;;  %v5232_v39 = vrot.slane %v4866_v34, 2 }
  0x7a   : > { %9885 = vmatmul.mubr.msk.f32.gmra.mrb[12].mxu1 %vm370_vm2, %v822_v18  ;;  %10237 = vmatmul.mubr.msk.f32.gmra.mrb[4].mxu0 %vm370_vm2, %v4930_v15  ;;  %v4944_v18 = vrot.slane %v4870_v12, 1  ;;  %v4939_v15 = vsel %vm319_vm1, %v4937_v23, %v4938_v30  ;;  %v4947_v23 = vrot.slane %v4872_v55, 1  ;;  %v5241_v25 = vrot.slane %v4872_v55, 2 }
  0x7b   : > { %9887 = vmatprep.mubr.msk.f32.mxu1 %vm370_vm2, %v825_v5  ;;  %10239 = vmatprep.mubr.msk.f32.mxu0 %vm370_vm2, %v4933_v63  ;;  %v8392_v5 = vld [vmem:[%s11099_s9 + $0x30] ss:$168 sps:$4 sm:$0xff]   ;;  %v4946_v63 = vrot.slane %v4871_v58, 1  ;;  %v8394_v58 = vld [vmem:[%s11099_s9 + $0x40] ss:$168 sps:$4 sm:$0xff]   ;;  %v5247_v22 = vrot.slane %v4876_v24, 2 }
  0x7c   : > { %v4945_v30 = vsel %vm319_vm1, %v4943_v35, %v4944_v18  ;;  %v1050_v18 = vunpack.c.l.bf16 %v11814_v60  ;;  %v5175_v60 = vunpack.c.l.bf16 %v8952_v29  ;;  %v8395_v29 = vld [vmem:[%s11099_s9 + $0x58] ss:$8 sps:$4 sm:$0xff]  }
  0x7d   : > { %v4948_v35 = vsel %vm319_vm1, %v4946_v63, %v4947_v23  ;;  %v4956_v63 = vrot.slane %v13879_v7, 1  ;;  %v8953_v23 = vld [vmem:[%s11099_s9 + $0x68] sm:$0xe] }
  0x7e   : > { %9888 = vmatmul.mubr.msk.f32.gmra.mrb[14].mxu1 %vm370_vm2, %v828_v51  ;;  %10240 = vmatmul.mubr.msk.f32.gmra.mrb[6].mxu0 %vm370_vm2, %v4936_v20  ;;  %v4875_v51 = vunpack.c.h.bf16 %v8392_v5  ;;  %v4877_v20 = vunpack.c.h.bf16 %v8393_v50  ;;  %v5176_v13 = vunpack.c.l.bf16 %v8953_v23  ;;  %v5214_v23 = vrot.slane %v4854_v45, 2  ;;  %v11923_v45 = vld [vmem:[%s11099_s9 + $0xc] sm:$0x1] }
  0x7f   : > { %9892 = vmatprep.mubr.msk.f32.mxu1 %vm370_vm2, %v1046_v54  ;;  %10242 = vmatprep.mubr.msk.f32.mxu0 %vm370_vm2, %v4939_v15  ;;  %v4950_v54 = vrot.slane %v4874_v42, 1  ;;  %v1049_v15 = vunpack.c.l.bf16 %v11803_v47  ;;  %v4953_v47 = vrot.slane %v4876_v24, 1 }
  0x80   : > { %v4952_v46 = vrot.slane %v4875_v51, 1  ;;  %v8954_v51 = vld [vmem:[%s11099_s9 + $0x70] sm:$0xe] }
  0x81   : > { %v5177_v7 = vunpack.c.l.bf16 %v8954_v51  ;;  %v8958_v51 = vld [vmem:[%s11099_s9 + $0x90] sm:$0xe] }
  0x82   : > { %9893 = vmatmul.mubr.msk.f32.vlgmr.msra.gmra.mrb[0].mxu1 %vm370_vm2, %v1047_v32  ;;  %10243 = vmatmul.mubr.msk.f32.gmra.mrb[8].mxu0 %vm370_vm2, %v4942_v11  ;;  %v4879_v32 = vunpack.c.h.bf16 %v8394_v58  ;;  %v4951_v11 = vsel %vm319_vm1, %v4949_v62, %v4950_v54  ;;  %v1052_v62 = vunpack.c.l.bf16 %v8393_v50  ;;  %v8956_v50 = vld [vmem:[%s11099_s9 + $0x80] sm:$0xe] }
  0x83   : > { %9895 = vmatprep.mubr.msk.f32.mxu1 %vm370_vm2, %v1048_v31  ;;  %10245 = vmatprep.mubr.msk.f32.mxu0 %vm370_vm2, %v4945_v30  ;;  %v4955_v31 = vrot.slane %v4877_v20, 1  ;;  %v1051_v30 = vunpack.c.l.bf16 %v8392_v5  ;;  %v4959_v20 = vrot.slane %v4880_v4, 1 }
  0x84   : > { %9917 = vmatpush3.msk.msra.mxu1 %vm403_vm0, %v11637_v37  ;;  %v4954_v37 = vsel %vm319_vm1, %v4952_v46, %v4953_v47  ;;  %v4958_v54 = vrot.slane %v4879_v32, 1  ;;  %v1053_v46 = vunpack.c.l.bf16 %v8394_v58  ;;  %v1054_v47 = vunpack.c.l.bf16 %v8395_v29 }
  0x85   : > { %9942 = vmatprep.subr.msk.mxu1 %vm403_vm0, %v11865_v27  ;;  %v4957_v5 = vsel %vm319_vm1, %v4955_v31, %v4956_v63  ;;  %v5211_v32 = vrot.slane %v4852_v19, 2  ;;  %v5179_v63 = vunpack.c.l.bf16 %v8956_v50  ;;  %v8957_v19 = vld [vmem:[%s11099_s9 + $0x88] sm:$0xe] }
  0x86   : > { %9896 = vmatmul.mubr.msk.f32.gmra.mrb[2].mxu1 %vm370_vm2, %v1049_v15  ;;  %10246 = vmatmul.mubr.msk.f32.gmra.mrb[10].mxu0 %vm370_vm2, %v4948_v35  ;;  %v5207_v15 = vrot.slane %v5175_v60, 2  ;;  %v5208_v35 = vrot.slane %v4850_v16, 2  ;;  %v4960_v38 = vsel %vm319_vm1, %v4958_v54, %v4959_v20  ;;  %v5210_v16 = vrot.slane %v5176_v13, 2  ;;  %v8959_v13 = vld [vmem:[%s11099_s9 + $0x98] sm:$0xe] }
  0x87   : > { %9898 = vmatprep.mubr.msk.f32.mxu1 %vm370_vm2, %v1050_v18  ;;  %10248 = vmatprep.mubr.msk.f32.mxu0 %vm370_vm2, %v4951_v11  ;;  %v8955_v18 = vld [vmem:[%s11099_s9 + $0x78] sm:$0xe]  ;;  %v8397_v11 = vld [vmem:[%s11099_s9 + $0x68] ss:$8 sps:$4 sm:$0xff]   ;;  %v5213_v60 = vrot.slane %v5177_v7, 2  ;;  %v5217_v7 = vrot.slane %v4856_v1, 2  ;;  %v5182_v9 = vunpack.c.l.bf16 %v8959_v13 }
  0x88   : > { %v5178_v31 = vunpack.c.l.bf16 %v8955_v18  ;;  %v5209_v58 = vsel %vm780_vm3, %v5207_v15, %v5208_v35  ;;  %v8960_v54 = vld [vmem:[%s11099_s9 + $0xb0] sm:$0xe]  ;;  %v5212_v20 = vsel %vm780_vm3, %v5210_v16, %v5211_v32  ;;  %v5180_v15 = vunpack.c.l.bf16 %v8957_v19  ;;  %v11929_v35 = vld [vmem:[%s11099_s9 + $0x14] sm:$0x1]  ;;  %v8961_v32 = vld [vmem:[%s11099_s9 + $0xb8] sm:$0xe] }
  0x89   : > { %v5215_v41 = vsel %vm780_vm3, %v5213_v60, %v5214_v23  ;;  %v1057_v1 = vunpack.c.h.bf16 %v8397_v11  ;;  %v5181_v18 = vunpack.c.l.bf16 %v8958_v51  ;;  %v1059_v16 = vunpack.c.h.bf16 %v11909_v44  ;;  %v11959_v44 = vld [vmem:[%s11099_s9 + $0x1c] sm:$0x1] }
  0x8a   : > { %9899 = vmatmul.mubr.msk.f32.gmra.mrb[4].mxu1 %vm370_vm2, %v1051_v30  ;;  %10249 = vmatmul.mubr.msk.f32.gmra.mrb[12].mxu0 %vm370_vm2, %v4954_v37  ;;  %v1055_v30 = vunpack.c.h.bf16 %v8395_v29  ;;  %v1056_v37 = vunpack.c.l.bf16 %v8397_v11  ;;  %v5216_v29 = vrot.slane %v5178_v31, 2  ;;  %v5223_v11 = vrot.slane %v4860_v14, 2  ;;  %v11947_v31 = vld [vmem:[%s11099_s9 + $0x88] ss:$8 sps:$4 sm:$0xff]   ;;  %v8425_v14 = vld [vmem:[%s11099_s9 + $0x18] ss:$8 sps:$4 sm:$0xff]  }
  0x8b   : > { %9901 = vmatprep.mubr.msk.f32.mxu1 %vm370_vm2, %v1052_v62  ;;  %10251 = vmatprep.mubr.msk.f32.mxu0 %vm370_vm2, %v4957_v5  ;;  %v8421_v62 = vld [vmem:[%s11099_s9 + $0x8] ss:$8 sps:$4 sm:$0xff]   ;;  %v5219_v5 = vrot.slane %v5179_v63, 2  ;;  %v5222_v19 = vrot.slane %v5180_v15, 2  ;;  %v5228_v51 = vrot.slane %v5182_v9, 2  ;;  %v5229_v13 = vrot.slane %v4864_v49, 2 }
  0x8c   : > { %v1308_v50 = vunpack.c.l.bf16 %v8421_v62  ;;  %v1310_v63 = vunpack.c.h.bf16 %v8421_v62  ;;  %v5218_v60 = vsel %vm780_vm3, %v5216_v29, %v5217_v7  ;;  %v8962_v62 = vld [vmem:[%s11099_s9 + $0xc0] sm:$0xe]  ;;  %v1060_v49 = vunpack.c.l.bf16 %v11947_v31  ;;  %v8963_v15 = vld [vmem:[%s11099_s9 + $0xc8] sm:$0xe] }
  0x8d   : > { %v5221_v23 = vsel %vm780_vm3, %v5219_v5, %v5220_v28  ;;  %v1061_v7 = vunpack.c.h.bf16 %v11947_v31  ;;  %v5224_v52 = vsel %vm780_vm3, %v5222_v19, %v5223_v11  ;;  %v1312_v34 = vunpack.c.l.bf16 %v8425_v14  ;;  %v8965_v19 = vld [vmem:[%s11099_s9 + $0xd8] sm:$0xe] }
  0x8e   : > { %9902 = vmatmul.mubr.msk.f32.gmra.mrb[6].mxu1 %vm370_vm2, %v1053_v46  ;;  %10252 = vmatmul.mubr.msk.f32.gmra.mrb[14].mxu0 %vm370_vm2, %v4960_v38  ;;  %v1309_v46 = vunpack.c.l.bf16 %v11923_v45  ;;  %v11939_v38 = vld [vmem:[%s13844_s1 + $0x4c] sm:$0xf]  ;;  %v1375_v28 = vrot.slane %v1310_v63, 1  ;;  %v1313_v29 = vunpack.c.l.bf16 %v11959_v44  ;;  %v5185_v5 = vunpack.c.l.bf16 %v8962_v62  ;;  %v8964_v63 = vld [vmem:[%s11099_s9 + $0xd0] sm:$0xe] }
  0x8f   : > { %9904 = vmatprep.mubr.msk.f32.mxu1 %vm370_vm2, %v1054_v47  ;;  %10256 = vmatprep.mubr.msk.f32.mxu0 %vm370_vm2, %v5209_v58  ;;  %v5183_v47 = vunpack.c.l.bf16 %v8960_v54  ;;  %v1311_v58 = vunpack.c.l.bf16 %v11929_v35  ;;  %v5230_v9 = vsel %vm780_vm3, %v5228_v51, %v5229_v13  ;;  %v1314_v11 = vunpack.c.h.bf16 %v8425_v14  ;;  %v8433_v13 = vld [vmem:[%s11099_s9 + $0x38] ss:$8 sps:$4 sm:$0xff]  }
  0x90   : > { %v1373_v3 = vrot.slane %v1309_v46, 1  ;;  %v1379_v14 = vrot.slane %v1313_v29, 1  ;;  %v5238_v51 = vrot.slane %v4870_v12, 2  ;;  %v5187_v62 = vunpack.c.l.bf16 %v8964_v63 }
  0x91   : > { %v5231_v61 = vrot.slane %v5183_v47, 2  ;;  %v1376_v54 = vrot.slane %v1311_v58, 1  ;;  %v5188_v12 = vunpack.c.l.bf16 %v8965_v19  ;;  %v1670_v45 = vrot.slane %v1311_v58, 2  ;;  %v12215_v58 = vld [vmem:[%s11099_s9 + $0x110] ss:$8 sps:$4 sm:$0xff]  }
  0x92   : > { %9905 = vmatmul.mubr.msk.f32.gmra.mrb[8].mxu1 %vm370_vm2, %v1055_v30  ;;  %10257 = vmatmul.mubr.msk.f32.vlgmr.msra.gmra.mrb[0].mxu0 %vm370_vm2, %v5212_v20  ;;  %v5225_v30 = vrot.slane %v5181_v18, 2  ;;  %v11978_v20 = vld [vmem:[%s11099_s9 + $0x24] sm:$0x1] }
  0x93   : > { %9907 = vmatprep.mubr.msk.f32.mxu1 %vm370_vm2, %v1056_v37  ;;  %10281 = vmatpush3.msk.msra.mxu0 %vm403_vm0, %v11750_v17  ;;  %v5184_v17 = vunpack.c.l.bf16 %v8961_v32  ;;  %v1372_v37 = vrot.slane %v1308_v50, 1  ;;  %v5235_v50 = vrot.slane %v4868_v48, 2  ;;  %v5233_v32 = vsel %vm780_vm3, %v5231_v61, %v5232_v39  ;;  %v12014_v61 = vld [vmem:[%s11099_s9 + $0x3c] sm:$0x1] }
  0x94   : > { %10259 = vmatprep.mubr.msk.f32.mxu0 %vm370_vm2, %v5215_v41  ;;  %10306 = vmatprep.subr.msk.mxu0 %vm403_vm0, %v11939_v38  ;;  %v8429_v41 = vld [vmem:[%s11099_s9 + $0x28] ss:$8 sps:$4 sm:$0xff]   ;;  %v5227_v18 = vsel %vm780_vm3, %v5225_v30, %v5226_v26  ;;  %v1315_v31 = vunpack.c.l.bf16 %v11978_v20  ;;  %v1377_v0 = vsel %vm319_vm1, %v1375_v28, %v1376_v54  ;;  %v5186_v48 = vunpack.c.l.bf16 %v8963_v15  ;;  %v8966_v28 = vld [vmem:[%s11099_s9 + $0xe0] sm:$0xe] }
  0x95   : > { %v1374_v47 = vsel %vm319_vm1, %v1372_v37, %v1373_v3  ;;  %v1378_v26 = vrot.slane %v1312_v34, 1  ;;  %v5237_v30 = vrot.slane %v5185_v5, 2  ;;  %v1318_v37 = vunpack.c.h.bf16 %v8429_v41  ;;  %v12027_v5 = vld [vmem:[%s11099_s9 + $0x44] sm:$0x1] }
  0x96   : > { %9908 = vmatmul.mubr.msk.f32.gmra.mrb[10].mxu1 %vm370_vm2, %v1057_v1  ;;  %10260 = vmatmul.mubr.msk.f32.gmra.mrb[2].mxu0 %vm370_vm2, %v5218_v60  ;;  %v11986_v1 = vld [vmem:[%s11099_s9 + $0x2c] sm:$0x1]  ;;  %v11998_v60 = vld [vmem:[%s11099_s9 + $0x34] sm:$0x1]  ;;  %v1381_v39 = vrot.slane %v1314_v11, 1  ;;  %v5240_v54 = vrot.slane %v5186_v48, 2  ;;  %v1320_v34 = vunpack.c.l.bf16 %v8433_v13  ;;  %v1323_v48 = vunpack.c.l.bf16 %v12027_v5 }
  0x97   : > { %9910 = vmatprep.mubr.msk.f32.mxu1 %vm370_vm2, %v1058_v21  ;;  %10262 = vmatprep.mubr.msk.f32.mxu0 %vm370_vm2, %v5221_v23  ;;  %v5234_v21 = vrot.slane %v5184_v17, 2  ;;  %v1317_v23 = vunpack.c.l.bf16 %v11986_v1  ;;  %v1319_v3 = vunpack.c.l.bf16 %v11998_v60  ;;  %v1380_v40 = vsel %vm319_vm1, %v1378_v26, %v1379_v14  ;;  %v12042_v11 = vld [vmem:[%s11099_s9 + $0x5c] sm:$0x1]  ;;  %v12059_v26 = vld [vmem:[%s11099_s9 + $0x60] ss:$72 sps:$4 sm:$0xff]  }
  0x98   : > { %v5239_v55 = vsel %vm780_vm3, %v5237_v30, %v5238_v51  ;;  %v5244_v15 = vrot.slane %v4874_v42, 2  ;;  %v5246_v63 = vrot.slane %v5188_v12, 2  ;;  %v1322_v42 = vunpack.c.h.bf16 %v8433_v13  ;;  %v12062_v14 = vld [vmem:[%s11099_s9 + $0x64] sm:$0x1]  ;;  %v12238_v1 = vld [vmem:[%s11099_s9 + $0xac] sm:$0x1] }
  0x99   : > { %v5236_v17 = vsel %vm780_vm3, %v5234_v21, %v5235_v50  ;;  %v5243_v21 = vrot.slane %v5187_v62, 2  ;;  %v1387_v50 = vrot.slane %v1318_v37, 1  ;;  %v5242_v19 = vsel %vm780_vm3, %v5240_v54, %v5241_v25  ;;  %v12072_v62 = vld [vmem:[%s11099_s9 + $0x68] ss:$72 sps:$4 sm:$0xff]   ;;  %v12075_v37 = vld [vmem:[%s11099_s9 + $0x6c] sm:$0x1] }
  0x9a   : > { %9911 = vmatmul.mubr.msk.f32.gmra.mrb[12].mxu1 %vm370_vm2, %v1059_v16  ;;  %10263 = vmatmul.mubr.msk.f32.gmra.mrb[4].mxu0 %vm370_vm2, %v5224_v52  ;;  %v1316_v16 = vunpack.c.l.bf16 %v8429_v41  ;;  %v1321_v41 = vunpack.c.l.bf16 %v12014_v61  ;;  %v1390_v59 = vrot.slane %v1320_v34, 1  ;;  %v13908_v12 = vunpack.c.l.bf16 %v11841_v56 }
  0x9b   : > { %9913 = vmatprep.mubr.msk.f32.mxu1 %vm370_vm2, %v1060_v49  ;;  %10265 = vmatprep.mubr.msk.f32.mxu0 %vm370_vm2, %v5227_v18  ;;  %v1382_v49 = vrot.slane %v1315_v31, 1  ;;  %v8967_v18 = vld [vmem:[%s11099_s9 + $0xe8] sm:$0xe]  ;;  %v1393_v54 = vrot.slane %v1322_v42, 1  ;;  %v1326_v56 = vunpack.c.l.bf16 %v12059_v26  ;;  %v1327_v34 = vunpack.c.l.bf16 %v12062_v14 }
  0x9c   : > { %v1384_v52 = vrot.slane %v1316_v16, 1  ;;  %v12051_v16 = vld [vmem:[%s13844_s1 + $0x18] sm:$0xf]  ;;  %v1391_v30 = vrot.slane %v1321_v41, 1  ;;  %v5190_v51 = vunpack.c.l.bf16 %v8967_v18  ;;  %v12099_v18 = vld [vmem:[%s11099_s9 + $0x74] sm:$0x1] }
  0x9d   : > { %v1682_v20 = vrot.slane %v1319_v3, 2 }
  0x9e   : > { %9914 = vmatmul.mubr.msk.f32.gmra.mrb[14].mxu1 %vm370_vm2, %v1061_v7  ;;  %10266 = vmatmul.mubr.msk.f32.gmra.mrb[6].mxu0 %vm370_vm2, %v5230_v9  ;;  %v1385_v7 = vrot.slane %v1317_v23, 1  ;;  %v12037_v9 = vld [vmem:[%s11099_s9 + $0x58] ss:$72 sps:$4 sm:$0xff]   ;;  %v5252_v36 = vrot.slane %v5190_v51, 2 }
  0x9f   : > { %9918 = vmatprep.mubr.msk.f32.mxu1 %vm370_vm2, %v1374_v47  ;;  %10268 = vmatprep.mubr.msk.f32.mxu0 %vm370_vm2, %v5233_v32  ;;  %v1388_v47 = vrot.slane %v1319_v3, 1  ;;  %v5189_v32 = vunpack.c.l.bf16 %v8966_v28  ;;  %v1324_v13 = vunpack.c.l.bf16 %v12037_v9  ;;  %v5250_v28 = vrot.slane %v13908_v12, 2  ;;  %v12132_v12 = vld [vmem:[%s11099_s9 + $0x84] sm:$0x1] }
  0xa0   : > { %v1386_v24 = vsel %vm319_vm1, %v1384_v52, %v1385_v7  ;;  %v1394_v52 = vrot.slane %v1323_v48, 1  ;;  %v5253_v7 = vrot.slane %v4880_v4, 2  ;;  %v1392_v4 = vsel %vm319_vm1, %v1390_v59, %v1391_v30 }
  0xa1   : > { %v5249_v25 = vrot.slane %v5189_v32, 2  ;;  %v12107_v32 = vld [vmem:[%s11099_s9 + $0x78] ss:$72 sps:$4 sm:$0xff]   ;;  %v5473_v42 = vunpack.c.h.bf16 %v12037_v9  ;;  %v1400_v59 = vrot.slane %v1327_v34, 1  ;;  %v5486_v3 = vunpack.c.h.bf16 %v12215_v58 }
  0xa2   : > { %9919 = vmatmul.mubr.msk.f32.vlgmr.msra.gmra.mrb[0].mxu1 %vm370_vm2, %v1377_v0  ;;  %10269 = vmatmul.mubr.msk.f32.gmra.mrb[8].mxu0 %vm370_vm2, %v5236_v17  ;;  %v1383_v0 = vsel %vm319_vm1, %v1381_v39, %v1382_v49  ;;  %v1325_v17 = vunpack.c.l.bf16 %v12042_v11  ;;  %v5245_v39 = vsel %vm780_vm3, %v5243_v21, %v5244_v15  ;;  %v1389_v49 = vsel %vm319_vm1, %v1387_v50, %v1388_v47  ;;  %v12096_v15 = vld [vmem:[%s11099_s9 + $0x70] ss:$72 sps:$4 sm:$0xff]  }
  0xa3   : > { %9921 = vmatprep.mubr.msk.f32.mxu1 %vm370_vm2, %v1380_v40  ;;  %10271 = vmatprep.mubr.msk.f32.mxu0 %vm370_vm2, %v5239_v55  ;;  %v1328_v40 = vunpack.c.l.bf16 %v12072_v62  ;;  %v1329_v55 = vunpack.c.l.bf16 %v12075_v37  ;;  %v1396_v21 = vrot.slane %v1324_v13, 1  ;;  %v5251_v47 = vsel %vm780_vm3, %v5249_v25, %v5250_v28  ;;  %v12129_v25 = vld [vmem:[%s11099_s9 + $0x80] ss:$72 sps:$4 sm:$0xff]  }
  0xa4   : > { %9943 = vmatpush3.msk.msra.mxu1 %vm403_vm0, %v11865_v27  ;;  %v5248_v27 = vsel %vm780_vm3, %v5246_v63, %v5247_v22  ;;  %v1397_v50 = vrot.slane %v1325_v17, 1  ;;  %v12110_v63 = vld [vmem:[%s11099_s9 + $0x7c] sm:$0x1]  ;;  %v1395_v22 = vsel %vm319_vm1, %v1393_v54, %v1394_v52  ;;  %v5254_v9 = vsel %vm780_vm3, %v5252_v36, %v5253_v7  ;;  %v12135_v28 = vld [vmem:[%s11099_s9 + $0x88] ss:$72 sps:$4 sm:$0xff]  }
  0xa5   : > { %9968 = vmatprep.subr.msk.mxu1 %vm403_vm0, %v12051_v16  ;;  %v1402_v30 = vrot.slane %v1328_v40, 1  ;;  %v1403_v51 = vrot.slane %v1329_v55, 1  ;;  %v5474_v54 = vunpack.c.h.bf16 %v12059_v26  ;;  %v5475_v52 = vunpack.c.h.bf16 %v12072_v62 }
  0xa6   : > { %9922 = vmatmul.mubr.msk.f32.gmra.mrb[2].mxu1 %vm370_vm2, %v1383_v0  ;;  %10272 = vmatmul.mubr.msk.f32.gmra.mrb[10].mxu0 %vm370_vm2, %v5242_v19  ;;  %v1330_v0 = vunpack.c.l.bf16 %v12096_v15  ;;  %v1331_v19 = vunpack.c.l.bf16 %v12099_v18  ;;  %v1398_v13 = vsel %vm319_vm1, %v1396_v21, %v1397_v50  ;;  %v1334_v36 = vunpack.c.l.bf16 %v12129_v25 }
  0xa7   : > { %9924 = vmatprep.mubr.msk.f32.mxu1 %vm370_vm2, %v1386_v24  ;;  %10274 = vmatprep.mubr.msk.f32.mxu0 %vm370_vm2, %v5245_v39  ;;  %v1399_v24 = vrot.slane %v1326_v56, 1  ;;  %v1332_v39 = vunpack.c.l.bf16 %v12107_v32  ;;  %v1335_v26 = vunpack.c.l.bf16 %v12132_v12  ;;  %v1336_v50 = vunpack.c.l.bf16 %v12135_v28  ;;  %v12354_v12 = vld [vmem:[%s13844_s1 + $0x54] sm:$0xf] }
  0xa8   : > { %v1405_v7 = vrot.slane %v1330_v0, 1  ;;  %v1406_v56 = vrot.slane %v1331_v19, 1  ;;  %v12158_v0 = vld [vmem:[%s11099_s9 + $0x94] sm:$0x1] }
  0xa9   : > { %v1401_v40 = vsel %vm319_vm1, %v1399_v24, %v1400_v59  ;;  %v1408_v62 = vrot.slane %v1332_v39, 1  ;;  %v8471_v24 = vld [vmem:[%s11099_s9 + $0x8] sm:$0xe] }
  0xaa   : > { %9925 = vmatmul.mubr.msk.f32.gmra.mrb[4].mxu1 %vm370_vm2, %v1389_v49  ;;  %10275 = vmatmul.mubr.msk.f32.gmra.mrb[12].mxu0 %vm370_vm2, %v5248_v27  ;;  %v1333_v49 = vunpack.c.l.bf16 %v12110_v63  ;;  %v12138_v27 = vld [vmem:[%s11099_s9 + $0x8c] sm:$0x1]  ;;  %v1407_v59 = vsel %vm319_vm1, %v1405_v7, %v1406_v56  ;;  %v1339_v7 = vunpack.c.l.bf16 %v12158_v0  ;;  %v1634_v56 = vunpack.c.l.bf16 %v8471_v24 }
  0xab   : > { %9927 = vmatprep.mubr.msk.f32.mxu1 %vm370_vm2, %v1392_v4  ;;  %10277 = vmatprep.mubr.msk.f32.mxu0 %vm370_vm2, %v5251_v47  ;;  %v1404_v4 = vsel %vm319_vm1, %v1402_v30, %v1403_v51  ;;  %v13880_v47 = vunpack.c.l.bf16 %v12138_v27  ;;  %v5476_v30 = vunpack.c.h.bf16 %v12096_v15  ;;  %v12168_v51 = vld [vmem:[%s13844_s1 + $0x50] sm:$0xf]  ;;  %v1706_v63 = vrot.slane %v1335_v26, 2 }
  0xac   : > { %v1409_v21 = vrot.slane %v1333_v49, 1 }
  0xae   : > { %9928 = vmatmul.mubr.msk.f32.gmra.mrb[6].mxu1 %vm370_vm2, %v1395_v22  ;;  %10278 = vmatmul.mubr.msk.f32.gmra.mrb[14].mxu0 %vm370_vm2, %v5254_v9  ;;  %v8451_v22 = vld [vmem:[%s11099_s9 + $0x90] ss:$72 sps:$4 sm:$0xff]   ;;  %v1411_v9 = vrot.slane %v1334_v36, 1  ;;  %v1410_v15 = vsel %vm319_vm1, %v1408_v62, %v1409_v21  ;;  %v1418_v21 = vrot.slane %v1339_v7, 1 }
  0xaf   : > { %9930 = vmatprep.mubr.msk.f32.mxu1 %vm370_vm2, %v1398_v13  ;;  %10282 = vmatprep.mubr.msk.f32.mxu0 %vm370_vm2, %v5473_v42  ;;  %v5477_v42 = vunpack.c.h.bf16 %v12107_v32  ;;  %v1412_v13 = vrot.slane %v1335_v26, 1  ;;  %v1338_v39 = vunpack.c.l.bf16 %v8451_v22  ;;  %v1414_v32 = vrot.slane %v1336_v50, 1  ;;  %v8996_v50 = vld [vmem:[%s11099_s9 + $0xf0] ss:$8 sps:$4 sm:$0xff]  }
  0xb0   : > { %v5482_v35 = vunpack.c.h.bf16 %v8996_v50 }
  0xb1   : > { %v1413_v36 = vsel %vm319_vm1, %v1411_v9, %v1412_v13  ;;  %v1417_v62 = vrot.slane %v1338_v39, 1  ;;  %v5480_v9 = vunpack.c.h.bf16 %v8451_v22  ;;  %v5481_v13 = vunpack.c.l.bf16 %v8996_v50  ;;  %v8476_v39 = vld [vmem:[%s11099_s9 + $0x30] sm:$0xe] }
  0xb2   : > { %9931 = vmatmul.mubr.msk.f32.gmra.mrb[8].mxu1 %vm370_vm2, %v1401_v40  ;;  %10283 = vmatmul.mubr.msk.f32.vlgmr.msra.gmra.mrb[0].mxu0 %vm370_vm2, %v5474_v54  ;;  %v1415_v54 = vrot.slane %v13880_v47, 1  ;;  %v8472_v40 = vld [vmem:[%s11099_s9 + $0x10] sm:$0xe]  ;;  %v8474_v47 = vld [vmem:[%s11099_s9 + $0x20] sm:$0xe] }
  0xb3   : > { %9933 = vmatprep.mubr.msk.f32.mxu1 %vm370_vm2, %v1404_v4  ;;  %10307 = vmatpush3.msk.msra.mxu0 %vm403_vm0, %v11939_v38  ;;  %v8473_v4 = vld [vmem:[%s11099_s9 + $0x18] sm:$0xe]  ;;  %v5478_v38 = vunpack.c.h.bf16 %v12129_v25  ;;  %v1635_v24 = vunpack.c.l.bf16 %v8472_v40  ;;  %v1666_v25 = vrot.slane %v1634_v56, 2  ;;  %v1673_v56 = vrot.slane %v1313_v29, 2  ;;  %v8998_v40 = vld [vmem:[%s11099_s9 + $0x100] ss:$8 sps:$4 sm:$0xff]  }
  0xb4   : > { %10285 = vmatprep.mubr.msk.f32.mxu0 %vm370_vm2, %v5475_v52  ;;  %10332 = vmatprep.subr.msk.mxu0 %vm403_vm0, %v12168_v51  ;;  %v5479_v52 = vunpack.c.h.bf16 %v12135_v28  ;;  %v1667_v28 = vrot.slane %v1309_v46, 2  ;;  %v1637_v46 = vunpack.c.l.bf16 %v8474_v47  ;;  %v5483_v44 = vunpack.c.l.bf16 %v8998_v40 }
  0xb5   : > { %v1676_v29 = vrot.slane %v1315_v31, 2  ;;  %v5484_v31 = vunpack.c.h.bf16 %v8998_v40  ;;  %v1685_v40 = vrot.slane %v1321_v41, 2  ;;  %v1691_v41 = vrot.slane %v1325_v17, 2 }
  0xb6   : > { %9934 = vmatmul.mubr.msk.f32.gmra.mrb[10].mxu1 %vm370_vm2, %v1407_v59  ;;  %10286 = vmatmul.mubr.msk.f32.gmra.mrb[2].mxu0 %vm370_vm2, %v5476_v30  ;;  %v1416_v59 = vsel %vm319_vm1, %v1414_v32, %v1415_v54  ;;  %v1636_v30 = vunpack.c.l.bf16 %v8473_v4  ;;  %v1669_v32 = vrot.slane %v1635_v24, 2  ;;  %v1668_v54 = vsel %vm780_vm3, %v1666_v25, %v1667_v28  ;;  %v9022_v28 = vld [vmem:[%s11099_s9 + $0xa0] ss:$8 sps:$4 sm:$0xff]  }
  0xb7   : > { %9936 = vmatprep.mubr.msk.f32.mxu1 %vm370_vm2, %v1410_v15  ;;  %10288 = vmatprep.mubr.msk.f32.mxu0 %vm370_vm2, %v5477_v42  ;;  %v8475_v15 = vld [vmem:[%s11099_s9 + $0x28] sm:$0xe]  ;;  %v1419_v42 = vsel %vm319_vm1, %v1417_v62, %v1418_v21  ;;  %v8478_v62 = vld [vmem:[%s11099_s9 + $0x40] sm:$0xe]  ;;  %v8479_v21 = vld [vmem:[%s11099_s9 + $0x58] sm:$0xe] }
  0xb8   : > { %v1672_v22 = vrot.slane %v1636_v30, 2  ;;  %v1638_v4 = vunpack.c.l.bf16 %v8475_v15  ;;  %v1671_v47 = vsel %vm780_vm3, %v1669_v32, %v1670_v45  ;;  %v12230_v30 = vld [vmem:[%s11099_s9 + $0xa4] sm:$0x1]  ;;  %v5735_v32 = vunpack.c.l.bf16 %v9022_v28 }
  0xb9   : > { %v5736_v45 = vunpack.c.l.bf16 %v12230_v30 }
  0xba   : > { %9937 = vmatmul.mubr.msk.f32.gmra.mrb[12].mxu1 %vm370_vm2, %v1413_v36  ;;  %10289 = vmatmul.mubr.msk.f32.gmra.mrb[4].mxu0 %vm370_vm2, %v5478_v38  ;;  %v1639_v38 = vunpack.c.l.bf16 %v8476_v39  ;;  %v8477_v36 = vld [vmem:[%s11099_s9 + $0x38] sm:$0xe]  ;;  %v1674_v50 = vsel %vm780_vm3, %v1672_v22, %v1673_v56  ;;  %v1678_v24 = vrot.slane %v1638_v4, 2  ;;  %v1642_v39 = vunpack.c.l.bf16 %v8479_v21 }
  0xbb   : > { %9939 = vmatprep.mubr.msk.f32.mxu1 %vm370_vm2, %v1416_v59  ;;  %10291 = vmatprep.mubr.msk.f32.mxu0 %vm370_vm2, %v5479_v52  ;;  %v1675_v52 = vrot.slane %v1637_v46, 2  ;;  %v1679_v59 = vrot.slane %v1317_v23, 2  ;;  %v1640_v25 = vunpack.c.l.bf16 %v8477_v36  ;;  %v12243_v23 = vld [vmem:[%s13844_s1 + $0x1c] sm:$0xf]  ;;  %v8481_v46 = vld [vmem:[%s11099_s9 + $0x68] sm:$0xe] }
  0xbc   : > { %v1681_v15 = vrot.slane %v1639_v38, 2  ;;  %v1688_v4 = vrot.slane %v1323_v48, 2  ;;  %v12263_v38 = vld [vmem:[%s11099_s9 + $0xb4] sm:$0x1]  ;;  %v1690_v5 = vrot.slane %v1642_v39, 2  ;;  %v1644_v48 = vunpack.c.l.bf16 %v8481_v46 }
  0xbd   : > { %v1677_v60 = vsel %vm780_vm3, %v1675_v52, %v1676_v29  ;;  %v1680_v22 = vsel %vm780_vm3, %v1678_v24, %v1679_v59  ;;  %v1684_v56 = vrot.slane %v1640_v25, 2  ;;  %v5799_v52 = vrot.slane %v5735_v32, 1  ;;  %v8483_v25 = vld [vmem:[%s11099_s9 + $0x78] sm:$0xe]  ;;  %v12292_v39 = vld [vmem:[%s11099_s9 + $0xc4] sm:$0x1] }
  0xbe   : > { %9940 = vmatmul.mubr.msk.f32.gmra.mrb[14].mxu1 %vm370_vm2, %v1419_v42  ;;  %10292 = vmatmul.mubr.msk.f32.gmra.mrb[6].mxu0 %vm370_vm2, %v5480_v9  ;;  %v5485_v9 = vunpack.c.l.bf16 %v12215_v58  ;;  %v8480_v42 = vld [vmem:[%s11099_s9 + $0x60] sm:$0xe]  ;;  %v1683_v36 = vsel %vm780_vm3, %v1681_v15, %v1682_v20  ;;  %v5800_v29 = vrot.slane %v5736_v45, 1  ;;  %v5740_v21 = vunpack.c.l.bf16 %v12263_v38 }
  0xbf   : > { %9944 = vmatprep.mubr.msk.f32.mxu1 %vm370_vm2, %v1668_v54  ;;  %10294 = vmatprep.mubr.msk.f32.mxu0 %vm370_vm2, %v5481_v13  ;;  %v1641_v13 = vunpack.c.l.bf16 %v8478_v62  ;;  %v12252_v54 = vld [vmem:[%s11099_s9 + $0xb0] ss:$8 sps:$4 sm:$0xff]   ;;  %v1643_v58 = vunpack.c.l.bf16 %v8480_v42  ;;  %v1686_v11 = vsel %vm780_vm3, %v1684_v56, %v1685_v40  ;;  %v1694_v59 = vrot.slane %v1327_v34, 2  ;;  %v8484_v56 = vld [vmem:[%s11099_s9 + $0x80] sm:$0xe] }
  0xc0   : > { %v5739_v62 = vunpack.c.l.bf16 %v12252_v54  ;;  %v1692_v42 = vsel %vm780_vm3, %v1690_v5, %v1691_v41  ;;  %v1696_v14 = vrot.slane %v1644_v48, 2  ;;  %v1697_v34 = vrot.slane %v1329_v55, 2  ;;  %v12307_v40 = vld [vmem:[%s11099_s9 + $0xcc] sm:$0x1] }
  0xc1   : > { %v1687_v61 = vrot.slane %v1641_v13, 2  ;;  %v1693_v15 = vrot.slane %v1643_v58, 2  ;;  %v5806_v46 = vrot.slane %v5740_v21, 1  ;;  %v1646_v55 = vunpack.c.l.bf16 %v8483_v25 }
  0xc2   : > { %9945 = vmatmul.mubr.msk.f32.vlgmr.msra.gmra.mrb[0].mxu1 %vm370_vm2, %v1671_v47  ;;  %10295 = vmatmul.mubr.msk.f32.gmra.mrb[8].mxu0 %vm370_vm2, %v5482_v35  ;;  %v9002_v35 = vld [vmem:[%s11099_s9 + $0x120] ss:$8 sps:$4 sm:$0xff]   ;;  %v5737_v47 = vunpack.c.h.bf16 %v9022_v28  ;;  %v5805_v32 = vrot.slane %v5739_v62, 1  ;;  %v1647_v5 = vunpack.c.l.bf16 %v8484_v56  ;;  %v5746_v48 = vunpack.c.l.bf16 %v12307_v40 }
  0xc3   : > { %9947 = vmatprep.mubr.msk.f32.mxu1 %vm370_vm2, %v1674_v50  ;;  %10297 = vmatprep.mubr.msk.f32.mxu0 %vm370_vm2, %v5483_v44  ;;  %v5738_v44 = vunpack.c.l.bf16 %v12238_v1  ;;  %v12281_v50 = vld [vmem:[%s11099_s9 + $0xbc] sm:$0x1]  ;;  %v5487_v17 = vunpack.c.l.bf16 %v9002_v35  ;;  %v5488_v24 = vunpack.c.h.bf16 %v9002_v35  ;;  %v9030_v28 = vld [vmem:[%s11099_s9 + $0xc0] ss:$8 sps:$4 sm:$0xff]   ;;  %v1695_v35 = vsel %vm780_vm3, %v1693_v15, %v1694_v59 }
  0xc4   : > { %9969 = vmatpush3.msk.msra.mxu1 %vm403_vm0, %v12051_v16  ;;  %v8482_v16 = vld [vmem:[%s11099_s9 + $0x70] sm:$0xe]  ;;  %v5802_v20 = vrot.slane %v5737_v47, 1  ;;  %v5742_v37 = vunpack.c.l.bf16 %v12281_v50  ;;  %v1700_v47 = vrot.slane %v1331_v19, 2  ;;  %v5745_v41 = vunpack.c.h.bf16 %v9030_v28  ;;  %v12487_v1 = vld [vmem:[%s11099_s9 + $0x80] ss:$8 sps:$4 sm:$0xff]  }
  0xc5   : > { %9994 = vmatprep.subr.msk.mxu1 %vm403_vm0, %v12243_v23  ;;  %v1645_v13 = vunpack.c.l.bf16 %v8482_v16  ;;  %v9034_v16 = vld [vmem:[%s11099_s9 + $0xd0] ss:$8 sps:$4 sm:$0xff]   ;;  %v5807_v18 = vsel %vm319_vm1, %v5805_v32, %v5806_v46  ;;  %v1702_v59 = vrot.slane %v1646_v55, 2 }
  0xc6   : > { %9948 = vmatmul.mubr.msk.f32.gmra.mrb[2].mxu1 %vm370_vm2, %v1677_v60  ;;  %10298 = vmatmul.mubr.msk.f32.gmra.mrb[10].mxu0 %vm370_vm2, %v5484_v31  ;;  %v5803_v31 = vrot.slane %v5738_v44, 1  ;;  %v5801_v60 = vsel %vm319_vm1, %v5799_v52, %v5800_v29  ;;  %v12322_v52 = vld [vmem:[%s11099_s9 + $0xd4] sm:$0x1]  ;;  %v1703_v29 = vrot.slane %v1333_v49, 2  ;;  %v5747_v49 = vunpack.c.l.bf16 %v9034_v16 }
  0xc7   : > { %9950 = vmatprep.mubr.msk.f32.mxu1 %vm370_vm2, %v1680_v22  ;;  %10300 = vmatprep.mubr.msk.f32.mxu0 %vm370_vm2, %v5485_v9  ;;  %v1689_v9 = vsel %vm780_vm3, %v1687_v61, %v1688_v4  ;;  %v5741_v22 = vunpack.c.h.bf16 %v12252_v54  ;;  %v5744_v4 = vunpack.c.l.bf16 %v12292_v39  ;;  %v1699_v54 = vrot.slane %v1645_v13, 2  ;;  %v12344_v13 = vld [vmem:[%s11099_s9 + $0xf4] sm:$0x1] }
  0xc8   : > { %v5804_v58 = vsel %vm319_vm1, %v5802_v20, %v5803_v31  ;;  %v1698_v61 = vsel %vm780_vm3, %v1696_v14, %v1697_v34  ;;  %v5748_v20 = vunpack.c.l.bf16 %v12322_v52  ;;  %v9038_v31 = vld [vmem:[%s11099_s9 + $0xf0] ss:$8 sps:$4 sm:$0xff]   ;;  %v5815_v14 = vrot.slane %v5746_v48, 1 }
  0xc9   : > { %v5808_v19 = vrot.slane %v5741_v22, 1  ;;  %v1701_v15 = vsel %vm780_vm3, %v1699_v54, %v1700_v47  ;;  %v13909_v34 = vunpack.c.l.bf16 %v12138_v27  ;;  %v5749_v46 = vunpack.c.h.bf16 %v9034_v16  ;;  %v9042_v47 = vld [vmem:[%s11099_s9 + $0x100] ss:$8 sps:$4 sm:$0xff]  }
  0xca   : > { %9951 = vmatmul.mubr.msk.f32.gmra.mrb[4].mxu1 %vm370_vm2, %v1683_v36  ;;  %10301 = vmatmul.mubr.msk.f32.gmra.mrb[12].mxu0 %vm370_vm2, %v5486_v3  ;;  %v5743_v3 = vunpack.c.l.bf16 %v9030_v28  ;;  %v8485_v36 = vld [vmem:[%s11099_s9 + $0x88] sm:$0xe]  ;;  %v12336_v28 = vld [vmem:[%s11099_s9 + $0xdc] sm:$0x1]  ;;  %v1704_v56 = vsel %vm780_vm3, %v1702_v59, %v1703_v29  ;;  %v5752_v54 = vunpack.c.l.bf16 %v12344_v13  ;;  %v12392_v59 = vld [vmem:[%s11099_s9 + $0x10c] sm:$0x1] }
  0xcb   : > { %9953 = vmatprep.mubr.msk.f32.mxu1 %vm370_vm2, %v1686_v11  ;;  %10303 = vmatprep.mubr.msk.f32.mxu0 %vm370_vm2, %v5487_v17  ;;  %v1648_v62 = vunpack.c.l.bf16 %v8485_v36  ;;  %v8486_v11 = vld [vmem:[%s11099_s9 + $0x90] sm:$0xe]  ;;  %v5809_v17 = vrot.slane %v5742_v37, 1  ;;  %v5750_v22 = vunpack.c.l.bf16 %v12336_v28  ;;  %v5817_v36 = vrot.slane %v5747_v49, 1 }
  0xcc   : > { %v5811_v25 = vrot.slane %v5743_v3, 1  ;;  %v1649_v32 = vunpack.c.l.bf16 %v8486_v11  ;;  %v12366_v3 = vld [vmem:[%s11099_s9 + $0xfc] sm:$0x1]  ;;  %v5753_v11 = vunpack.c.h.bf16 %v9038_v31  ;;  %v9046_v49 = vld [vmem:[%s11099_s9 + $0x110] ss:$8 sps:$4 sm:$0xff]   ;;  %v6106_v38 = vrot.slane %v5744_v4, 2 }
  0xcd   : > { %v1708_v26 = vrot.slane %v1648_v62, 2  ;;  %v5810_v27 = vsel %vm319_vm1, %v5808_v19, %v5809_v17  ;;  %v5820_v19 = vrot.slane %v5749_v46, 1  ;;  %v5821_v29 = vrot.slane %v5750_v22, 1  ;;  %v8506_v62 = vld [vmem:[%s11099_s9 + $0x10] ss:$8 sps:$4 sm:$0xff]  }
  0xce   : > { %9954 = vmatmul.mubr.msk.f32.gmra.mrb[6].mxu1 %vm370_vm2, %v1689_v9  ;;  %10304 = vmatmul.mubr.msk.f32.gmra.mrb[14].mxu0 %vm370_vm2, %v5488_v24  ;;  %v5812_v24 = vrot.slane %v5744_v4, 1  ;;  %v1705_v9 = vrot.slane %v1647_v5, 2  ;;  %v5754_v0 = vunpack.c.l.bf16 %v12366_v3  ;;  %v1943_v4 = vunpack.c.l.bf16 %v12487_v1 }
  0xcf   : > { %9956 = vmatprep.mubr.msk.f32.mxu1 %vm370_vm2, %v1692_v42  ;;  %10308 = vmatprep.mubr.msk.f32.mxu0 %vm370_vm2, %v5801_v60  ;;  %v5814_v42 = vrot.slane %v5745_v41, 1  ;;  %v1709_v60 = vrot.slane %v13909_v34, 2  ;;  %v1712_v41 = vrot.slane %v1339_v7, 2  ;;  %v5755_v7 = vunpack.c.l.bf16 %v9042_v47 }
  0xd0   : > { %v5813_v55 = vsel %vm319_vm1, %v5811_v25, %v5812_v24  ;;  %v5758_v34 = vunpack.c.l.bf16 %v12392_v59  ;;  %v6112_v40 = vrot.slane %v5748_v20, 2  ;;  %v6118_v28 = vrot.slane %v5752_v54, 2 }
  0xd1   : > { %v5816_v5 = vsel %vm319_vm1, %v5814_v42, %v5815_v14  ;;  %v1710_v16 = vsel %vm780_vm3, %v1708_v26, %v1709_v60  ;;  %v5822_v42 = vsel %vm319_vm1, %v5820_v19, %v5821_v29  ;;  %v5757_v14 = vunpack.c.h.bf16 %v9042_v47  ;;  %v9050_v47 = vld [vmem:[%s11099_s9 + $0x120] ss:$8 sps:$4 sm:$0xff]   ;;  %v8510_v29 = vld [vmem:[%s11099_s9 + $0x30] ss:$8 sps:$4 sm:$0xff]  }
  0xd2   : > { %9957 = vmatmul.mubr.msk.f32.gmra.mrb[8].mxu1 %vm370_vm2, %v1695_v35  ;;  %10309 = vmatmul.mubr.msk.f32.vlgmr.msra.gmra.mrb[0].mxu0 %vm370_vm2, %v5804_v58  ;;  %v5818_v35 = vrot.slane %v5748_v20, 1  ;;  %v5751_v58 = vunpack.c.l.bf16 %v9038_v31  ;;  %v5826_v60 = vrot.slane %v5753_v11, 1  ;;  %v5827_v26 = vrot.slane %v5754_v0, 1 }
  0xd3   : > { %9959 = vmatprep.mubr.msk.f32.mxu1 %vm370_vm2, %v1698_v61  ;;  %10333 = vmatpush3.msk.msra.mxu0 %vm403_vm0, %v12168_v51  ;;  %v12373_v51 = vld [vmem:[%s11099_s9 + $0x104] sm:$0x1]  ;;  %v1707_v61 = vsel %vm780_vm3, %v1705_v9, %v1706_v63  ;;  %v1931_v63 = vunpack.c.l.bf16 %v8506_v62  ;;  %v12400_v9 = vld [vmem:[%s11099_s9 + $0x114] sm:$0x1]  ;;  %v5829_v46 = vrot.slane %v5755_v7, 1 }
  0xd4   : > { %10311 = vmatprep.mubr.msk.f32.mxu0 %vm370_vm2, %v5807_v18  ;;  %10358 = vmatprep.subr.msk.mxu0 %vm403_vm0, %v12354_v12  ;;  %v1711_v18 = vrot.slane %v1649_v32, 2  ;;  %v5756_v17 = vunpack.c.l.bf16 %v12373_v51  ;;  %v5819_v25 = vsel %vm319_vm1, %v5817_v36, %v5818_v35  ;;  %v5823_v24 = vrot.slane %v5751_v58, 1  ;;  %v8508_v32 = vld [vmem:[%s11099_s9 + $0x20] ss:$8 sps:$4 sm:$0xff]   ;;  %v12416_v35 = vld [vmem:[%s11099_s9 + $0x11c] sm:$0x1] }
  0xd5   : > { %v5760_v36 = vunpack.c.l.bf16 %v12400_v9  ;;  %v1932_v58 = vunpack.c.h.bf16 %v8506_v62  ;;  %v5761_v62 = vunpack.c.h.bf16 %v9046_v49  ;;  %v5762_v11 = vunpack.c.l.bf16 %v12416_v35 }
  0xd6   : > { %9960 = vmatmul.mubr.msk.f32.gmra.mrb[10].mxu1 %vm370_vm2, %v1701_v15  ;;  %10312 = vmatmul.mubr.msk.f32.gmra.mrb[2].mxu0 %vm370_vm2, %v5810_v27  ;;  %v5824_v15 = vrot.slane %v5752_v54, 1  ;;  %v1713_v31 = vsel %vm780_vm3, %v1711_v18, %v1712_v41  ;;  %v5830_v27 = vrot.slane %v5756_v17, 1  ;;  %v5832_v41 = vrot.slane %v5757_v14, 1 }
  0xd7   : > { %9962 = vmatprep.mubr.msk.f32.mxu1 %vm370_vm2, %v1704_v56  ;;  %10314 = vmatprep.mubr.msk.f32.mxu0 %vm370_vm2, %v5813_v55  ;;  %v5759_v55 = vunpack.c.l.bf16 %v9046_v49  ;;  %v5828_v18 = vsel %vm319_vm1, %v5826_v60, %v5827_v26  ;;  %v12443_v49 = vld [vmem:[%s13844_s1 + $0x20] sm:$0xf]  ;;  %v1935_v60 = vunpack.c.l.bf16 %v8510_v29  ;;  %v5838_v26 = vrot.slane %v5761_v62, 1 }
  0xd8   : > { %v5825_v56 = vsel %vm319_vm1, %v5823_v24, %v5824_v15  ;;  %v5831_v19 = vsel %vm319_vm1, %v5829_v46, %v5830_v27  ;;  %v5763_v24 = vunpack.c.l.bf16 %v9050_v47  ;;  %v8512_v46 = vld [vmem:[%s11099_s9 + $0x40] ss:$8 sps:$4 sm:$0xff]   ;;  %v5765_v27 = vunpack.c.h.bf16 %v9050_v47 }
  0xd9   : > { %v5835_v7 = vrot.slane %v5759_v55, 1  ;;  %v1936_v47 = vunpack.c.h.bf16 %v8510_v29  ;;  %v6127_v51 = vrot.slane %v5758_v34, 2  ;;  %v6133_v9 = vrot.slane %v5762_v11, 2 }
  0xda   : > { %9963 = vmatmul.mubr.msk.f32.gmra.mrb[12].mxu1 %vm370_vm2, %v1707_v61  ;;  %10315 = vmatmul.mubr.msk.f32.gmra.mrb[4].mxu0 %vm370_vm2, %v5816_v5  ;;  %v12421_v61 = vld [vmem:[%s11099_s9 + $0x124] sm:$0x1]  ;;  %v1933_v5 = vunpack.c.l.bf16 %v8508_v32  ;;  %v5844_v62 = vrot.slane %v5765_v27, 1  ;;  %v6097_v27 = vrot.slane %v5738_v44, 2  ;;  %v9077_v44 = vld [vmem:[%s11099_s9 + $0xc8] sm:$0xe] }
  0xdb   : > { %9965 = vmatprep.mubr.msk.f32.mxu1 %vm370_vm2, %v1710_v16  ;;  %10317 = vmatprep.mubr.msk.f32.mxu0 %vm370_vm2, %v5819_v25  ;;  %v5833_v16 = vrot.slane %v5758_v34, 1  ;;  %v5836_v25 = vrot.slane %v5760_v36, 1  ;;  %v13881_v15 = vunpack.c.l.bf16 %v12421_v61 }
  0xdd   : > { %v5834_v14 = vsel %vm319_vm1, %v5832_v41, %v5833_v16  ;;  %v5837_v55 = vsel %vm319_vm1, %v5835_v7, %v5836_v25  ;;  %v9073_v16 = vld [vmem:[%s11099_s9 + $0xa8] sm:$0xe] }
  0xde   : > { %9966 = vmatmul.mubr.msk.f32.gmra.mrb[14].mxu1 %vm370_vm2, %v1713_v31  ;;  %10318 = vmatmul.mubr.msk.f32.gmra.mrb[6].mxu0 %vm370_vm2, %v5822_v42  ;;  %v1934_v31 = vunpack.c.h.bf16 %v8508_v32  ;;  %v9072_v42 = vld [vmem:[%s11099_s9 + $0xa0] sm:$0xe]  ;;  %v5839_v32 = vrot.slane %v5762_v11, 1 }
  0xdf   : > { %9970 = vmatprep.mubr.msk.f32.mxu1 %vm370_vm2, %v1931_v63  ;;  %10320 = vmatprep.mubr.msk.f32.mxu0 %vm370_vm2, %v5825_v56  ;;  %v12436_v63 = vld [vmem:[%s11099_s9 + $0x12c] sm:$0x1]  ;;  %v6061_v41 = vunpack.c.l.bf16 %v9072_v42  ;;  %v8514_v25 = vld [vmem:[%s11099_s9 + $0x60] ss:$8 sps:$4 sm:$0xff]   ;;  %v6094_v42 = vrot.slane %v5736_v45, 2 }
  0xe0   : > { %v5766_v56 = vunpack.c.l.bf16 %v12436_v63 }
  0xe2   : > { %9971 = vmatmul.mubr.msk.f32.vlgmr.msra.gmra.mrb[0].mxu1 %vm370_vm2, %v1932_v58  ;;  %10321 = vmatmul.mubr.msk.f32.gmra.mrb[8].mxu0 %vm370_vm2, %v5828_v18  ;;  %v5841_v58 = vrot.slane %v5763_v24, 1  ;;  %v9074_v18 = vld [vmem:[%s11099_s9 + $0xb0] sm:$0xe]  ;;  %v5845_v7 = vrot.slane %v5766_v56, 1  ;;  %v6062_v24 = vunpack.c.l.bf16 %v9073_v16  ;;  %v6100_v16 = vrot.slane %v5740_v21, 2 }
  0xe3   : > { %9973 = vmatprep.mubr.msk.f32.mxu1 %vm370_vm2, %v1933_v5  ;;  %10323 = vmatprep.mubr.msk.f32.mxu0 %vm370_vm2, %v5831_v19  ;;  %v5842_v5 = vrot.slane %v13881_v15, 1  ;;  %v5840_v19 = vsel %vm319_vm1, %v5838_v26, %v5839_v32  ;;  %v9076_v15 = vld [vmem:[%s11099_s9 + $0xc0] sm:$0xe]  ;;  %v1938_v26 = vunpack.c.h.bf16 %v8512_v46  ;;  %v1939_v32 = vunpack.c.l.bf16 %v8514_v25  ;;  %v12501_v21 = vld [vmem:[%s11099_s9 + $0x14] sm:$0x1] }
  0xe4   : > { %9995 = vmatpush3.msk.msra.mxu1 %vm403_vm0, %v12243_v23  ;;  %v1937_v23 = vunpack.c.l.bf16 %v8512_v46  ;;  %v5846_v30 = vsel %vm319_vm1, %v5844_v62, %v5845_v7  ;;  %v6096_v45 = vrot.slane %v6062_v24, 2  ;;  %v6103_v62 = vrot.slane %v5742_v37, 2  ;;  %v9080_v7 = vld [vmem:[%s11099_s9 + $0xf0] sm:$0xe] }
  0xe5   : > { %10020 = vmatprep.subr.msk.mxu1 %vm403_vm0, %v12443_v49  ;;  %v5843_v29 = vsel %vm319_vm1, %v5841_v58, %v5842_v5  ;;  %v6065_v5 = vunpack.c.l.bf16 %v9076_v15 }
  0xe6   : > { %9974 = vmatmul.mubr.msk.f32.gmra.mrb[2].mxu1 %vm370_vm2, %v1934_v31  ;;  %10324 = vmatmul.mubr.msk.f32.gmra.mrb[10].mxu0 %vm370_vm2, %v5834_v14  ;;  %v6093_v31 = vrot.slane %v6061_v41, 2  ;;  %v6063_v14 = vunpack.c.l.bf16 %v9074_v18  ;;  %v9078_v18 = vld [vmem:[%s11099_s9 + $0xd0] sm:$0xe] }
  0xe7   : > { %9976 = vmatprep.mubr.msk.f32.mxu1 %vm370_vm2, %v1935_v60  ;;  %10326 = vmatprep.mubr.msk.f32.mxu0 %vm370_vm2, %v5837_v55  ;;  %v9075_v60 = vld [vmem:[%s11099_s9 + $0xb8] sm:$0xe] }
  0xe8   : > { %v8516_v55 = vld [vmem:[%s11099_s9 + $0x70] ss:$8 sps:$4 sm:$0xff]   ;;  %v6064_v58 = vunpack.c.l.bf16 %v9075_v60  ;;  %v6095_v46 = vsel %vm780_vm3, %v6093_v31, %v6094_v42  ;;  %v6099_v41 = vrot.slane %v6063_v14, 2  ;;  %v6066_v31 = vunpack.c.l.bf16 %v9077_v44  ;;  %v12507_v42 = vld [vmem:[%s11099_s9 + $0x1c] sm:$0x1] }
  0xe9   : > { %v1941_v15 = vunpack.c.l.bf16 %v8516_v55  ;;  %v1942_v37 = vunpack.c.h.bf16 %v8516_v55  ;;  %v6067_v14 = vunpack.c.l.bf16 %v9078_v18  ;;  %v6109_v55 = vrot.slane %v5746_v48, 2  ;;  %v8544_v48 = vld [vmem:[%s11099_s9 + $0x20] ss:$8 sps:$4 sm:$0xff]  }
  0xea   : > { %9977 = vmatmul.mubr.msk.f32.gmra.mrb[4].mxu1 %vm370_vm2, %v1936_v47  ;;  %10327 = vmatmul.mubr.msk.f32.gmra.mrb[12].mxu0 %vm370_vm2, %v5840_v19  ;;  %v1940_v47 = vunpack.c.h.bf16 %v8514_v25  ;;  %v8540_v19 = vld [vmem:[%s11099_s9 + $0x10] ss:$8 sps:$4 sm:$0xff]   ;;  %v6098_v25 = vsel %vm780_vm3, %v6096_v45, %v6097_v27  ;;  %v6102_v24 = vrot.slane %v6064_v58, 2  ;;  %v6101_v50 = vsel %vm780_vm3, %v6099_v41, %v6100_v16 }
  0xeb   : > { %9979 = vmatprep.mubr.msk.f32.mxu1 %vm370_vm2, %v1937_v23  ;;  %10329 = vmatprep.mubr.msk.f32.mxu0 %vm370_vm2, %v5843_v29  ;;  %v9079_v23 = vld [vmem:[%s11099_s9 + $0xd8] sm:$0xe]  ;;  %v6105_v29 = vrot.slane %v6065_v5, 2  ;;  %v2193_v60 = vunpack.c.l.bf16 %v8540_v19  ;;  %v1944_v45 = vunpack.c.h.bf16 %v12487_v1  ;;  %v2195_v5 = vunpack.c.h.bf16 %v8540_v19  ;;  %v12537_v1 = vld [vmem:[%s11099_s9 + $0x24] sm:$0x1] }
  0xec   : > { %v6068_v39 = vunpack.c.l.bf16 %v9079_v23  ;;  %v9081_v27 = vld [vmem:[%s11099_s9 + $0xf8] sm:$0xe]  ;;  %v6104_v41 = vsel %vm780_vm3, %v6102_v24, %v6103_v62  ;;  %v6108_v44 = vrot.slane %v6066_v31, 2  ;;  %v6115_v23 = vrot.slane %v5750_v22, 2  ;;  %v9082_v19 = vld [vmem:[%s11099_s9 + $0x100] sm:$0xe] }
  0xed   : > { %v12525_v58 = vld [vmem:[%s11099_s9 + $0x90] ss:$8 sps:$4 sm:$0xff]   ;;  %v6107_v16 = vsel %vm780_vm3, %v6105_v29, %v6106_v38  ;;  %v2260_v38 = vrot.slane %v2195_v5, 1  ;;  %v2197_v54 = vunpack.c.l.bf16 %v8544_v48  ;;  %v2198_v24 = vunpack.c.l.bf16 %v12537_v1  ;;  %v9083_v31 = vld [vmem:[%s11099_s9 + $0x108] sm:$0xe] }
  0xee   : > { %9980 = vmatmul.mubr.msk.f32.gmra.mrb[6].mxu1 %vm370_vm2, %v1938_v26  ;;  %10330 = vmatmul.mubr.msk.f32.gmra.mrb[14].mxu0 %vm370_vm2, %v5846_v30  ;;  %v2194_v26 = vunpack.c.l.bf16 %v12501_v21  ;;  %v12517_v30 = vld [vmem:[%s13844_s1 + $0x58] sm:$0xf]  ;;  %v6114_v18 = vrot.slane %v6068_v39, 2  ;;  %v1945_v22 = vunpack.c.l.bf16 %v12525_v58  ;;  %v1946_v62 = vunpack.c.h.bf16 %v12525_v58  ;;  %v9084_v5 = vld [vmem:[%s11099_s9 + $0x110] sm:$0xe] }
  0xef   : > { %9982 = vmatprep.mubr.msk.f32.mxu1 %vm370_vm2, %v1939_v32  ;;  %10334 = vmatprep.mubr.msk.f32.mxu0 %vm370_vm2, %v6095_v46  ;;  %v6069_v32 = vunpack.c.l.bf16 %v9080_v7  ;;  %v2196_v46 = vunpack.c.l.bf16 %v12507_v42  ;;  %v6110_v13 = vsel %vm780_vm3, %v6108_v44, %v6109_v55  ;;  %v6071_v29 = vunpack.c.l.bf16 %v9082_v19  ;;  %v9085_v44 = vld [vmem:[%s11099_s9 + $0x118] sm:$0xe] }
  0xf0   : > { %v2258_v52 = vrot.slane %v2194_v26, 1  ;;  %v6116_v39 = vsel %vm780_vm3, %v6114_v18, %v6115_v23  ;;  %v2199_v55 = vunpack.c.h.bf16 %v8544_v48  ;;  %v2264_v48 = vrot.slane %v2198_v24, 1  ;;  %v8552_v23 = vld [vmem:[%s11099_s9 + $0x40] ss:$8 sps:$4 sm:$0xff]  }
  0xf1   : > { %v6117_v20 = vrot.slane %v6069_v32, 2  ;;  %v2261_v7 = vrot.slane %v2196_v46, 1  ;;  %v6124_v18 = vrot.slane %v5756_v17, 2  ;;  %v6073_v19 = vunpack.c.l.bf16 %v9084_v5 }
  0xf2   : > { %9983 = vmatmul.mubr.msk.f32.gmra.mrb[8].mxu1 %vm370_vm2, %v1940_v47  ;;  %10335 = vmatmul.mubr.msk.f32.vlgmr.msra.gmra.mrb[0].mxu0 %vm370_vm2, %v6098_v25  ;;  %v6111_v47 = vrot.slane %v6067_v14, 2  ;;  %v12556_v25 = vld [vmem:[%s11099_s9 + $0x2c] sm:$0x1]  ;;  %v6074_v17 = vunpack.c.l.bf16 %v9085_v44  ;;  %v2555_v21 = vrot.slane %v2196_v46, 2  ;;  %v12793_v46 = vld [vmem:[%s11099_s9 + $0x118] ss:$8 sps:$4 sm:$0xff]  }
  0xf3   : > { %9985 = vmatprep.mubr.msk.f32.mxu1 %vm370_vm2, %v1941_v15  ;;  %10359 = vmatpush3.msk.msra.mxu0 %vm403_vm0, %v12354_v12  ;;  %v6070_v12 = vunpack.c.l.bf16 %v9081_v27  ;;  %v2257_v15 = vrot.slane %v2193_v60, 1  ;;  %v6121_v60 = vrot.slane %v5754_v0, 2  ;;  %v6119_v27 = vsel %vm780_vm3, %v6117_v20, %v6118_v28  ;;  %v12592_v20 = vld [vmem:[%s11099_s9 + $0x44] sm:$0x1] }
  0xf4   : > { %10337 = vmatprep.mubr.msk.f32.mxu0 %vm370_vm2, %v6101_v50  ;;  %10384 = vmatprep.subr.msk.mxu0 %vm403_vm0, %v12517_v30  ;;  %v8548_v50 = vld [vmem:[%s11099_s9 + $0x30] ss:$8 sps:$4 sm:$0xff]   ;;  %v6113_v14 = vsel %vm780_vm3, %v6111_v47, %v6112_v40  ;;  %v2200_v58 = vunpack.c.l.bf16 %v12556_v25  ;;  %v2262_v3 = vsel %vm319_vm1, %v2260_v38, %v2261_v7  ;;  %v6072_v0 = vunpack.c.l.bf16 %v9083_v31  ;;  %v9086_v38 = vld [vmem:[%s11099_s9 + $0x120] sm:$0xe] }
  0xf5   : > { %v2259_v32 = vsel %vm319_vm1, %v2257_v15, %v2258_v52  ;;  %v2263_v40 = vrot.slane %v2197_v54, 1  ;;  %v6123_v47 = vrot.slane %v6071_v29, 2  ;;  %v2203_v15 = vunpack.c.h.bf16 %v8548_v50  ;;  %v12605_v29 = vld [vmem:[%s11099_s9 + $0x4c] sm:$0x1] }
  0xf6   : > { %9986 = vmatmul.mubr.msk.f32.gmra.mrb[10].mxu1 %vm370_vm2, %v1942_v37  ;;  %10338 = vmatmul.mubr.msk.f32.gmra.mrb[2].mxu0 %vm370_vm2, %v6104_v41  ;;  %v12564_v37 = vld [vmem:[%s11099_s9 + $0x34] sm:$0x1]  ;;  %v12576_v41 = vld [vmem:[%s11099_s9 + $0x3c] sm:$0x1]  ;;  %v2266_v28 = vrot.slane %v2199_v55, 1  ;;  %v6126_v7 = vrot.slane %v6072_v0, 2  ;;  %v2205_v54 = vunpack.c.l.bf16 %v8552_v23  ;;  %v2208_v0 = vunpack.c.l.bf16 %v12605_v29 }
  0xf7   : > { %9988 = vmatprep.mubr.msk.f32.mxu1 %vm370_vm2, %v1943_v4  ;;  %10340 = vmatprep.mubr.msk.f32.mxu0 %vm370_vm2, %v6107_v16  ;;  %v6120_v4 = vrot.slane %v6070_v12, 2  ;;  %v2202_v16 = vunpack.c.l.bf16 %v12564_v37  ;;  %v2204_v52 = vunpack.c.l.bf16 %v12576_v41  ;;  %v2265_v59 = vsel %vm319_vm1, %v2263_v40, %v2264_v48  ;;  %v12620_v55 = vld [vmem:[%s11099_s9 + $0x64] sm:$0x1]  ;;  %v12637_v40 = vld [vmem:[%s11099_s9 + $0x68] ss:$72 sps:$4 sm:$0xff]  }
  0xf8   : > { %v6125_v34 = vsel %vm780_vm3, %v6123_v47, %v6124_v18  ;;  %v6130_v31 = vrot.slane %v5760_v36, 2  ;;  %v6132_v5 = vrot.slane %v6074_v17, 2  ;;  %v2207_v36 = vunpack.c.h.bf16 %v8552_v23  ;;  %v12640_v48 = vld [vmem:[%s11099_s9 + $0x6c] sm:$0x1]  ;;  %v12816_v37 = vld [vmem:[%s11099_s9 + $0xb4] sm:$0x1] }
  0xf9   : > { %v6122_v12 = vsel %vm780_vm3, %v6120_v4, %v6121_v60  ;;  %v6129_v4 = vrot.slane %v6073_v19, 2  ;;  %v2272_v60 = vrot.slane %v2203_v15, 1  ;;  %v6128_v44 = vsel %vm780_vm3, %v6126_v7, %v6127_v51  ;;  %v12650_v19 = vld [vmem:[%s11099_s9 + $0x70] ss:$72 sps:$4 sm:$0xff]   ;;  %v12653_v15 = vld [vmem:[%s11099_s9 + $0x74] sm:$0x1] }
  0xfa   : > { %9989 = vmatmul.mubr.msk.f32.gmra.mrb[12].mxu1 %vm370_vm2, %v1944_v45  ;;  %10341 = vmatmul.mubr.msk.f32.gmra.mrb[4].mxu0 %vm370_vm2, %v6110_v13  ;;  %v2201_v45 = vunpack.c.l.bf16 %v8548_v50  ;;  %v2206_v50 = vunpack.c.l.bf16 %v12592_v20  ;;  %v2275_v11 = vrot.slane %v2205_v54, 1  ;;  %v13910_v17 = vunpack.c.l.bf16 %v12421_v61 }
  0xfb   : > { %9991 = vmatprep.mubr.msk.f32.mxu1 %vm370_vm2, %v1945_v22  ;;  %10343 = vmatprep.mubr.msk.f32.mxu0 %vm370_vm2, %v6113_v14  ;;  %v2267_v22 = vrot.slane %v2200_v58, 1  ;;  %v9087_v14 = vld [vmem:[%s11099_s9 + $0x128] sm:$0xe]  ;;  %v2278_v7 = vrot.slane %v2207_v36, 1  ;;  %v2211_v61 = vunpack.c.l.bf16 %v12637_v40  ;;  %v2212_v54 = vunpack.c.l.bf16 %v12640_v48 }
  0xfc   : > { %v2269_v13 = vrot.slane %v2201_v45, 1  ;;  %v12629_v45 = vld [vmem:[%s13844_s1 + $0x24] sm:$0xf]  ;;  %v2276_v47 = vrot.slane %v2206_v50, 1  ;;  %v6076_v18 = vunpack.c.l.bf16 %v9087_v14  ;;  %v12677_v14 = vld [vmem:[%s11099_s9 + $0x7c] sm:$0x1] }
  0xfd   : > { %v2567_v25 = vrot.slane %v2204_v52, 2 }
  0xfe   : > { %9992 = vmatmul.mubr.msk.f32.gmra.mrb[14].mxu1 %vm370_vm2, %v1946_v62  ;;  %10344 = vmatmul.mubr.msk.f32.gmra.mrb[6].mxu0 %vm370_vm2, %v6116_v39  ;;  %v2270_v62 = vrot.slane %v2202_v16, 1  ;;  %v12615_v39 = vld [vmem:[%s11099_s9 + $0x60] ss:$72 sps:$4 sm:$0xff]   ;;  %v2277_v63 = vsel %vm319_vm1, %v2275_v11, %v2276_v47  ;;  %v2285_v11 = vrot.slane %v2212_v54, 1 }
  0xff   : > { %9996 = vmatprep.mubr.msk.f32.mxu1 %vm370_vm2, %v2259_v32  ;;  %10346 = vmatprep.mubr.msk.f32.mxu0 %vm370_vm2, %v6119_v27  ;;  %v2273_v32 = vrot.slane %v2204_v52, 1  ;;  %v6075_v27 = vunpack.c.l.bf16 %v9086_v38  ;;  %v2209_v23 = vunpack.c.l.bf16 %v12615_v39  ;;  %v6136_v38 = vrot.slane %v13910_v17, 2  ;;  %v12710_v17 = vld [vmem:[%s11099_s9 + $0x8c] sm:$0x1] }
 0x100   : > { %v2271_v35 = vsel %vm319_vm1, %v2269_v13, %v2270_v62  ;;  %v2279_v13 = vrot.slane %v2208_v0, 1  ;;  %v6139_v62 = vrot.slane %v5766_v56, 2  ;;  %v6138_v56 = vrot.slane %v6076_v18, 2 }
 0x101   : > { %v6135_v51 = vrot.slane %v6075_v27, 2  ;;  %v12685_v27 = vld [vmem:[%s11099_s9 + $0x80] ss:$72 sps:$4 sm:$0xff]   ;;  %v6358_v36 = vunpack.c.h.bf16 %v12615_v39  ;;  %v6371_v52 = vunpack.c.h.bf16 %v12793_v46 }
 0x102   : > { %9997 = vmatmul.mubr.msk.f32.vlgmr.msra.gmra.mrb[0].mxu1 %vm370_vm2, %v2262_v3  ;;  %10347 = vmatmul.mubr.msk.f32.gmra.mrb[8].mxu0 %vm370_vm2, %v6122_v12  ;;  %v2268_v3 = vsel %vm319_vm1, %v2266_v28, %v2267_v22  ;;  %v2210_v12 = vunpack.c.l.bf16 %v12620_v55  ;;  %v6131_v28 = vsel %vm780_vm3, %v6129_v4, %v6130_v31  ;;  %v2274_v22 = vsel %vm319_vm1, %v2272_v60, %v2273_v32  ;;  %v12674_v31 = vld [vmem:[%s11099_s9 + $0x78] ss:$72 sps:$4 sm:$0xff]  }
 0x103   : > { %9999 = vmatprep.mubr.msk.f32.mxu1 %vm370_vm2, %v2265_v59  ;;  %10349 = vmatprep.mubr.msk.f32.mxu0 %vm370_vm2, %v6125_v34  ;;  %v2213_v59 = vunpack.c.l.bf16 %v12650_v19  ;;  %v2214_v34 = vunpack.c.l.bf16 %v12653_v15  ;;  %v2281_v4 = vrot.slane %v2209_v23, 1  ;;  %v6137_v32 = vsel %vm780_vm3, %v6135_v51, %v6136_v38  ;;  %v12707_v51 = vld [vmem:[%s11099_s9 + $0x88] ss:$72 sps:$4 sm:$0xff]  }
 0x104   : > { %10021 = vmatpush3.msk.msra.mxu1 %vm403_vm0, %v12443_v49  ;;  %v6134_v49 = vsel %vm780_vm3, %v6132_v5, %v6133_v9  ;;  %v2282_v60 = vrot.slane %v2210_v12, 1  ;;  %v12688_v5 = vld [vmem:[%s11099_s9 + $0x84] sm:$0x1]  ;;  %v2280_v9 = vsel %vm319_vm1, %v2278_v7, %v2279_v13  ;;  %v6140_v39 = vsel %vm780_vm3, %v6138_v56, %v6139_v62  ;;  %v12713_v38 = vld [vmem:[%s11099_s9 + $0x90] ss:$72 sps:$4 sm:$0xff]  }
 0x105   : > { %10046 = vmatprep.subr.msk.mxu1 %vm403_vm0, %v12629_v45  ;;  %v2287_v47 = vrot.slane %v2213_v59, 1  ;;  %v2288_v18 = vrot.slane %v2214_v34, 1  ;;  %v6359_v7 = vunpack.c.h.bf16 %v12637_v40  ;;  %v6360_v13 = vunpack.c.h.bf16 %v12650_v19 }
 0x106   : > { %10000 = vmatmul.mubr.msk.f32.gmra.mrb[2].mxu1 %vm370_vm2, %v2268_v3  ;;  %10350 = vmatmul.mubr.msk.f32.gmra.mrb[10].mxu0 %vm370_vm2, %v6128_v44  ;;  %v2215_v3 = vunpack.c.l.bf16 %v12674_v31  ;;  %v2216_v44 = vunpack.c.l.bf16 %v12677_v14  ;;  %v2283_v23 = vsel %vm319_vm1, %v2281_v4, %v2282_v60  ;;  %v2219_v56 = vunpack.c.l.bf16 %v12707_v51 }
 0x107   : > { %10002 = vmatprep.mubr.msk.f32.mxu1 %vm370_vm2, %v2271_v35  ;;  %10352 = vmatprep.mubr.msk.f32.mxu0 %vm370_vm2, %v6131_v28  ;;  %v2284_v35 = vrot.slane %v2211_v61, 1  ;;  %v2217_v28 = vunpack.c.l.bf16 %v12685_v27  ;;  %v2220_v40 = vunpack.c.l.bf16 %v12710_v17  ;;  %v2221_v60 = vunpack.c.l.bf16 %v12713_v38 }
 0x108   : > { %v2290_v62 = vrot.slane %v2215_v3, 1  ;;  %v2291_v61 = vrot.slane %v2216_v44, 1  ;;  %v12736_v3 = vld [vmem:[%s11099_s9 + $0x9c] sm:$0x1] }
 0x109   : > { %v2286_v59 = vsel %vm319_vm1, %v2284_v35, %v2285_v11  ;;  %v2293_v19 = vrot.slane %v2217_v28, 1  ;;  %v8590_v35 = vld [vmem:[%s11099_s9 + $0x10] sm:$0xe] }
 0x10a   : > { %10003 = vmatmul.mubr.msk.f32.gmra.mrb[4].mxu1 %vm370_vm2, %v2274_v22  ;;  %10353 = vmatmul.mubr.msk.f32.gmra.mrb[12].mxu0 %vm370_vm2, %v6134_v49  ;;  %v2218_v22 = vunpack.c.l.bf16 %v12688_v5  ;;  %v12716_v49 = vld [vmem:[%s11099_s9 + $0x94] sm:$0x1]  ;;  %v2292_v11 = vsel %vm319_vm1, %v2290_v62, %v2291_v61  ;;  %v2224_v62 = vunpack.c.l.bf16 %v12736_v3  ;;  %v2519_v61 = vunpack.c.l.bf16 %v8590_v35 }
 0x10b   : > { %10005 = vmatprep.mubr.msk.f32.mxu1 %vm370_vm2, %v2277_v63  ;;  %10355 = vmatprep.mubr.msk.f32.mxu0 %vm370_vm2, %v6137_v32  ;;  %v2289_v63 = vsel %vm319_vm1, %v2287_v47, %v2288_v18  ;;  %v13882_v32 = vunpack.c.l.bf16 %v12716_v49  ;;  %v6361_v47 = vunpack.c.h.bf16 %v12674_v31  ;;  %v12746_v18 = vld [vmem:[%s13844_s1 + $0x5c] sm:$0xf]  ;;  %v2591_v5 = vrot.slane %v2220_v40, 2 }
 0x10c   : > { %v2294_v4 = vrot.slane %v2218_v22, 1 }
 0x10e   : > { %10006 = vmatmul.mubr.msk.f32.gmra.mrb[6].mxu1 %vm370_vm2, %v2280_v9  ;;  %10356 = vmatmul.mubr.msk.f32.gmra.mrb[14].mxu0 %vm370_vm2, %v6140_v39  ;;  %v8570_v9 = vld [vmem:[%s11099_s9 + $0x98] ss:$72 sps:$4 sm:$0xff]   ;;  %v2296_v39 = vrot.slane %v2219_v56, 1  ;;  %v2295_v31 = vsel %vm319_vm1, %v2293_v19, %v2294_v4  ;;  %v2303_v4 = vrot.slane %v2224_v62, 1 }
 0x10f   : > { %10008 = vmatprep.mubr.msk.f32.mxu1 %vm370_vm2, %v2283_v23  ;;  %10360 = vmatprep.mubr.msk.f32.mxu0 %vm370_vm2, %v6358_v36  ;;  %v6362_v36 = vunpack.c.h.bf16 %v12685_v27  ;;  %v2297_v23 = vrot.slane %v2220_v40, 1  ;;  %v2223_v28 = vunpack.c.l.bf16 %v8570_v9  ;;  %v2299_v27 = vrot.slane %v2221_v60, 1  ;;  %v9117_v60 = vld [vmem:[%s11099_s9 + $0xf8] ss:$8 sps:$4 sm:$0xff]  }
 0x110   : > { %v6367_v42 = vunpack.c.h.bf16 %v9117_v60  ;;  %v12934_v40 = vld [vmem:[%s13844_s1 + $0x60] sm:$0xf] }
 0x111   : > { %v2298_v56 = vsel %vm319_vm1, %v2296_v39, %v2297_v23  ;;  %v2302_v19 = vrot.slane %v2223_v28, 1  ;;  %v6365_v39 = vunpack.c.h.bf16 %v8570_v9  ;;  %v6366_v23 = vunpack.c.l.bf16 %v9117_v60  ;;  %v8595_v28 = vld [vmem:[%s11099_s9 + $0x38] sm:$0xe] }
 0x112   : > { %10009 = vmatmul.mubr.msk.f32.gmra.mrb[8].mxu1 %vm370_vm2, %v2286_v59  ;;  %10361 = vmatmul.mubr.msk.f32.vlgmr.msra.gmra.mrb[0].mxu0 %vm370_vm2, %v6359_v7  ;;  %v2300_v7 = vrot.slane %v13882_v32, 1  ;;  %v8591_v59 = vld [vmem:[%s11099_s9 + $0x18] sm:$0xe]  ;;  %v8593_v32 = vld [vmem:[%s11099_s9 + $0x28] sm:$0xe] }
 0x113   : > { %10011 = vmatprep.mubr.msk.f32.mxu1 %vm370_vm2, %v2289_v63  ;;  %10385 = vmatpush3.msk.msra.mxu0 %vm403_vm0, %v12517_v30  ;;  %v8592_v63 = vld [vmem:[%s11099_s9 + $0x20] sm:$0xe]  ;;  %v6363_v30 = vunpack.c.h.bf16 %v12707_v51  ;;  %v2520_v35 = vunpack.c.l.bf16 %v8591_v59  ;;  %v2551_v51 = vrot.slane %v2519_v61, 2  ;;  %v2558_v61 = vrot.slane %v2198_v24, 2  ;;  %v9119_v59 = vld [vmem:[%s11099_s9 + $0x108] ss:$8 sps:$4 sm:$0xff]  }
 0x114   : > { %10363 = vmatprep.mubr.msk.f32.mxu0 %vm370_vm2, %v6360_v13  ;;  %10410 = vmatprep.subr.msk.mxu0 %vm403_vm0, %v12746_v18  ;;  %v6364_v13 = vunpack.c.h.bf16 %v12713_v38  ;;  %v2552_v38 = vrot.slane %v2194_v26, 2  ;;  %v2522_v26 = vunpack.c.l.bf16 %v8593_v32  ;;  %v6368_v1 = vunpack.c.l.bf16 %v9119_v59 }
 0x115   : > { %v2561_v24 = vrot.slane %v2200_v58, 2  ;;  %v6369_v58 = vunpack.c.h.bf16 %v9119_v59  ;;  %v2570_v59 = vrot.slane %v2206_v50, 2  ;;  %v2576_v50 = vrot.slane %v2210_v12, 2 }
 0x116   : > { %10012 = vmatmul.mubr.msk.f32.gmra.mrb[10].mxu1 %vm370_vm2, %v2292_v11  ;;  %10364 = vmatmul.mubr.msk.f32.gmra.mrb[2].mxu0 %vm370_vm2, %v6361_v47  ;;  %v2301_v11 = vsel %vm319_vm1, %v2299_v27, %v2300_v7  ;;  %v2521_v47 = vunpack.c.l.bf16 %v8592_v63  ;;  %v2554_v27 = vrot.slane %v2520_v35, 2  ;;  %v2553_v7 = vsel %vm780_vm3, %v2551_v51, %v2552_v38  ;;  %v9143_v38 = vld [vmem:[%s11099_s9 + $0xa8] ss:$8 sps:$4 sm:$0xff]  }
 0x117   : > { %10014 = vmatprep.mubr.msk.f32.mxu1 %vm370_vm2, %v2295_v31  ;;  %10366 = vmatprep.mubr.msk.f32.mxu0 %vm370_vm2, %v6362_v36  ;;  %v8594_v31 = vld [vmem:[%s11099_s9 + $0x30] sm:$0xe]  ;;  %v2304_v36 = vsel %vm319_vm1, %v2302_v19, %v2303_v4  ;;  %v8597_v19 = vld [vmem:[%s11099_s9 + $0x48] sm:$0xe]  ;;  %v8598_v4 = vld [vmem:[%s11099_s9 + $0x60] sm:$0xe] }
 0x118   : > { %v2557_v9 = vrot.slane %v2521_v47, 2  ;;  %v2523_v63 = vunpack.c.l.bf16 %v8594_v31  ;;  %v2556_v32 = vsel %vm780_vm3, %v2554_v27, %v2555_v21  ;;  %v12808_v47 = vld [vmem:[%s11099_s9 + $0xac] sm:$0x1]  ;;  %v6620_v27 = vunpack.c.l.bf16 %v9143_v38 }
 0x119   : > { %v6621_v21 = vunpack.c.l.bf16 %v12808_v47 }
 0x11a   : > { %10015 = vmatmul.mubr.msk.f32.gmra.mrb[12].mxu1 %vm370_vm2, %v2298_v56  ;;  %10367 = vmatmul.mubr.msk.f32.gmra.mrb[4].mxu0 %vm370_vm2, %v6363_v30  ;;  %v2524_v30 = vunpack.c.l.bf16 %v8595_v28  ;;  %v8596_v56 = vld [vmem:[%s11099_s9 + $0x40] sm:$0xe]  ;;  %v2559_v60 = vsel %vm780_vm3, %v2557_v9, %v2558_v61  ;;  %v2563_v35 = vrot.slane %v2523_v63, 2  ;;  %v2527_v28 = vunpack.c.l.bf16 %v8598_v4 }
 0x11b   : > { %10017 = vmatprep.mubr.msk.f32.mxu1 %vm370_vm2, %v2301_v11  ;;  %10369 = vmatprep.mubr.msk.f32.mxu0 %vm370_vm2, %v6364_v13  ;;  %v2560_v13 = vrot.slane %v2522_v26, 2  ;;  %v2564_v11 = vrot.slane %v2202_v16, 2  ;;  %v2525_v51 = vunpack.c.l.bf16 %v8596_v56  ;;  %v12821_v16 = vld [vmem:[%s13844_s1 + $0x28] sm:$0xf]  ;;  %v8600_v26 = vld [vmem:[%s11099_s9 + $0x70] sm:$0xe] }
 0x11c   : > { %v2566_v31 = vrot.slane %v2524_v30, 2  ;;  %v2573_v63 = vrot.slane %v2208_v0, 2  ;;  %v12841_v30 = vld [vmem:[%s11099_s9 + $0xbc] sm:$0x1]  ;;  %v2575_v29 = vrot.slane %v2527_v28, 2  ;;  %v2529_v0 = vunpack.c.l.bf16 %v8600_v26 }
 0x11d   : > { %v2562_v41 = vsel %vm780_vm3, %v2560_v13, %v2561_v24  ;;  %v2565_v9 = vsel %vm780_vm3, %v2563_v35, %v2564_v11  ;;  %v2569_v61 = vrot.slane %v2525_v51, 2  ;;  %v6684_v13 = vrot.slane %v6620_v27, 1  ;;  %v8602_v51 = vld [vmem:[%s11099_s9 + $0x80] sm:$0xe]  ;;  %v12870_v28 = vld [vmem:[%s11099_s9 + $0xcc] sm:$0x1] }
 0x11e   : > { %10018 = vmatmul.mubr.msk.f32.gmra.mrb[14].mxu1 %vm370_vm2, %v2304_v36  ;;  %10370 = vmatmul.mubr.msk.f32.gmra.mrb[6].mxu0 %vm370_vm2, %v6365_v39  ;;  %v6370_v39 = vunpack.c.l.bf16 %v12793_v46  ;;  %v8599_v36 = vld [vmem:[%s11099_s9 + $0x68] sm:$0xe]  ;;  %v2568_v56 = vsel %vm780_vm3, %v2566_v31, %v2567_v25  ;;  %v6685_v24 = vrot.slane %v6621_v21, 1  ;;  %v6625_v4 = vunpack.c.l.bf16 %v12841_v30 }
 0x11f   : > { %10022 = vmatprep.mubr.msk.f32.mxu1 %vm370_vm2, %v2553_v7  ;;  %10372 = vmatprep.mubr.msk.f32.mxu0 %vm370_vm2, %v6366_v23  ;;  %v2526_v23 = vunpack.c.l.bf16 %v8597_v19  ;;  %v12830_v7 = vld [vmem:[%s11099_s9 + $0xb8] ss:$8 sps:$4 sm:$0xff]   ;;  %v2528_v46 = vunpack.c.l.bf16 %v8599_v36  ;;  %v2571_v55 = vsel %vm780_vm3, %v2569_v61, %v2570_v59  ;;  %v2579_v11 = vrot.slane %v2212_v54, 2  ;;  %v8603_v61 = vld [vmem:[%s11099_s9 + $0x88] sm:$0xe] }
 0x120   : > { %v6624_v19 = vunpack.c.l.bf16 %v12830_v7  ;;  %v2577_v36 = vsel %vm780_vm3, %v2575_v29, %v2576_v50  ;;  %v2581_v48 = vrot.slane %v2529_v0, 2  ;;  %v2582_v54 = vrot.slane %v2214_v34, 2  ;;  %v12885_v59 = vld [vmem:[%s11099_s9 + $0xd4] sm:$0x1] }
 0x121   : > { %v2572_v20 = vrot.slane %v2526_v23, 2  ;;  %v2578_v31 = vrot.slane %v2528_v46, 2  ;;  %v6691_v26 = vrot.slane %v6625_v4, 1  ;;  %v2531_v34 = vunpack.c.l.bf16 %v8602_v51 }
 0x122   : > { %10023 = vmatmul.mubr.msk.f32.vlgmr.msra.gmra.mrb[0].mxu1 %vm370_vm2, %v2556_v32  ;;  %10373 = vmatmul.mubr.msk.f32.gmra.mrb[8].mxu0 %vm370_vm2, %v6367_v42  ;;  %v9123_v42 = vld [vmem:[%s11099_s9 + $0x128] ss:$8 sps:$4 sm:$0xff]   ;;  %v6622_v32 = vunpack.c.h.bf16 %v9143_v38  ;;  %v6690_v27 = vrot.slane %v6624_v19, 1  ;;  %v2532_v29 = vunpack.c.l.bf16 %v8603_v61  ;;  %v6631_v0 = vunpack.c.l.bf16 %v12885_v59 }
 0x123   : > { %10025 = vmatprep.mubr.msk.f32.mxu1 %vm370_vm2, %v2559_v60  ;;  %10375 = vmatprep.mubr.msk.f32.mxu0 %vm370_vm2, %v6368_v1  ;;  %v6623_v1 = vunpack.c.l.bf16 %v12816_v37  ;;  %v12859_v60 = vld [vmem:[%s11099_s9 + $0xc4] sm:$0x1]  ;;  %v6372_v12 = vunpack.c.l.bf16 %v9123_v42  ;;  %v6373_v35 = vunpack.c.h.bf16 %v9123_v42  ;;  %v9151_v38 = vld [vmem:[%s11099_s9 + $0xc8] ss:$8 sps:$4 sm:$0xff]   ;;  %v2580_v42 = vsel %vm780_vm3, %v2578_v31, %v2579_v11 }
 0x124   : > { %10047 = vmatpush3.msk.msra.mxu1 %vm403_vm0, %v12629_v45  ;;  %v8601_v45 = vld [vmem:[%s11099_s9 + $0x78] sm:$0xe]  ;;  %v6687_v25 = vrot.slane %v6622_v32, 1  ;;  %v6627_v15 = vunpack.c.l.bf16 %v12859_v60  ;;  %v2585_v32 = vrot.slane %v2216_v44, 2  ;;  %v6630_v50 = vunpack.c.h.bf16 %v9151_v38  ;;  %v13085_v37 = vld [vmem:[%s11099_s9 + $0xc0] ss:$8 sps:$4 sm:$0xff]  }
 0x125   : > { %10072 = vmatprep.subr.msk.mxu1 %vm403_vm0, %v12821_v16  ;;  %v2530_v23 = vunpack.c.l.bf16 %v8601_v45  ;;  %v9155_v45 = vld [vmem:[%s11099_s9 + $0xd8] ss:$8 sps:$4 sm:$0xff]   ;;  %v6692_v14 = vsel %vm319_vm1, %v6690_v27, %v6691_v26  ;;  %v2587_v11 = vrot.slane %v2531_v34, 2 }
 0x126   : > { %10026 = vmatmul.mubr.msk.f32.gmra.mrb[2].mxu1 %vm370_vm2, %v2562_v41  ;;  %10376 = vmatmul.mubr.msk.f32.gmra.mrb[10].mxu0 %vm370_vm2, %v6369_v58  ;;  %v6688_v58 = vrot.slane %v6623_v1, 1  ;;  %v6686_v41 = vsel %vm319_vm1, %v6684_v13, %v6685_v24  ;;  %v12900_v13 = vld [vmem:[%s11099_s9 + $0xdc] sm:$0x1]  ;;  %v2588_v24 = vrot.slane %v2218_v22, 2  ;;  %v6632_v22 = vunpack.c.l.bf16 %v9155_v45 }
 0x127   : > { %10028 = vmatprep.mubr.msk.f32.mxu1 %vm370_vm2, %v2565_v9  ;;  %10378 = vmatprep.mubr.msk.f32.mxu0 %vm370_vm2, %v6370_v39  ;;  %v2574_v39 = vsel %vm780_vm3, %v2572_v20, %v2573_v63  ;;  %v6626_v9 = vunpack.c.h.bf16 %v12830_v7  ;;  %v6629_v63 = vunpack.c.l.bf16 %v12870_v28  ;;  %v2584_v7 = vrot.slane %v2530_v23, 2  ;;  %v12924_v23 = vld [vmem:[%s11099_s9 + $0xfc] sm:$0x1] }
 0x128   : > { %v6689_v46 = vsel %vm319_vm1, %v6687_v25, %v6688_v58  ;;  %v2583_v20 = vsel %vm780_vm3, %v2581_v48, %v2582_v54  ;;  %v6633_v25 = vunpack.c.l.bf16 %v12900_v13  ;;  %v12921_v58 = vld [vmem:[%s11099_s9 + $0x50] ss:$168 sps:$4 sm:$0xff]   ;;  %v6700_v48 = vrot.slane %v6631_v0, 1 }
 0x129   : > { %v6693_v44 = vrot.slane %v6626_v9, 1  ;;  %v2586_v31 = vsel %vm780_vm3, %v2584_v7, %v2585_v32  ;;  %v13911_v54 = vunpack.c.l.bf16 %v12716_v49  ;;  %v6634_v26 = vunpack.c.h.bf16 %v9155_v45  ;;  %v12956_v32 = vld [vmem:[%s11099_s9 + $0x60] ss:$168 sps:$4 sm:$0xff]  }
 0x12a   : > { %10029 = vmatmul.mubr.msk.f32.gmra.mrb[4].mxu1 %vm370_vm2, %v2568_v56  ;;  %10379 = vmatmul.mubr.msk.f32.gmra.mrb[12].mxu0 %vm370_vm2, %v6371_v52  ;;  %v6628_v52 = vunpack.c.l.bf16 %v9151_v38  ;;  %v8604_v56 = vld [vmem:[%s11099_s9 + $0x90] sm:$0xe]  ;;  %v12914_v38 = vld [vmem:[%s11099_s9 + $0xe4] sm:$0x1]  ;;  %v2589_v61 = vsel %vm780_vm3, %v2587_v11, %v2588_v24  ;;  %v6636_v7 = vunpack.c.h.bf16 %v12921_v58  ;;  %v2597_v45 = vrot.slane %v2224_v62, 2 }
 0x12b   : > { %10031 = vmatprep.mubr.msk.f32.mxu1 %vm370_vm2, %v2571_v55  ;;  %10381 = vmatprep.mubr.msk.f32.mxu0 %vm370_vm2, %v6372_v12  ;;  %v2533_v19 = vunpack.c.l.bf16 %v8604_v56  ;;  %v8605_v55 = vld [vmem:[%s11099_s9 + $0x98] sm:$0xe]  ;;  %v6694_v12 = vrot.slane %v6627_v15, 1  ;;  %v2594_v17 = vrot.slane %v13911_v54, 2  ;;  %v6635_v9 = vunpack.c.l.bf16 %v12914_v38  ;;  %v12949_v56 = vld [vmem:[%s11099_s9 + $0x104] sm:$0x1] }
 0x12c   : > { %v6696_v51 = vrot.slane %v6628_v52, 1  ;;  %v2534_v27 = vunpack.c.l.bf16 %v8605_v55  ;;  %v12946_v52 = vld [vmem:[%s11099_s9 + $0x58] ss:$168 sps:$4 sm:$0xff]   ;;  %v6705_v24 = vrot.slane %v6634_v26, 1  ;;  %v6639_v3 = vunpack.c.l.bf16 %v12949_v56  ;;  %v12979_v11 = vld [vmem:[%s11099_s9 + $0x68] ss:$168 sps:$4 sm:$0xff]  }
 0x12d   : > { %v6695_v49 = vsel %vm319_vm1, %v6693_v44, %v6694_v12  ;;  %v6638_v55 = vunpack.c.h.bf16 %v12946_v52  ;;  %v6640_v62 = vunpack.c.h.bf16 %v12956_v32  ;;  %v6991_v30 = vrot.slane %v6629_v63, 2 }
 0x12e   : > { %10032 = vmatmul.mubr.msk.f32.gmra.mrb[6].mxu1 %vm370_vm2, %v2574_v39  ;;  %10382 = vmatmul.mubr.msk.f32.gmra.mrb[14].mxu0 %vm370_vm2, %v6373_v35  ;;  %v6697_v35 = vrot.slane %v6629_v63, 1  ;;  %v2590_v39 = vrot.slane %v2532_v29, 2  ;;  %v2596_v44 = vrot.slane %v2534_v27, 2  ;;  %v6712_v27 = vrot.slane %v6639_v3, 1 }
 0x12f   : > { %10034 = vmatprep.mubr.msk.f32.mxu1 %vm370_vm2, %v2577_v36  ;;  %10386 = vmatprep.mubr.msk.f32.mxu0 %vm370_vm2, %v6686_v41  ;;  %v6699_v36 = vrot.slane %v6630_v50, 1  ;;  %v2593_v41 = vrot.slane %v2533_v19, 2  ;;  %v6706_v19 = vrot.slane %v6635_v9, 1  ;;  %v6714_v26 = vrot.slane %v6640_v62, 1 }
 0x130   : > { %v6698_v34 = vsel %vm319_vm1, %v6696_v51, %v6697_v35  ;;  %v2592_v29 = vsel %vm780_vm3, %v2590_v39, %v2591_v5  ;;  %v12982_v51 = vld [vmem:[%s11099_s9 + $0x114] sm:$0x1]  ;;  %v12990_v39 = vld [vmem:[%s11099_s9 + $0x70] ss:$168 sps:$4 sm:$0xff]   ;;  %v2829_v63 = vunpack.c.l.bf16 %v13085_v37  ;;  %v6997_v59 = vrot.slane %v6633_v25, 2 }
 0x131   : > { %v6701_v50 = vsel %vm319_vm1, %v6699_v36, %v6700_v48  ;;  %v12993_v36 = vld [vmem:[%s11099_s9 + $0x11c] sm:$0x1]  ;;  %v2598_v48 = vsel %vm780_vm3, %v2596_v44, %v2597_v45  ;;  %v6707_v54 = vsel %vm319_vm1, %v6705_v24, %v6706_v19  ;;  %v13017_v45 = vld [vmem:[%s11099_s9 + $0x12c] sm:$0x1] }
 0x132   : > { %10035 = vmatmul.mubr.msk.f32.gmra.mrb[8].mxu1 %vm370_vm2, %v2580_v42  ;;  %10387 = vmatmul.mubr.msk.f32.vlgmr.msra.gmra.mrb[0].mxu0 %vm370_vm2, %v6689_v46  ;;  %v6702_v42 = vrot.slane %v6632_v22, 1  ;;  %v6703_v46 = vrot.slane %v6633_v25, 1  ;;  %v2817_v22 = vunpack.c.l.bf16 %v12921_v58  ;;  %v6643_v58 = vunpack.c.l.bf16 %v12982_v51 }
 0x133   : > { %10037 = vmatprep.mubr.msk.f32.mxu1 %vm370_vm2, %v2583_v20  ;;  %10411 = vmatpush3.msk.msra.mxu0 %vm403_vm0, %v12746_v18  ;;  %v6637_v18 = vunpack.c.l.bf16 %v12924_v23  ;;  %v12959_v20 = vld [vmem:[%s11099_s9 + $0x10c] sm:$0x1] }
 0x134   : > { %10389 = vmatprep.mubr.msk.f32.mxu0 %vm370_vm2, %v6692_v14  ;;  %10436 = vmatprep.subr.msk.mxu0 %vm403_vm0, %v12934_v40  ;;  %v2595_v14 = vsel %vm780_vm3, %v2593_v41, %v2594_v17  ;;  %v6641_v12 = vunpack.c.l.bf16 %v12959_v20  ;;  %v6704_v35 = vsel %vm319_vm1, %v6702_v42, %v6703_v46  ;;  %v6642_v17 = vunpack.c.h.bf16 %v12979_v11  ;;  %v8631_v46 = vld [vmem:[%s11099_s9 + $0x78] ss:$168 sps:$4 sm:$0xff]  }
 0x135   : > { %v6709_v5 = vrot.slane %v6637_v18, 1  ;;  %v6711_v41 = vrot.slane %v6638_v55, 1  ;;  %v6645_v42 = vunpack.c.l.bf16 %v12993_v36  ;;  %v6718_v24 = vrot.slane %v6643_v58, 1 }
 0x136   : > { %10038 = vmatmul.mubr.msk.f32.gmra.mrb[10].mxu1 %vm370_vm2, %v2586_v31  ;;  %10390 = vmatmul.mubr.msk.f32.gmra.mrb[2].mxu0 %vm370_vm2, %v6695_v49  ;;  %v6708_v31 = vrot.slane %v6636_v7, 1  ;;  %v6715_v49 = vrot.slane %v6641_v12, 1  ;;  %v13011_v7 = vld [vmem:[%s11099_s9 + $0x124] sm:$0x1]  ;;  %v6717_v44 = vrot.slane %v6642_v17, 1  ;;  %v6646_v55 = vunpack.c.h.bf16 %v8631_v46 }
 0x137   : > { %10040 = vmatprep.mubr.msk.f32.mxu1 %vm370_vm2, %v2589_v61  ;;  %10392 = vmatprep.mubr.msk.f32.mxu0 %vm370_vm2, %v6698_v34  ;;  %v6644_v34 = vunpack.c.h.bf16 %v12990_v39  ;;  %v6647_v62 = vunpack.c.l.bf16 %v13011_v7  ;;  %v9193_v17 = vld [vmem:[%s11099_s9 + $0xa8] sm:$0xe]  ;;  %v7003_v38 = vrot.slane %v6637_v18, 2  ;;  %v7012_v20 = vrot.slane %v6643_v58, 2 }
 0x138   : > { %v6710_v61 = vsel %vm319_vm1, %v6708_v31, %v6709_v5  ;;  %v6716_v19 = vsel %vm319_vm1, %v6714_v26, %v6715_v49  ;;  %v6721_v31 = vrot.slane %v6645_v42, 1  ;;  %v2821_v26 = vunpack.c.l.bf16 %v12990_v39 }
 0x139   : > { %v6723_v49 = vrot.slane %v6646_v55, 1  ;;  %v6946_v39 = vunpack.c.l.bf16 %v9193_v17  ;;  %v7018_v36 = vrot.slane %v6647_v62, 2 }
 0x13a   : > { %10041 = vmatmul.mubr.msk.f32.gmra.mrb[12].mxu1 %vm370_vm2, %v2592_v29  ;;  %10393 = vmatmul.mubr.msk.f32.gmra.mrb[4].mxu0 %vm370_vm2, %v6701_v50  ;;  %v2818_v29 = vunpack.c.l.bf16 %v12946_v52  ;;  %v8632_v50 = vld [vmem:[%s11099_s9 + $0x80] ss:$168 sps:$4 sm:$0xff]   ;;  %v6713_v52 = vsel %vm319_vm1, %v6711_v41, %v6712_v27  ;;  %v13041_v41 = vld [vmem:[%s13844_s1 + $0x2c] sm:$0xf]  ;;  %v6719_v27 = vsel %vm319_vm1, %v6717_v44, %v6718_v24  ;;  %v9194_v24 = vld [vmem:[%s11099_s9 + $0xb0] sm:$0xe] }
 0x13b   : > { %10043 = vmatprep.mubr.msk.f32.mxu1 %vm370_vm2, %v2595_v14  ;;  %10395 = vmatprep.mubr.msk.f32.mxu0 %vm370_vm2, %v6704_v35  ;;  %v2819_v14 = vunpack.c.l.bf16 %v12956_v32  ;;  %v6720_v35 = vrot.slane %v6644_v34, 1  ;;  %v6648_v5 = vunpack.c.h.bf16 %v8632_v50  ;;  %v13883_v32 = vunpack.c.l.bf16 %v13017_v45 }
 0x13c   : > { %v6947_v17 = vunpack.c.l.bf16 %v9194_v24  ;;  %v6985_v24 = vrot.slane %v6625_v4, 2  ;;  %v13099_v4 = vld [vmem:[%s11099_s9 + $0x54] sm:$0x1] }
 0x13d   : > { %v6727_v44 = vrot.slane %v13883_v32, 1 }
 0x13e   : > { %10044 = vmatmul.mubr.msk.f32.gmra.mrb[14].mxu1 %vm370_vm2, %v2598_v48  ;;  %10396 = vmatmul.mubr.msk.f32.gmra.mrb[6].mxu0 %vm370_vm2, %v6707_v54  ;;  %v13033_v48 = vld [vmem:[%s11099_s9 + $0x134] sm:$0x1]  ;;  %v2820_v54 = vunpack.c.l.bf16 %v12979_v11  ;;  %v6724_v11 = vrot.slane %v6647_v62, 1 }
 0x13f   : > { %10048 = vmatprep.mubr.msk.f32.mxu1 %vm370_vm2, %v2817_v22  ;;  %10398 = vmatprep.mubr.msk.f32.mxu0 %vm370_vm2, %v6710_v61  ;;  %v8633_v22 = vld [vmem:[%s11099_s9 + $0x88] ss:$168 sps:$4 sm:$0xff]   ;;  %v6651_v34 = vunpack.c.l.bf16 %v13033_v48 }
 0x140   : > { %v6650_v61 = vunpack.c.h.bf16 %v8633_v22  ;;  %v6725_v55 = vsel %vm319_vm1, %v6723_v49, %v6724_v11  ;;  %v2824_v49 = vunpack.c.l.bf16 %v8633_v22 }
 0x142   : > { %10049 = vmatmul.mubr.msk.f32.vlgmr.msra.gmra.mrb[0].mxu1 %vm370_vm2, %v2818_v29  ;;  %10399 = vmatmul.mubr.msk.f32.gmra.mrb[8].mxu0 %vm370_vm2, %v6713_v52  ;;  %v6722_v29 = vsel %vm319_vm1, %v6720_v35, %v6721_v31  ;;  %v2822_v52 = vunpack.c.l.bf16 %v8631_v46  ;;  %v6729_v35 = vrot.slane %v6650_v61, 1  ;;  %v6730_v31 = vrot.slane %v6651_v34, 1 }
 0x143   : > { %10051 = vmatprep.mubr.msk.f32.mxu1 %vm370_vm2, %v2819_v14  ;;  %10401 = vmatprep.mubr.msk.f32.mxu0 %vm370_vm2, %v6716_v19  ;;  %v6726_v14 = vrot.slane %v6648_v5, 1  ;;  %v9195_v19 = vld [vmem:[%s11099_s9 + $0xb8] sm:$0xe]  ;;  %v8634_v5 = vld [vmem:[%s11099_s9 + $0xa0] ss:$8 sps:$4 sm:$0xff]   ;;  %v6982_v61 = vrot.slane %v6623_v1, 2 }
 0x144   : > { %10073 = vmatpush3.msk.msra.mxu1 %vm403_vm0, %v12821_v16  ;;  %v2823_v16 = vunpack.c.l.bf16 %v8632_v50  ;;  %v6948_v32 = vunpack.c.l.bf16 %v9195_v19  ;;  %v9197_v50 = vld [vmem:[%s11099_s9 + $0xc8] sm:$0xe]  ;;  %v2825_v11 = vunpack.c.l.bf16 %v8634_v5  ;;  %v6731_v47 = vsel %vm319_vm1, %v6729_v35, %v6730_v31  ;;  %v9198_v1 = vld [vmem:[%s11099_s9 + $0xd0] sm:$0xe]  ;;  %v9199_v19 = vld [vmem:[%s11099_s9 + $0xd8] sm:$0xe] }
 0x145   : > { %10098 = vmatprep.subr.msk.mxu1 %vm403_vm0, %v13041_v41  ;;  %v6728_v46 = vsel %vm319_vm1, %v6726_v14, %v6727_v44  ;;  %v6950_v44 = vunpack.c.l.bf16 %v9197_v50  ;;  %v9201_v31 = vld [vmem:[%s11099_s9 + $0xf8] sm:$0xe] }
 0x146   : > { %10052 = vmatmul.mubr.msk.f32.gmra.mrb[2].mxu1 %vm370_vm2, %v2820_v54  ;;  %10402 = vmatmul.mubr.msk.f32.gmra.mrb[10].mxu0 %vm370_vm2, %v6719_v27  ;;  %v6978_v54 = vrot.slane %v6946_v39, 2  ;;  %v6979_v27 = vrot.slane %v6621_v21, 2  ;;  %v6981_v21 = vrot.slane %v6947_v17, 2  ;;  %v6984_v39 = vrot.slane %v6948_v32, 2 }
 0x147   : > { %10054 = vmatprep.mubr.msk.f32.mxu1 %vm370_vm2, %v2821_v26  ;;  %10404 = vmatprep.mubr.msk.f32.mxu0 %vm370_vm2, %v6722_v29  ;;  %v9196_v26 = vld [vmem:[%s11099_s9 + $0xc0] sm:$0xe]  ;;  %v8636_v29 = vld [vmem:[%s11099_s9 + $0xb0] ss:$8 sps:$4 sm:$0xff]   ;;  %v6988_v32 = vrot.slane %v6627_v15, 2 }
 0x148   : > { %v6949_v14 = vunpack.c.l.bf16 %v9196_v26  ;;  %v6980_v22 = vsel %vm780_vm3, %v6978_v54, %v6979_v27  ;;  %v2827_v35 = vunpack.c.l.bf16 %v8636_v29  ;;  %v6951_v54 = vunpack.c.l.bf16 %v9198_v1  ;;  %v13105_v27 = vld [vmem:[%s11099_s9 + $0x5c] sm:$0x1] }
 0x149   : > { %v6986_v60 = vsel %vm780_vm3, %v6984_v39, %v6985_v24  ;;  %v2828_v15 = vunpack.c.h.bf16 %v8636_v29  ;;  %v6952_v26 = vunpack.c.l.bf16 %v9199_v19  ;;  %v6994_v29 = vrot.slane %v6631_v0, 2  ;;  %v8664_v0 = vld [vmem:[%s11099_s9 + $0x60] ss:$8 sps:$4 sm:$0xff]  }
 0x14a   : > { %10055 = vmatmul.mubr.msk.f32.gmra.mrb[4].mxu1 %vm370_vm2, %v2822_v52  ;;  %10405 = vmatmul.mubr.msk.f32.gmra.mrb[12].mxu0 %vm370_vm2, %v6725_v55  ;;  %v2826_v52 = vunpack.c.h.bf16 %v8634_v5  ;;  %v8660_v55 = vld [vmem:[%s11099_s9 + $0x50] ss:$8 sps:$4 sm:$0xff]   ;;  %v6983_v5 = vsel %vm780_vm3, %v6981_v21, %v6982_v61  ;;  %v6987_v17 = vrot.slane %v6949_v14, 2  ;;  %v9202_v61 = vld [vmem:[%s11099_s9 + $0x100] sm:$0xe]  ;;  %v2830_v21 = vunpack.c.h.bf16 %v13085_v37 }
 0x14b   : > { %10057 = vmatprep.mubr.msk.f32.mxu1 %vm370_vm2, %v2823_v16  ;;  %10407 = vmatprep.mubr.msk.f32.mxu0 %vm370_vm2, %v6728_v46  ;;  %v9200_v16 = vld [vmem:[%s11099_s9 + $0xe0] sm:$0xe]  ;;  %v6990_v46 = vrot.slane %v6950_v44, 2  ;;  %v3079_v50 = vunpack.c.l.bf16 %v8660_v55  ;;  %v13123_v14 = vld [vmem:[%s11099_s9 + $0xd0] ss:$8 sps:$4 sm:$0xff]   ;;  %v3081_v44 = vunpack.c.h.bf16 %v8660_v55  ;;  %v6993_v1 = vrot.slane %v6951_v54, 2 }
 0x14c   : > { %v6953_v28 = vunpack.c.l.bf16 %v9200_v16  ;;  %v6989_v39 = vsel %vm780_vm3, %v6987_v17, %v6988_v32  ;;  %v13135_v37 = vld [vmem:[%s11099_s9 + $0x64] sm:$0x1]  ;;  %v7000_v16 = vrot.slane %v6635_v9, 2  ;;  %v9203_v55 = vld [vmem:[%s11099_s9 + $0x108] sm:$0xe]  ;;  %v2831_v9 = vunpack.c.l.bf16 %v13123_v14 }
 0x14d   : > { %v6992_v24 = vsel %vm780_vm3, %v6990_v46, %v6991_v30  ;;  %v2832_v32 = vunpack.c.h.bf16 %v13123_v14  ;;  %v3146_v30 = vrot.slane %v3081_v44, 1  ;;  %v6995_v23 = vsel %vm780_vm3, %v6993_v1, %v6994_v29  ;;  %v9204_v54 = vld [vmem:[%s11099_s9 + $0x110] sm:$0xe]  ;;  %v9205_v44 = vld [vmem:[%s11099_s9 + $0x118] sm:$0xe] }
 0x14e   : > { %10058 = vmatmul.mubr.msk.f32.gmra.mrb[6].mxu1 %vm370_vm2, %v2824_v49  ;;  %10408 = vmatmul.mubr.msk.f32.gmra.mrb[14].mxu0 %vm370_vm2, %v6731_v47  ;;  %v3080_v49 = vunpack.c.l.bf16 %v13099_v4  ;;  %v13115_v47 = vld [vmem:[%s13844_s1 + $0x64] sm:$0xf]  ;;  %v6999_v19 = vrot.slane %v6953_v28, 2  ;;  %v3083_v18 = vunpack.c.l.bf16 %v8664_v0  ;;  %v3084_v17 = vunpack.c.l.bf16 %v13135_v37  ;;  %v9206_v1 = vld [vmem:[%s11099_s9 + $0x120] sm:$0xe] }
 0x14f   : > { %10060 = vmatprep.mubr.msk.f32.mxu1 %vm370_vm2, %v2825_v11  ;;  %10412 = vmatprep.mubr.msk.f32.mxu0 %vm370_vm2, %v6980_v22  ;;  %v6954_v11 = vunpack.c.l.bf16 %v9201_v31  ;;  %v3082_v22 = vunpack.c.l.bf16 %v13105_v27  ;;  %v6956_v46 = vunpack.c.l.bf16 %v9203_v55  ;;  %v3085_v29 = vunpack.c.h.bf16 %v8664_v0 }
 0x150   : > { %v3144_v13 = vrot.slane %v3080_v49, 1  ;;  %v7001_v28 = vsel %vm780_vm3, %v6999_v19, %v7000_v16  ;;  %v3150_v0 = vrot.slane %v3084_v17, 1  ;;  %v7009_v19 = vrot.slane %v6641_v12, 2  ;;  %v8672_v16 = vld [vmem:[%s11099_s9 + $0x80] ss:$8 sps:$4 sm:$0xff]  }
 0x151   : > { %v7002_v25 = vrot.slane %v6954_v11, 2  ;;  %v3147_v31 = vrot.slane %v3082_v22, 1  ;;  %v6958_v55 = vunpack.c.l.bf16 %v9205_v44  ;;  %v6959_v12 = vunpack.c.l.bf16 %v9206_v1 }
 0x152   : > { %10061 = vmatmul.mubr.msk.f32.gmra.mrb[8].mxu1 %vm370_vm2, %v2826_v52  ;;  %10413 = vmatmul.mubr.msk.f32.vlgmr.msra.gmra.mrb[0].mxu0 %vm370_vm2, %v6983_v5  ;;  %v6996_v52 = vrot.slane %v6952_v26, 2  ;;  %v13154_v5 = vld [vmem:[%s11099_s9 + $0x6c] sm:$0x1]  ;;  %v3441_v4 = vrot.slane %v3082_v22, 2  ;;  %v13391_v22 = vld [vmem:[%s11099_s9 + $0x120] ss:$8 sps:$4 sm:$0xff]  }
 0x153   : > { %10063 = vmatprep.mubr.msk.f32.mxu1 %vm370_vm2, %v2827_v35  ;;  %10437 = vmatpush3.msk.msra.mxu0 %vm403_vm0, %v12934_v40  ;;  %v6955_v40 = vunpack.c.l.bf16 %v9202_v61  ;;  %v3143_v35 = vrot.slane %v3079_v50, 1  ;;  %v7006_v50 = vrot.slane %v6639_v3, 2  ;;  %v7004_v61 = vsel %vm780_vm3, %v7002_v25, %v7003_v38  ;;  %v13190_v25 = vld [vmem:[%s11099_s9 + $0x84] sm:$0x1] }
 0x154   : > { %10415 = vmatprep.mubr.msk.f32.mxu0 %vm370_vm2, %v6986_v60  ;;  %10462 = vmatprep.subr.msk.mxu0 %vm403_vm0, %v13115_v47  ;;  %v8668_v60 = vld [vmem:[%s11099_s9 + $0x70] ss:$8 sps:$4 sm:$0xff]   ;;  %v6998_v26 = vsel %vm780_vm3, %v6996_v52, %v6997_v59  ;;  %v3086_v14 = vunpack.c.l.bf16 %v13154_v5  ;;  %v3148_v56 = vsel %vm319_vm1, %v3146_v30, %v3147_v31  ;;  %v6957_v3 = vunpack.c.l.bf16 %v9204_v54  ;;  %v9207_v30 = vld [vmem:[%s11099_s9 + $0x128] sm:$0xe] }
 0x155   : > { %v3145_v11 = vsel %vm319_vm1, %v3143_v35, %v3144_v13  ;;  %v3149_v59 = vrot.slane %v3083_v18, 1  ;;  %v7008_v52 = vrot.slane %v6956_v46, 2  ;;  %v3089_v35 = vunpack.c.h.bf16 %v8668_v60  ;;  %v13203_v46 = vld [vmem:[%s11099_s9 + $0x8c] sm:$0x1] }
 0x156   : > { %10064 = vmatmul.mubr.msk.f32.gmra.mrb[10].mxu1 %vm370_vm2, %v2828_v15  ;;  %10416 = vmatmul.mubr.msk.f32.gmra.mrb[2].mxu0 %vm370_vm2, %v6989_v39  ;;  %v13162_v15 = vld [vmem:[%s11099_s9 + $0x74] sm:$0x1]  ;;  %v13174_v39 = vld [vmem:[%s11099_s9 + $0x7c] sm:$0x1]  ;;  %v3152_v38 = vrot.slane %v3085_v29, 1  ;;  %v7011_v31 = vrot.slane %v6957_v3, 2  ;;  %v3091_v18 = vunpack.c.l.bf16 %v8672_v16  ;;  %v3094_v3 = vunpack.c.l.bf16 %v13203_v46 }
 0x157   : > { %10066 = vmatprep.mubr.msk.f32.mxu1 %vm370_vm2, %v2829_v63  ;;  %10418 = vmatprep.mubr.msk.f32.mxu0 %vm370_vm2, %v6992_v24  ;;  %v7005_v63 = vrot.slane %v6955_v40, 2  ;;  %v3088_v24 = vunpack.c.l.bf16 %v13162_v15  ;;  %v3090_v13 = vunpack.c.l.bf16 %v13174_v39  ;;  %v3151_v51 = vsel %vm319_vm1, %v3149_v59, %v3150_v0  ;;  %v13218_v29 = vld [vmem:[%s11099_s9 + $0xa4] sm:$0x1]  ;;  %v13235_v59 = vld [vmem:[%s11099_s9 + $0xa8] ss:$16 sps:$4 sm:$0xff]  }
 0x158   : > { %v7010_v58 = vsel %vm780_vm3, %v7008_v52, %v7009_v19  ;;  %v7015_v54 = vrot.slane %v6645_v42, 2  ;;  %v7017_v44 = vrot.slane %v6959_v12, 2  ;;  %v3093_v42 = vunpack.c.h.bf16 %v8672_v16  ;;  %v13238_v0 = vld [vmem:[%s11099_s9 + $0xac] sm:$0x1]  ;;  %v13414_v15 = vld [vmem:[%s11099_s9 + $0xbc] sm:$0x1] }
 0x159   : > { %v7007_v40 = vsel %vm780_vm3, %v7005_v63, %v7006_v50  ;;  %v7014_v63 = vrot.slane %v6958_v55, 2  ;;  %v3158_v50 = vrot.slane %v3089_v35, 1  ;;  %v7013_v1 = vsel %vm780_vm3, %v7011_v31, %v7012_v20  ;;  %v13248_v55 = vld [vmem:[%s11099_s9 + $0xb0] ss:$16 sps:$4 sm:$0xff]   ;;  %v13251_v35 = vld [vmem:[%s11099_s9 + $0xb4] sm:$0x1] }
 0x15a   : > { %10067 = vmatmul.mubr.msk.f32.gmra.mrb[12].mxu1 %vm370_vm2, %v2830_v21  ;;  %10419 = vmatmul.mubr.msk.f32.gmra.mrb[4].mxu0 %vm370_vm2, %v6995_v23  ;;  %v3087_v21 = vunpack.c.l.bf16 %v8668_v60  ;;  %v3092_v60 = vunpack.c.l.bf16 %v13190_v25  ;;  %v3161_v62 = vrot.slane %v3091_v18, 1  ;;  %v13912_v12 = vunpack.c.l.bf16 %v13017_v45  ;;  %v13442_v25 = vld [vmem:[%s13844_s1 + $0x34] sm:$0xf] }
 0x15b   : > { %10069 = vmatprep.mubr.msk.f32.mxu1 %vm370_vm2, %v2831_v9  ;;  %10421 = vmatprep.mubr.msk.f32.mxu0 %vm370_vm2, %v6998_v26  ;;  %v3153_v9 = vrot.slane %v3086_v14, 1  ;;  %v9208_v26 = vld [vmem:[%s11099_s9 + $0x130] sm:$0xe]  ;;  %v3164_v31 = vrot.slane %v3093_v42, 1  ;;  %v3097_v45 = vunpack.c.l.bf16 %v13235_v59  ;;  %v3098_v18 = vunpack.c.l.bf16 %v13238_v0 }
 0x15c   : > { %v3155_v23 = vrot.slane %v3087_v21, 1  ;;  %v13227_v21 = vld [vmem:[%s13844_s1 + $0x30] sm:$0xf]  ;;  %v3162_v52 = vrot.slane %v3092_v60, 1  ;;  %v6961_v19 = vunpack.c.l.bf16 %v9208_v26  ;;  %v13275_v26 = vld [vmem:[%s11099_s9 + $0xbc] sm:$0x1] }
 0x15d   : > { %v3453_v5 = vrot.slane %v3090_v13, 2 }
 0x15e   : > { %10070 = vmatmul.mubr.msk.f32.gmra.mrb[14].mxu1 %vm370_vm2, %v2832_v32  ;;  %10422 = vmatmul.mubr.msk.f32.gmra.mrb[6].mxu0 %vm370_vm2, %v7001_v28  ;;  %v3156_v32 = vrot.slane %v3088_v24, 1  ;;  %v13213_v28 = vld [vmem:[%s11099_s9 + $0xa0] ss:$16 sps:$4 sm:$0xff]   ;;  %v3163_v48 = vsel %vm319_vm1, %v3161_v62, %v3162_v52  ;;  %v3171_v62 = vrot.slane %v3098_v18, 1 }
 0x15f   : > { %10074 = vmatprep.mubr.msk.f32.mxu1 %vm370_vm2, %v3145_v11  ;;  %10424 = vmatprep.mubr.msk.f32.mxu0 %vm370_vm2, %v7004_v61  ;;  %v3159_v11 = vrot.slane %v3090_v13, 1  ;;  %v6960_v61 = vunpack.c.l.bf16 %v9207_v30  ;;  %v3095_v16 = vunpack.c.l.bf16 %v13213_v28  ;;  %v7021_v30 = vrot.slane %v13912_v12, 2  ;;  %v13308_v12 = vld [vmem:[%s11099_s9 + $0xcc] sm:$0x1] }
 0x160   : > { %v3157_v7 = vsel %vm319_vm1, %v3155_v23, %v3156_v32  ;;  %v3165_v23 = vrot.slane %v3094_v3, 1  ;;  %v7024_v32 = vrot.slane %v6651_v34, 2  ;;  %v7023_v34 = vrot.slane %v6961_v19, 2 }
 0x161   : > { %v7020_v20 = vrot.slane %v6960_v61, 2  ;;  %v13283_v61 = vld [vmem:[%s11099_s9 + $0xc0] ss:$16 sps:$4 sm:$0xff]   ;;  %v7243_v42 = vunpack.c.h.bf16 %v13213_v28 }
 0x162   : > { %10075 = vmatmul.mubr.msk.f32.vlgmr.msra.gmra.mrb[0].mxu1 %vm370_vm2, %v3148_v56  ;;  %10425 = vmatmul.mubr.msk.f32.gmra.mrb[8].mxu0 %vm370_vm2, %v7007_v40  ;;  %v3154_v56 = vsel %vm319_vm1, %v3152_v38, %v3153_v9  ;;  %v3096_v40 = vunpack.c.l.bf16 %v13218_v29  ;;  %v7016_v38 = vsel %vm780_vm3, %v7014_v63, %v7015_v54  ;;  %v3160_v9 = vsel %vm319_vm1, %v3158_v50, %v3159_v11  ;;  %v13272_v54 = vld [vmem:[%s11099_s9 + $0xb8] ss:$16 sps:$4 sm:$0xff]  }
 0x163   : > { %10077 = vmatprep.mubr.msk.f32.mxu1 %vm370_vm2, %v3151_v51  ;;  %10427 = vmatprep.mubr.msk.f32.mxu0 %vm370_vm2, %v7010_v58  ;;  %v3099_v51 = vunpack.c.l.bf16 %v13248_v55  ;;  %v3100_v58 = vunpack.c.l.bf16 %v13251_v35  ;;  %v3167_v63 = vrot.slane %v3095_v16, 1  ;;  %v7022_v11 = vsel %vm780_vm3, %v7020_v20, %v7021_v30  ;;  %v13305_v20 = vld [vmem:[%s11099_s9 + $0xc8] ss:$16 sps:$4 sm:$0xff]   ;;  %v13311_v30 = vld [vmem:[%s11099_s9 + $0xd0] ss:$16 sps:$4 sm:$0xff]  }
 0x164   : > { %10099 = vmatpush3.msk.msra.mxu1 %vm403_vm0, %v13041_v41  ;;  %v7019_v41 = vsel %vm780_vm3, %v7017_v44, %v7018_v36  ;;  %v3168_v50 = vrot.slane %v3096_v40, 1  ;;  %v13286_v44 = vld [vmem:[%s11099_s9 + $0xc4] sm:$0x1]  ;;  %v3166_v36 = vsel %vm319_vm1, %v3164_v31, %v3165_v23  ;;  %v7025_v28 = vsel %vm780_vm3, %v7023_v34, %v7024_v32 }
 0x165   : > { %10124 = vmatprep.subr.msk.mxu1 %vm403_vm0, %v13227_v21  ;;  %v3173_v52 = vrot.slane %v3099_v51, 1  ;;  %v3174_v19 = vrot.slane %v3100_v58, 1  ;;  %v7244_v31 = vunpack.c.h.bf16 %v13235_v59  ;;  %v7245_v23 = vunpack.c.h.bf16 %v13248_v55 }
 0x166   : > { %10078 = vmatmul.mubr.msk.f32.gmra.mrb[2].mxu1 %vm370_vm2, %v3154_v56  ;;  %10428 = vmatmul.mubr.msk.f32.gmra.mrb[10].mxu0 %vm370_vm2, %v7013_v1  ;;  %v3101_v56 = vunpack.c.l.bf16 %v13272_v54  ;;  %v3102_v1 = vunpack.c.l.bf16 %v13275_v26  ;;  %v3169_v16 = vsel %vm319_vm1, %v3167_v63, %v3168_v50  ;;  %v3105_v34 = vunpack.c.l.bf16 %v13305_v20 }
 0x167   : > { %10080 = vmatprep.mubr.msk.f32.mxu1 %vm370_vm2, %v3157_v7  ;;  %10430 = vmatprep.mubr.msk.f32.mxu0 %vm370_vm2, %v7016_v38  ;;  %v3170_v7 = vrot.slane %v3097_v45, 1  ;;  %v3103_v38 = vunpack.c.l.bf16 %v13283_v61  ;;  %v3106_v59 = vunpack.c.l.bf16 %v13308_v12  ;;  %v3107_v50 = vunpack.c.l.bf16 %v13311_v30 }
 0x168   : > { %v3176_v32 = vrot.slane %v3101_v56, 1  ;;  %v3177_v45 = vrot.slane %v3102_v1, 1  ;;  %v13334_v56 = vld [vmem:[%s11099_s9 + $0xdc] sm:$0x1] }
 0x169   : > { %v3172_v51 = vsel %vm319_vm1, %v3170_v7, %v3171_v62  ;;  %v3179_v55 = vrot.slane %v3103_v38, 1  ;;  %v8710_v7 = vld [vmem:[%s11099_s9 + $0x50] sm:$0xe] }
 0x16a   : > { %10081 = vmatmul.mubr.msk.f32.gmra.mrb[4].mxu1 %vm370_vm2, %v3160_v9  ;;  %10431 = vmatmul.mubr.msk.f32.gmra.mrb[12].mxu0 %vm370_vm2, %v7019_v41  ;;  %v3104_v9 = vunpack.c.l.bf16 %v13286_v44  ;;  %v13314_v41 = vld [vmem:[%s11099_s9 + $0xd4] sm:$0x1]  ;;  %v3178_v62 = vsel %vm319_vm1, %v3176_v32, %v3177_v45  ;;  %v3110_v32 = vunpack.c.l.bf16 %v13334_v56  ;;  %v3405_v45 = vunpack.c.l.bf16 %v8710_v7 }
 0x16b   : > { %10083 = vmatprep.mubr.msk.f32.mxu1 %vm370_vm2, %v3163_v48  ;;  %10433 = vmatprep.mubr.msk.f32.mxu0 %vm370_vm2, %v7022_v11  ;;  %v3175_v48 = vsel %vm319_vm1, %v3173_v52, %v3174_v19  ;;  %v13884_v11 = vunpack.c.l.bf16 %v13314_v41  ;;  %v7246_v52 = vunpack.c.h.bf16 %v13272_v54  ;;  %v13344_v19 = vld [vmem:[%s13844_s1 + $0x68] sm:$0xf]  ;;  %v3477_v44 = vrot.slane %v3106_v59, 2 }
 0x16c   : > { %v3180_v63 = vrot.slane %v3104_v9, 1 }
 0x16e   : > { %10084 = vmatmul.mubr.msk.f32.gmra.mrb[6].mxu1 %vm370_vm2, %v3166_v36  ;;  %10434 = vmatmul.mubr.msk.f32.gmra.mrb[14].mxu0 %vm370_vm2, %v7025_v28  ;;  %v8690_v36 = vld [vmem:[%s11099_s9 + $0xd8] ss:$16 sps:$4 sm:$0xff]   ;;  %v3182_v28 = vrot.slane %v3105_v34, 1  ;;  %v3181_v54 = vsel %vm319_vm1, %v3179_v55, %v3180_v63  ;;  %v3189_v63 = vrot.slane %v3110_v32, 1 }
 0x16f   : > { %10086 = vmatprep.mubr.msk.f32.mxu1 %vm370_vm2, %v3169_v16  ;;  %10438 = vmatprep.mubr.msk.f32.mxu0 %vm370_vm2, %v7243_v42  ;;  %v7247_v42 = vunpack.c.h.bf16 %v13283_v61  ;;  %v3183_v16 = vrot.slane %v3106_v59, 1  ;;  %v3109_v38 = vunpack.c.l.bf16 %v8690_v36  ;;  %v3185_v61 = vrot.slane %v3107_v50, 1  ;;  %v9238_v50 = vld [vmem:[%s11099_s9 + $0x100] ss:$8 sps:$4 sm:$0xff]  }
 0x170   : > { %v7252_v27 = vunpack.c.h.bf16 %v9238_v50 }
 0x171   : > { %v3184_v34 = vsel %vm319_vm1, %v3182_v28, %v3183_v16  ;;  %v3188_v55 = vrot.slane %v3109_v38, 1  ;;  %v7250_v28 = vunpack.c.h.bf16 %v8690_v36  ;;  %v7251_v16 = vunpack.c.l.bf16 %v9238_v50  ;;  %v8715_v38 = vld [vmem:[%s11099_s9 + $0x78] sm:$0xe] }
 0x172   : > { %10087 = vmatmul.mubr.msk.f32.gmra.mrb[8].mxu1 %vm370_vm2, %v3172_v51  ;;  %10439 = vmatmul.mubr.msk.f32.vlgmr.msra.gmra.mrb[0].mxu0 %vm370_vm2, %v7244_v31  ;;  %v3186_v31 = vrot.slane %v13884_v11, 1  ;;  %v8711_v51 = vld [vmem:[%s11099_s9 + $0x58] sm:$0xe]  ;;  %v8713_v11 = vld [vmem:[%s11099_s9 + $0x68] sm:$0xe] }
 0x173   : > { %10089 = vmatprep.mubr.msk.f32.mxu1 %vm370_vm2, %v3175_v48  ;;  %10463 = vmatpush3.msk.msra.mxu0 %vm403_vm0, %v13115_v47  ;;  %v8712_v48 = vld [vmem:[%s11099_s9 + $0x60] sm:$0xe]  ;;  %v7248_v47 = vunpack.c.h.bf16 %v13305_v20  ;;  %v3406_v7 = vunpack.c.l.bf16 %v8711_v51  ;;  %v3437_v20 = vrot.slane %v3405_v45, 2  ;;  %v3444_v45 = vrot.slane %v3084_v17, 2  ;;  %v9240_v51 = vld [vmem:[%s11099_s9 + $0x110] ss:$8 sps:$4 sm:$0xff]  }
 0x174   : > { %10441 = vmatprep.mubr.msk.f32.mxu0 %vm370_vm2, %v7245_v23  ;;  %10488 = vmatprep.subr.msk.mxu0 %vm403_vm0, %v13344_v19  ;;  %v7249_v23 = vunpack.c.h.bf16 %v13311_v30  ;;  %v3438_v30 = vrot.slane %v3080_v49, 2  ;;  %v3408_v49 = vunpack.c.l.bf16 %v8713_v11  ;;  %v7253_v37 = vunpack.c.l.bf16 %v9240_v51 }
 0x175   : > { %v3447_v17 = vrot.slane %v3086_v14, 2  ;;  %v7254_v14 = vunpack.c.h.bf16 %v9240_v51  ;;  %v3459_v51 = vrot.slane %v3094_v3, 2  ;;  %v3462_v3 = vrot.slane %v3096_v40, 2 }
 0x176   : > { %10090 = vmatmul.mubr.msk.f32.gmra.mrb[10].mxu1 %vm370_vm2, %v3178_v62  ;;  %10442 = vmatmul.mubr.msk.f32.gmra.mrb[2].mxu0 %vm370_vm2, %v7246_v52  ;;  %v3187_v62 = vsel %vm319_vm1, %v3185_v61, %v3186_v31  ;;  %v3407_v52 = vunpack.c.l.bf16 %v8712_v48  ;;  %v3440_v61 = vrot.slane %v3406_v7, 2  ;;  %v3439_v31 = vsel %vm780_vm3, %v3437_v20, %v3438_v30  ;;  %v9264_v30 = vld [vmem:[%s11099_s9 + $0xb0] ss:$8 sps:$4 sm:$0xff]  }
 0x177   : > { %10092 = vmatprep.mubr.msk.f32.mxu1 %vm370_vm2, %v3181_v54  ;;  %10444 = vmatprep.mubr.msk.f32.mxu0 %vm370_vm2, %v7247_v42  ;;  %v8714_v54 = vld [vmem:[%s11099_s9 + $0x70] sm:$0xe]  ;;  %v3190_v42 = vsel %vm319_vm1, %v3188_v55, %v3189_v63  ;;  %v8717_v55 = vld [vmem:[%s11099_s9 + $0x88] sm:$0xe]  ;;  %v8718_v63 = vld [vmem:[%s11099_s9 + $0xa0] sm:$0xe]  ;;  %v7505_v13 = vunpack.c.l.bf16 %v9264_v30 }
 0x178   : > { %v3443_v36 = vrot.slane %v3407_v52, 2  ;;  %v3409_v48 = vunpack.c.l.bf16 %v8714_v54  ;;  %v3442_v11 = vsel %vm780_vm3, %v3440_v61, %v3441_v4  ;;  %v13406_v52 = vld [vmem:[%s11099_s9 + $0xb4] sm:$0x1]  ;;  %v8720_v4 = vld [vmem:[%s11099_s9 + $0xb0] sm:$0xe] }
 0x179   : > { %v7506_v61 = vunpack.c.l.bf16 %v13406_v52 }
 0x17a   : > { %10093 = vmatmul.mubr.msk.f32.gmra.mrb[12].mxu1 %vm370_vm2, %v3184_v34  ;;  %10445 = vmatmul.mubr.msk.f32.gmra.mrb[4].mxu0 %vm370_vm2, %v7248_v47  ;;  %v3410_v47 = vunpack.c.l.bf16 %v8715_v38  ;;  %v8716_v34 = vld [vmem:[%s11099_s9 + $0x80] sm:$0xe]  ;;  %v3445_v50 = vsel %vm780_vm3, %v3443_v36, %v3444_v45  ;;  %v3449_v7 = vrot.slane %v3409_v48, 2  ;;  %v3413_v38 = vunpack.c.l.bf16 %v8718_v63  ;;  %v13434_v48 = vld [vmem:[%s11099_s9 + $0xc4] sm:$0x1] }
 0x17b   : > { %10095 = vmatprep.mubr.msk.f32.mxu1 %vm370_vm2, %v3187_v62  ;;  %10447 = vmatprep.mubr.msk.f32.mxu0 %vm370_vm2, %v7249_v23  ;;  %v3446_v23 = vrot.slane %v3408_v49, 2  ;;  %v3450_v62 = vrot.slane %v3088_v24, 2  ;;  %v3411_v20 = vunpack.c.l.bf16 %v8716_v34  ;;  %v7256_v24 = vunpack.c.h.bf16 %v13391_v22  ;;  %v13423_v49 = vld [vmem:[%s11099_s9 + $0xc0] ss:$8 sps:$4 sm:$0xff]   ;;  %v9244_v34 = vld [vmem:[%s11099_s9 + $0x130] ss:$8 sps:$4 sm:$0xff]  }
 0x17c   : > { %v3452_v54 = vrot.slane %v3410_v47, 2  ;;  %v3456_v45 = vrot.slane %v3092_v60, 2  ;;  %v3461_v60 = vrot.slane %v3413_v38, 2  ;;  %v7510_v63 = vunpack.c.l.bf16 %v13434_v48  ;;  %v13468_v38 = vld [vmem:[%s11099_s9 + $0xd4] sm:$0x1] }
 0x17d   : > { %v3448_v39 = vsel %vm780_vm3, %v3446_v23, %v3447_v17  ;;  %v3455_v36 = vrot.slane %v3411_v20, 2  ;;  %v7569_v23 = vrot.slane %v7505_v13, 1  ;;  %v7570_v17 = vrot.slane %v7506_v61, 1  ;;  %v8722_v20 = vld [vmem:[%s11099_s9 + $0xc0] sm:$0xe] }
 0x17e   : > { %10096 = vmatmul.mubr.msk.f32.gmra.mrb[14].mxu1 %vm370_vm2, %v3190_v42  ;;  %10448 = vmatmul.mubr.msk.f32.gmra.mrb[6].mxu0 %vm370_vm2, %v7250_v28  ;;  %v7255_v28 = vunpack.c.l.bf16 %v13391_v22  ;;  %v8719_v42 = vld [vmem:[%s11099_s9 + $0xa8] sm:$0xe]  ;;  %v3454_v47 = vsel %vm780_vm3, %v3452_v54, %v3453_v5  ;;  %v7507_v22 = vunpack.c.h.bf16 %v9264_v30  ;;  %v7257_v40 = vunpack.c.l.bf16 %v9244_v34  ;;  %v9272_v30 = vld [vmem:[%s11099_s9 + $0xd0] ss:$8 sps:$4 sm:$0xff]  }
 0x17f   : > { %10100 = vmatprep.mubr.msk.f32.mxu1 %vm370_vm2, %v3439_v31  ;;  %10450 = vmatprep.mubr.msk.f32.mxu0 %vm370_vm2, %v7251_v16  ;;  %v3412_v16 = vunpack.c.l.bf16 %v8717_v55  ;;  %v3451_v31 = vsel %vm780_vm3, %v3449_v7, %v3450_v62  ;;  %v7509_v55 = vunpack.c.l.bf16 %v13423_v49  ;;  %v3457_v29 = vsel %vm780_vm3, %v3455_v36, %v3456_v45  ;;  %v8723_v36 = vld [vmem:[%s11099_s9 + $0xc8] sm:$0xe]  ;;  %v13483_v45 = vld [vmem:[%s11099_s9 + $0xdc] sm:$0x1] }
 0x180   : > { %v7258_v7 = vunpack.c.h.bf16 %v9244_v34  ;;  %v3465_v62 = vrot.slane %v3098_v18, 2  ;;  %v7572_v5 = vrot.slane %v7507_v22, 1  ;;  %v3468_v18 = vrot.slane %v3100_v58, 2 }
 0x181   : > { %v3458_v46 = vrot.slane %v3412_v16, 2  ;;  %v7575_v13 = vrot.slane %v7509_v55, 1  ;;  %v3417_v58 = vunpack.c.l.bf16 %v8722_v20  ;;  %v3471_v22 = vrot.slane %v3102_v1, 2 }
 0x182   : > { %10101 = vmatmul.mubr.msk.f32.vlgmr.msra.gmra.mrb[0].mxu1 %vm370_vm2, %v3442_v11  ;;  %10451 = vmatmul.mubr.msk.f32.gmra.mrb[8].mxu0 %vm370_vm2, %v7252_v27  ;;  %v3414_v27 = vunpack.c.l.bf16 %v8719_v42  ;;  %v7508_v11 = vunpack.c.l.bf16 %v13414_v15  ;;  %v3463_v42 = vsel %vm780_vm3, %v3461_v60, %v3462_v3  ;;  %v3418_v60 = vunpack.c.l.bf16 %v8723_v36 }
 0x183   : > { %10103 = vmatprep.mubr.msk.f32.mxu1 %vm370_vm2, %v3445_v50  ;;  %10453 = vmatprep.mubr.msk.f32.mxu0 %vm370_vm2, %v7253_v37  ;;  %v8721_v37 = vld [vmem:[%s11099_s9 + $0xb8] sm:$0xe]  ;;  %v13457_v50 = vld [vmem:[%s11099_s9 + $0xcc] sm:$0x1]  ;;  %v7515_v3 = vunpack.c.h.bf16 %v9272_v30 }
 0x184   : > { %10125 = vmatpush3.msk.msra.mxu1 %vm403_vm0, %v13227_v21  ;;  %v3415_v21 = vunpack.c.l.bf16 %v8720_v4  ;;  %v3464_v54 = vrot.slane %v3414_v27, 2  ;;  %v3416_v16 = vunpack.c.l.bf16 %v8721_v37  ;;  %v7576_v4 = vrot.slane %v7510_v63, 1  ;;  %v9276_v37 = vld [vmem:[%s11099_s9 + $0xe0] ss:$8 sps:$4 sm:$0xff]  }
 0x185   : > { %10514 = vmatprep.subr.msk.mxu1 %vm403_vm0, %v13442_v25  ;;  %v7512_v35 = vunpack.c.l.bf16 %v13457_v50  ;;  %v7867_v52 = vrot.slane %v7508_v11, 2 }
 0x186   : > { %10104 = vmatmul.mubr.msk.f32.gmra.mrb[2].mxu1 %vm370_vm2, %v3448_v39  ;;  %10454 = vmatmul.mubr.msk.f32.gmra.mrb[10].mxu0 %vm370_vm2, %v7254_v14  ;;  %v7573_v14 = vrot.slane %v7508_v11, 1  ;;  %v3467_v0 = vrot.slane %v3415_v21, 2  ;;  %v7571_v39 = vsel %vm319_vm1, %v7569_v23, %v7570_v17  ;;  %v3466_v34 = vsel %vm780_vm3, %v3464_v54, %v3465_v62  ;;  %v13498_v23 = vld [vmem:[%s11099_s9 + $0xe4] sm:$0x1] }
 0x187   : > { %10106 = vmatprep.mubr.msk.f32.mxu1 %vm370_vm2, %v3451_v31  ;;  %10456 = vmatprep.mubr.msk.f32.mxu0 %vm370_vm2, %v7255_v28  ;;  %v3460_v28 = vsel %vm780_vm3, %v3458_v46, %v3459_v51  ;;  %v7511_v31 = vunpack.c.h.bf16 %v13423_v49  ;;  %v7514_v51 = vunpack.c.l.bf16 %v13468_v38  ;;  %v3470_v49 = vrot.slane %v3416_v16, 2  ;;  %v8761_v38 = vld [vmem:[%s11099_s9 + $0xd8] ss:$8 sps:$4 sm:$0xff]  }
 0x188   : > { %v7574_v27 = vsel %vm319_vm1, %v7572_v5, %v7573_v14  ;;  %v3469_v46 = vsel %vm780_vm3, %v3467_v0, %v3468_v18  ;;  %v7516_v21 = vunpack.c.l.bf16 %v13483_v45  ;;  %v7577_v26 = vsel %vm319_vm1, %v7575_v13, %v7576_v4  ;;  %v13519_v14 = vld [vmem:[%s11099_s9 + $0x58] ss:$168 sps:$4 sm:$0xff]  }
 0x189   : > { %v7578_v1 = vrot.slane %v7511_v31, 1  ;;  %v3474_v17 = vrot.slane %v3104_v9, 2  ;;  %v3473_v62 = vrot.slane %v3417_v58, 2  ;;  %v3472_v54 = vsel %vm780_vm3, %v3470_v49, %v3471_v22  ;;  %v13539_v58 = vld [vmem:[%s11099_s9 + $0x60] ss:$168 sps:$4 sm:$0xff]  }
 0x18a   : > { %10107 = vmatmul.mubr.msk.f32.gmra.mrb[4].mxu1 %vm370_vm2, %v3454_v47  ;;  %10457 = vmatmul.mubr.msk.f32.gmra.mrb[12].mxu0 %vm370_vm2, %v7256_v24  ;;  %v7513_v24 = vunpack.c.l.bf16 %v9272_v30  ;;  %v8724_v47 = vld [vmem:[%s11099_s9 + $0xd0] sm:$0xe]  ;;  %v13512_v30 = vld [vmem:[%s11099_s9 + $0xec] sm:$0x1]  ;;  %v7517_v9 = vunpack.c.l.bf16 %v9276_v37  ;;  %v7518_v5 = vunpack.c.l.bf16 %v13498_v23  ;;  %v3476_v16 = vrot.slane %v3418_v60, 2 }
 0x18b   : > { %10109 = vmatprep.mubr.msk.f32.mxu1 %vm370_vm2, %v3457_v29  ;;  %10459 = vmatprep.mubr.msk.f32.mxu0 %vm370_vm2, %v7257_v40  ;;  %v3419_v55 = vunpack.c.l.bf16 %v8724_v47  ;;  %v8725_v29 = vld [vmem:[%s11099_s9 + $0xd8] sm:$0xe]  ;;  %v7579_v40 = vrot.slane %v7512_v35, 1  ;;  %v13913_v0 = vunpack.c.l.bf16 %v13314_v41  ;;  %v7519_v13 = vunpack.c.h.bf16 %v9276_v37  ;;  %v13549_v49 = vld [vmem:[%s11099_s9 + $0x68] ss:$168 sps:$4 sm:$0xff]  }
 0x18c   : > { %v7581_v20 = vrot.slane %v7513_v24, 1  ;;  %v3420_v59 = vunpack.c.l.bf16 %v8725_v29  ;;  %v7520_v4 = vunpack.c.l.bf16 %v13512_v30  ;;  %v3475_v31 = vsel %vm780_vm3, %v3473_v62, %v3474_v17  ;;  %v13542_v24 = vld [vmem:[%s11099_s9 + $0x10c] sm:$0x1]  ;;  %v13552_v22 = vld [vmem:[%s11099_s9 + $0x114] sm:$0x1] }
 0x18d   : > { %v3480_v18 = vrot.slane %v13913_v0, 2  ;;  %v3479_v12 = vrot.slane %v3419_v55, 2  ;;  %v7580_v41 = vsel %vm319_vm1, %v7578_v1, %v7579_v40  ;;  %v7587_v47 = vrot.slane %v7517_v9, 1  ;;  %v13570_v40 = vld [vmem:[%s11099_s9 + $0x70] ss:$168 sps:$4 sm:$0xff]  }
 0x18e   : > { %10110 = vmatmul.mubr.msk.f32.gmra.mrb[6].mxu1 %vm370_vm2, %v3460_v28  ;;  %10460 = vmatmul.mubr.msk.f32.gmra.mrb[14].mxu0 %vm370_vm2, %v7258_v7  ;;  %v7582_v7 = vrot.slane %v7514_v51, 1  ;;  %v7584_v28 = vrot.slane %v7515_v3, 1  ;;  %v3483_v3 = vrot.slane %v3110_v32, 2  ;;  %v7590_v1 = vrot.slane %v7519_v13, 1  ;;  %v13573_v62 = vld [vmem:[%s11099_s9 + $0x11c] sm:$0x1] }
 0x18f   : > { %10112 = vmatprep.mubr.msk.f32.mxu1 %vm370_vm2, %v3463_v42  ;;  %10464 = vmatprep.mubr.msk.f32.mxu0 %vm370_vm2, %v7571_v39  ;;  %v7585_v42 = vrot.slane %v7516_v21, 1  ;;  %v13527_v39 = vld [vmem:[%s11099_s9 + $0x104] sm:$0x1]  ;;  %v3481_v37 = vsel %vm780_vm3, %v3479_v12, %v3480_v18  ;;  %v7591_v17 = vrot.slane %v7520_v4, 1  ;;  %v7523_v55 = vunpack.c.h.bf16 %v13539_v58  ;;  %v8751_v9 = vld [vmem:[%s11099_s9 + $0x78] ss:$168 sps:$4 sm:$0xff]  }
 0x190   : > { %v7583_v36 = vsel %vm319_vm1, %v7581_v20, %v7582_v7  ;;  %v7524_v56 = vunpack.c.l.bf16 %v13542_v24  ;;  %v7525_v32 = vunpack.c.h.bf16 %v13549_v49  ;;  %v7526_v29 = vunpack.c.l.bf16 %v13552_v22  ;;  %v9327_v24 = vld [vmem:[%s11099_s9 + $0x128] sm:$0xe] }
 0x191   : > { %v7586_v60 = vsel %vm319_vm1, %v7584_v28, %v7585_v42  ;;  %v7592_v42 = vsel %vm319_vm1, %v7590_v1, %v7591_v17  ;;  %v7527_v0 = vunpack.c.h.bf16 %v13570_v40  ;;  %v7528_v18 = vunpack.c.l.bf16 %v13573_v62 }
 0x192   : > { %10113 = vmatmul.mubr.msk.f32.gmra.mrb[8].mxu1 %vm370_vm2, %v3466_v34  ;;  %10465 = vmatmul.mubr.msk.f32.vlgmr.msra.gmra.mrb[0].mxu0 %vm370_vm2, %v7574_v27  ;;  %v7588_v34 = vrot.slane %v7518_v5, 1  ;;  %v7521_v27 = vunpack.c.h.bf16 %v13519_v14  ;;  %v7597_v12 = vrot.slane %v7524_v56, 1  ;;  %v7600_v13 = vrot.slane %v7526_v29, 1 }
 0x193   : > { %10115 = vmatprep.mubr.msk.f32.mxu1 %vm370_vm2, %v3469_v46  ;;  %10489 = vmatpush3.msk.msra.mxu0 %vm403_vm0, %v13344_v19  ;;  %v7522_v19 = vunpack.c.l.bf16 %v13527_v39  ;;  %v3478_v46 = vsel %vm780_vm3, %v3476_v16, %v3477_v44  ;;  %v3702_v44 = vunpack.c.l.bf16 %v13519_v14  ;;  %v13582_v16 = vld [vmem:[%s11099_s9 + $0x124] sm:$0x1]  ;;  %v7596_v14 = vrot.slane %v7523_v55, 1 }
 0x194   : > { %10467 = vmatprep.mubr.msk.f32.mxu0 %vm370_vm2, %v7577_v26  ;;  %v3482_v26 = vrot.slane %v3420_v59, 2  ;;  %v7589_v20 = vsel %vm319_vm1, %v7587_v47, %v7588_v34  ;;  %v7593_v7 = vrot.slane %v7521_v27, 1  ;;  %v7599_v59 = vrot.slane %v7525_v32, 1  ;;  %v8752_v47 = vld [vmem:[%s11099_s9 + $0x80] ss:$168 sps:$4 sm:$0xff]  }
 0x195   : > { %v13599_v34 = vld [vmem:[%s11099_s9 + $0x12c] sm:$0x1]  ;;  %v3703_v27 = vunpack.c.l.bf16 %v13539_v58  ;;  %v7598_v58 = vsel %vm319_vm1, %v7596_v14, %v7597_v12  ;;  %v7531_v17 = vunpack.c.h.bf16 %v8752_v47  ;;  %v3706_v14 = vunpack.c.l.bf16 %v8751_v9 }
 0x196   : > { %10116 = vmatmul.mubr.msk.f32.gmra.mrb[10].mxu1 %vm370_vm2, %v3472_v54  ;;  %10468 = vmatmul.mubr.msk.f32.gmra.mrb[2].mxu0 %vm370_vm2, %v7580_v41  ;;  %v7594_v54 = vrot.slane %v7522_v19, 1  ;;  %v3484_v28 = vsel %vm780_vm3, %v3482_v26, %v3483_v3  ;;  %v3704_v3 = vunpack.c.l.bf16 %v13549_v49  ;;  %v7603_v26 = vrot.slane %v7528_v18, 1 }
 0x197   : > { %10118 = vmatprep.mubr.msk.f32.mxu1 %vm370_vm2, %v3475_v31  ;;  %10470 = vmatprep.mubr.msk.f32.mxu0 %vm370_vm2, %v7583_v36  ;;  %v7529_v31 = vunpack.c.h.bf16 %v8751_v9  ;;  %v7530_v36 = vunpack.c.l.bf16 %v13582_v16  ;;  %v7601_v1 = vsel %vm319_vm1, %v7599_v59, %v7600_v13  ;;  %v7532_v55 = vunpack.c.l.bf16 %v13599_v34 }
 0x198   : > { %v7595_v41 = vsel %vm319_vm1, %v7593_v7, %v7594_v54  ;;  %v8754_v54 = vld [vmem:[%s11099_s9 + $0x90] ss:$168 sps:$4 sm:$0xff]   ;;  %v7608_v12 = vrot.slane %v7531_v17, 1  ;;  %v7873_v48 = vrot.slane %v7512_v35, 2  ;;  %v7885_v23 = vrot.slane %v7520_v4, 2 }
 0x199   : > { %v7605_v32 = vrot.slane %v7529_v31, 1  ;;  %v7609_v59 = vrot.slane %v7532_v55, 1  ;;  %v7535_v13 = vunpack.c.h.bf16 %v8754_v54  ;;  %v13915_v4 = vunpack.c.l.bf16 %v11437_v53 }
 0x19a   : > { %10119 = vmatmul.mubr.msk.f32.gmra.mrb[12].mxu1 %vm370_vm2, %v3478_v46  ;;  %10471 = vmatmul.mubr.msk.f32.gmra.mrb[4].mxu0 %vm370_vm2, %v7586_v60  ;;  %v8753_v46 = vld [vmem:[%s11099_s9 + $0x88] ss:$168 sps:$4 sm:$0xff]   ;;  %v13605_v60 = vld [vmem:[%s11099_s9 + $0x134] sm:$0x1]  ;;  %v7903_v16 = vrot.slane %v7532_v55, 2 }
 0x19b   : > { %10121 = vmatprep.mubr.msk.f32.mxu1 %vm370_vm2, %v3481_v37  ;;  %10473 = vmatprep.mubr.msk.f32.mxu0 %vm370_vm2, %v7589_v20  ;;  %v7602_v37 = vrot.slane %v7527_v0, 1  ;;  %v7606_v20 = vrot.slane %v7530_v36, 1  ;;  %v7533_v7 = vunpack.c.h.bf16 %v8753_v46  ;;  %v7534_v49 = vunpack.c.l.bf16 %v13605_v60 }
 0x19d   : > { %v7604_v0 = vsel %vm319_vm1, %v7602_v37, %v7603_v26  ;;  %v7611_v31 = vrot.slane %v7533_v7, 1  ;;  %v3707_v37 = vunpack.c.l.bf16 %v8752_v47  ;;  %v9316_v26 = vld [vmem:[%s11099_s9 + $0xc0] sm:$0xe] }
 0x19e   : > { %10122 = vmatmul.mubr.msk.f32.gmra.mrb[14].mxu1 %vm370_vm2, %v3484_v28  ;;  %10474 = vmatmul.mubr.msk.f32.gmra.mrb[6].mxu0 %vm370_vm2, %v7592_v42  ;;  %v3705_v28 = vunpack.c.l.bf16 %v13570_v40  ;;  %v9314_v42 = vld [vmem:[%s11099_s9 + $0xb0] sm:$0xe]  ;;  %v7607_v40 = vsel %vm319_vm1, %v7605_v32, %v7606_v20 }
 0x19f   : > { %10126 = vmatprep.mubr.msk.f32.mxu1 %vm370_vm2, %v3702_v44  ;;  %10476 = vmatprep.mubr.msk.f32.mxu0 %vm370_vm2, %v7595_v41  ;;  %v13621_v44 = vld [vmem:[%s11099_s9 + $0x13c] sm:$0x1]  ;;  %v7831_v9 = vunpack.c.l.bf16 %v9314_v42  ;;  %v8755_v32 = vld [vmem:[%s11099_s9 + $0xa8] ss:$8 sps:$4 sm:$0xff]   ;;  %v7833_v42 = vunpack.c.l.bf16 %v9316_v26  ;;  %v9320_v26 = vld [vmem:[%s11099_s9 + $0xe0] sm:$0xe] }
 0x1a0   : > { %v7536_v41 = vunpack.c.l.bf16 %v13621_v44 }
 0x1a1   : > { %v7863_v7 = vrot.slane %v7831_v9, 2  ;;  %v7870_v9 = vrot.slane %v7510_v63, 2  ;;  %v8759_v63 = vld [vmem:[%s11099_s9 + $0xc8] ss:$8 sps:$4 sm:$0xff]  }
 0x1a2   : > { %10127 = vmatmul.mubr.msk.f32.vlgmr.msra.gmra.mrb[0].mxu1 %vm370_vm2, %v3703_v27  ;;  %10477 = vmatmul.mubr.msk.f32.gmra.mrb[8].mxu0 %vm370_vm2, %v7598_v58  ;;  %v7612_v27 = vrot.slane %v7534_v49, 1  ;;  %v7610_v58 = vsel %vm319_vm1, %v7608_v12, %v7609_v59  ;;  %v7615_v17 = vrot.slane %v7536_v41, 1  ;;  %v3710_v12 = vunpack.c.l.bf16 %v8755_v32 }
 0x1a3   : > { %10129 = vmatprep.mubr.msk.f32.mxu1 %vm370_vm2, %v3704_v3  ;;  %10479 = vmatprep.mubr.msk.f32.mxu0 %vm370_vm2, %v7601_v1  ;;  %v9315_v3 = vld [vmem:[%s11099_s9 + $0xb8] sm:$0xe]  ;;  %v7614_v1 = vrot.slane %v7535_v13, 1  ;;  %v3714_v50 = vunpack.c.l.bf16 %v8759_v63  ;;  %v3715_v45 = vunpack.c.h.bf16 %v8759_v63  ;;  %v7888_v63 = vrot.slane %v7522_v19, 2 }
 0x1a4   : > { %10515 = vmatpush3.msk.msra.mxu1 %vm403_vm0, %v13442_v25  ;;  %v3708_v25 = vunpack.c.l.bf16 %v8753_v46  ;;  %v7832_v20 = vunpack.c.l.bf16 %v9315_v3  ;;  %v7613_v47 = vsel %vm319_vm1, %v7611_v31, %v7612_v27  ;;  %v9317_v46 = vld [vmem:[%s11099_s9 + $0xc8] sm:$0xe]  ;;  %v9319_v31 = vld [vmem:[%s11099_s9 + $0xd8] sm:$0xe]  ;;  %v7869_v27 = vrot.slane %v7833_v42, 2 }
 0x1a5   : > { %v7616_v59 = vsel %vm319_vm1, %v7614_v1, %v7615_v17  ;;  %v7836_v11 = vunpack.c.l.bf16 %v9319_v31  ;;  %v9321_v1 = vld [vmem:[%s11099_s9 + $0xe8] sm:$0xe]  ;;  %v9322_v42 = vld [vmem:[%s11099_s9 + $0x100] sm:$0xe]  ;;  %v9324_v31 = vld [vmem:[%s11099_s9 + $0x110] sm:$0xe] }
 0x1a6   : > { %10130 = vmatmul.mubr.msk.f32.gmra.mrb[2].mxu1 %vm370_vm2, %v3705_v28  ;;  %10480 = vmatmul.mubr.msk.f32.gmra.mrb[10].mxu0 %vm370_vm2, %v7604_v0  ;;  %v7864_v28 = vrot.slane %v7506_v61, 2  ;;  %v3709_v0 = vunpack.c.l.bf16 %v8754_v54  ;;  %v7866_v13 = vrot.slane %v7832_v20, 2  ;;  %v8757_v61 = vld [vmem:[%s11099_s9 + $0xb8] ss:$8 sps:$4 sm:$0xff]   ;;  %v7871_v17 = vsel %vm780_vm3, %v7869_v27, %v7870_v9 }
 0x1a7   : > { %10132 = vmatprep.mubr.msk.f32.mxu1 %vm370_vm2, %v3706_v14  ;;  %10482 = vmatprep.mubr.msk.f32.mxu0 %vm370_vm2, %v7607_v40  ;;  %v9318_v14 = vld [vmem:[%s11099_s9 + $0xd0] sm:$0xe]  ;;  %v7834_v40 = vunpack.c.l.bf16 %v9317_v46  ;;  %v3712_v15 = vunpack.c.l.bf16 %v8757_v61  ;;  %v7876_v20 = vrot.slane %v7514_v51, 2  ;;  %v7878_v35 = vrot.slane %v7836_v11, 2  ;;  %v9325_v9 = vld [vmem:[%s11099_s9 + $0x118] sm:$0xe] }
 0x1a8   : > { %v7865_v54 = vsel %vm780_vm3, %v7863_v7, %v7864_v28  ;;  %v7835_v3 = vunpack.c.l.bf16 %v9318_v14  ;;  %v8797_v7 = vld [vmem:[%s11099_s9 + $0xa8] ss:$8 sps:$4 sm:$0xff]   ;;  %v3713_v28 = vunpack.c.h.bf16 %v8757_v61  ;;  %v7879_v46 = vrot.slane %v7516_v21, 2 }
 0x1a9   : > { %v7838_v51 = vunpack.c.l.bf16 %v9321_v1  ;;  %v3980_v14 = vunpack.c.l.bf16 %v8797_v7  ;;  %v9323_v61 = vld [vmem:[%s11099_s9 + $0x108] sm:$0xe]  ;;  %v3716_v21 = vunpack.c.l.bf16 %v8761_v38  ;;  %v7841_v30 = vunpack.c.l.bf16 %v9324_v31 }
 0x1aa   : > { %10133 = vmatmul.mubr.msk.f32.gmra.mrb[4].mxu1 %vm370_vm2, %v3707_v37  ;;  %10483 = vmatmul.mubr.msk.f32.gmra.mrb[12].mxu0 %vm370_vm2, %v7610_v58  ;;  %v3711_v37 = vunpack.c.h.bf16 %v8755_v32  ;;  %v7872_v58 = vrot.slane %v7834_v40, 2  ;;  %v7875_v32 = vrot.slane %v7835_v3, 2  ;;  %v8801_v40 = vld [vmem:[%s11099_s9 + $0xb8] ss:$8 sps:$4 sm:$0xff]   ;;  %v4056_v1 = vrot.slane %v13915_v4, 1 }
 0x1ab   : > { %10135 = vmatprep.mubr.msk.f32.mxu1 %vm370_vm2, %v3708_v25  ;;  %10485 = vmatprep.mubr.msk.f32.mxu0 %vm370_vm2, %v7613_v47  ;;  %v7868_v25 = vsel %vm780_vm3, %v7866_v13, %v7867_v52  ;;  %v7837_v47 = vunpack.c.l.bf16 %v9320_v26  ;;  %v7882_v13 = vrot.slane %v7518_v5, 2  ;;  %v7839_v52 = vunpack.c.l.bf16 %v9322_v42 }
 0x1ac   : > { %v7884_v27 = vrot.slane %v7838_v51, 2  ;;  %v3982_v5 = vunpack.c.h.bf16 %v8797_v7  ;;  %v4052_v3 = vrot.slane %v3980_v14, 1  ;;  %v3984_v11 = vunpack.c.l.bf16 %v8801_v40 }
 0x1ad   : > { %v7891_v19 = vrot.slane %v7524_v56, 2  ;;  %v7894_v51 = vrot.slane %v7526_v29, 2  ;;  %v8809_v56 = vld [vmem:[%s11099_s9 + $0xd8] ss:$8 sps:$4 sm:$0xff]   ;;  %v7906_v4 = vrot.slane %v7534_v49, 2  ;;  %v7909_v49 = vrot.slane %v7536_v41, 2 }
 0x1ae   : > { %10136 = vmatmul.mubr.msk.f32.gmra.mrb[6].mxu1 %vm370_vm2, %v3709_v0  ;;  %10486 = vmatmul.mubr.msk.f32.gmra.mrb[14].mxu0 %vm370_vm2, %v7616_v59  ;;  %v7874_v0 = vsel %vm780_vm3, %v7872_v58, %v7873_v48  ;;  %v7881_v59 = vrot.slane %v7837_v47, 2  ;;  %v7887_v48 = vrot.slane %v7839_v52, 2  ;;  %v7886_v47 = vsel %vm780_vm3, %v7884_v27, %v7885_v23  ;;  %v9328_v52 = vld [vmem:[%s11099_s9 + $0x130] sm:$0xe] }
 0x1af   : > { %10138 = vmatprep.mubr.msk.f32.mxu1 %vm370_vm2, %v3710_v12  ;;  %10490 = vmatprep.mubr.msk.f32.mxu0 %vm370_vm2, %v7865_v54  ;;  %v7877_v12 = vsel %vm780_vm3, %v7875_v32, %v7876_v20  ;;  %v7880_v54 = vsel %vm780_vm3, %v7878_v35, %v7879_v46  ;;  %v3986_v32 = vunpack.c.h.bf16 %v8801_v40  ;;  %v7842_v20 = vunpack.c.l.bf16 %v9325_v9 }
 0x1b0   : > { %v7883_v58 = vsel %vm780_vm3, %v7881_v59, %v7882_v13  ;;  %v4055_v39 = vrot.slane %v3982_v5, 1  ;;  %v4058_v42 = vrot.slane %v3984_v11, 1  ;;  %v7889_v46 = vsel %vm780_vm3, %v7887_v48, %v7888_v63  ;;  %v9329_v5 = vld [vmem:[%s11099_s9 + $0x138] sm:$0xe] }
 0x1b1   : > { %v4061_v14 = vrot.slane %v3986_v32, 1  ;;  %v7896_v13 = vrot.slane %v7842_v20, 2  ;;  %v7900_v27 = vrot.slane %v7530_v36, 2  ;;  %v7845_v23 = vunpack.c.l.bf16 %v9328_v52 }
 0x1b2   : > { %10139 = vmatmul.mubr.msk.f32.gmra.mrb[8].mxu1 %vm370_vm2, %v3711_v37  ;;  %10491 = vmatmul.mubr.msk.f32.vlgmr.msra.gmra.mrb[0].mxu0 %vm370_vm2, %v7868_v25  ;;  %v13914_v37 = vunpack.c.l.bf16 %v11421_v43  ;;  %v8805_v25 = vld [vmem:[%s11099_s9 + $0xc8] ss:$8 sps:$4 sm:$0xff]   ;;  %v9326_v43 = vld [vmem:[%s11099_s9 + $0x120] sm:$0xe]  ;;  %v4057_v22 = vsel %vm319_vm1, %v4055_v39, %v4056_v1  ;;  %v3994_v36 = vunpack.c.h.bf16 %v8809_v56  ;;  %v13921_v1 = vunpack.c.l.bf16 %v11497_v33 }
 0x1b3   : > { %10141 = vmatprep.mubr.msk.f32.mxu1 %vm370_vm2, %v3712_v15  ;;  %10493 = vmatprep.mubr.msk.f32.mxu0 %vm370_vm2, %v7871_v17  ;;  %v7840_v15 = vunpack.c.l.bf16 %v9323_v61  ;;  %v3717_v17 = vunpack.c.h.bf16 %v8761_v38  ;;  %v3988_v53 = vunpack.c.l.bf16 %v8805_v25  ;;  %v7893_v38 = vrot.slane %v7841_v30, 2 }
 0x1b4   : > { %v4053_v26 = vrot.slane %v13914_v37, 1  ;;  %v13918_v61 = vunpack.c.l.bf16 %v11466_v6  ;;  %v7905_v30 = vrot.slane %v7845_v23, 2  ;;  %v4073_v55 = vrot.slane %v3994_v36, 1 }
 0x1b5   : > { %v4064_v29 = vrot.slane %v3988_v53, 1  ;;  %v7895_v31 = vsel %vm780_vm3, %v7893_v38, %v7894_v51  ;;  %v13788_v51 = vld [vmem:[%s13846_s3] ss:$0 sm:$0xff] }
 0x1b6   : > { %10142 = vmatmul.mubr.msk.f32.gmra.mrb[10].mxu1 %vm370_vm2, %v3713_v28  ;;  %10494 = vmatmul.mubr.msk.f32.gmra.mrb[2].mxu0 %vm370_vm2, %v7874_v0  ;;  %v4054_v7 = vsel %vm319_vm1, %v4052_v3, %v4053_v26  ;;  %v7890_v28 = vrot.slane %v7840_v15, 2  ;;  %v7843_v0 = vunpack.c.l.bf16 %v9326_v43  ;;  %v4065_v40 = vrot.slane %v13918_v61, 1 }
 0x1b7   : > { %10144 = vmatprep.mubr.msk.f32.mxu1 %vm370_vm2, %v3714_v50  ;;  %10496 = vmatprep.mubr.msk.f32.mxu0 %vm370_vm2, %v7877_v12  ;;  %v13916_v50 = vunpack.c.l.bf16 %v11447_v2  ;;  %v13917_v12 = vunpack.c.l.bf16 %v11460_v8  ;;  %v7897_v2 = vrot.slane %v7528_v18, 2  ;;  %v7844_v18 = vunpack.c.l.bf16 %v9327_v24 }
 0x1b8   : > { %v7892_v8 = vsel %vm780_vm3, %v7890_v28, %v7891_v19  ;;  %v13919_v3 = vunpack.c.l.bf16 %v11474_v10  ;;  %v4066_v26 = vsel %vm319_vm1, %v4064_v29, %v4065_v40  ;;  %v7846_v10 = vunpack.c.l.bf16 %v9329_v5 }
 0x1b9   : > { %v4059_v35 = vrot.slane %v13916_v50, 1  ;;  %v4062_v59 = vrot.slane %v13917_v12, 1  ;;  %v7898_v9 = vsel %vm780_vm3, %v7896_v13, %v7897_v2  ;;  %v7902_v11 = vrot.slane %v7844_v18, 2 }
 0x1ba   : > { %10145 = vmatmul.mubr.msk.f32.gmra.mrb[12].mxu1 %vm370_vm2, %v3715_v45  ;;  %10497 = vmatmul.mubr.msk.f32.gmra.mrb[4].mxu0 %vm370_vm2, %v7880_v54  ;;  %v3990_v45 = vunpack.c.h.bf16 %v8805_v25  ;;  %v7899_v54 = vrot.slane %v7843_v0, 2  ;;  %v4068_v37 = vrot.slane %v13919_v3, 1  ;;  %v7908_v60 = vrot.slane %v7846_v10, 2 }
 0x1bb   : > { %10147 = vmatprep.mubr.msk.f32.mxu1 %vm370_vm2, %v3716_v21  ;;  %10499 = vmatprep.mubr.msk.f32.mxu0 %vm370_vm2, %v7883_v58  ;;  %v4060_v62 = vsel %vm319_vm1, %v4058_v42, %v4059_v35  ;;  %v3992_v21 = vunpack.c.l.bf16 %v8809_v56  ;;  %v4063_v6 = vsel %vm319_vm1, %v4061_v14, %v4062_v59  ;;  %v13920_v58 = vunpack.c.l.bf16 %v11486_v57  ;;  %v13783_v35 = vld [vmem:[%s13845_s2] ss:$0 sm:$0xff] }
 0x1bc   : > { %v4067_v15 = vrot.slane %v3990_v45, 1  ;;  %v7901_v63 = vsel %vm780_vm3, %v7899_v54, %v7900_v27  ;;  %v4074_v57 = vrot.slane %v13921_v1, 1  ;;  %v7907_v20 = vsel %vm780_vm3, %v7905_v30, %v7906_v4 }
 0x1bd   : > { %v4070_v25 = vrot.slane %v3992_v21, 1  ;;  %v4071_v48 = vrot.slane %v13920_v58, 1  ;;  %v7910_v43 = vsel %vm780_vm3, %v7908_v60, %v7909_v49 }
 0x1be   : > { %10148 = vmatmul.mubr.msk.f32.gmra.mrb[14].mxu1 %vm370_vm2, %v3717_v17  ;;  %10500 = vmatmul.mubr.msk.f32.gmra.mrb[6].mxu0 %vm370_vm2, %v7886_v47  ;;  %v4069_v34 = vsel %vm319_vm1, %v4067_v15, %v4068_v37  ;;  %v7904_v17 = vsel %vm780_vm3, %v7902_v11, %v7903_v16  ;;  %v4075_v33 = vsel %vm319_vm1, %v4073_v55, %v4074_v57 }
 0x1bf   : > { %10164 = vmatprep.mubr.msk.f32.mxu1 %vm370_vm2, %v4054_v7  ;;  %10502 = vmatprep.mubr.msk.f32.mxu0 %vm370_vm2, %v7889_v46  ;;  %v4072_v32 = vsel %vm319_vm1, %v4070_v25, %v4071_v48 }
 0x1c2   : > { %10165 = vmatmul.mubr.msk.f32.vlgmr.msra.gmra.mrb[8].mxu1 %vm370_vm2, %v4057_v22  ;;  %10503 = vmatmul.mubr.msk.f32.gmra.mrb[8].mxu0 %vm370_vm2, %v7892_v8 }
 0x1c3   : > { %10167 = vmatprep.mubr.msk.f32.mxu1 %vm370_vm2, %v4060_v62  ;;  %10505 = vmatprep.mubr.msk.f32.mxu0 %vm370_vm2, %v7895_v31 }
 0x1c6   : > { %10168 = vmatmul.mubr.msk.f32.gmra.mrb[10].mxu1 %vm370_vm2, %v4063_v6  ;;  %10506 = vmatmul.mubr.msk.f32.gmra.mrb[10].mxu0 %vm370_vm2, %v7898_v9 }
 0x1c7   : > { %10170 = vmatprep.mubr.msk.f32.mxu1 %vm370_vm2, %v4066_v26  ;;  %10508 = vmatprep.mubr.msk.f32.mxu0 %vm370_vm2, %v7901_v63 }
 0x1ca   : > { %10171 = vmatmul.mubr.msk.f32.gmra.mrb[12].mxu1 %vm370_vm2, %v4069_v34  ;;  %10509 = vmatmul.mubr.msk.f32.gmra.mrb[12].mxu0 %vm370_vm2, %v7904_v17 }
 0x1cb   : > { %10173 = vmatprep.mubr.msk.f32.mxu1 %vm370_vm2, %v4072_v32  ;;  %10511 = vmatprep.mubr.msk.f32.mxu0 %vm370_vm2, %v7907_v20 }
 0x1ce   : > { %10174 = vmatmul.mubr.msk.f32.gmra.mrb[14].mxu1 %vm370_vm2, %v4075_v33  ;;  %10512 = vmatmul.mubr.msk.f32.gmra.mrb[14].mxu0 %vm370_vm2, %v7910_v43 }
 0x275   : > { %v10128_v44 = vpop.f32.mrb[0].mxu1 }
 0x276   : > { %v3837_v41 = vpop.f32.mrb[1].mxu1 }
 0x279   : > { %v10131_v47 = vpop.f32.mrb[2].mxu1 }
 0x27a   : > { %v3847_v39 = vpop.f32.mrb[3].mxu1 }
 0x27d   : > { %v10134_v19 = vpop.f32.mrb[4].mxu1 }
 0x27e   : > { %v3857_v53 = vpop.f32.mrb[5].mxu1 }
 0x281   : > { %v10137_v7 = vpop.f32.mrb[6].mxu1 }
 0x282   : > { %v3867_v28 = vpop.f32.mrb[7].mxu1 }
 0x285   : > { %v10492_v42 = vpop.f32.mrb[0].mxu0 }
 0x286   : > { %v10516_v50 = vadd.f32 %v10492_v42, %v10128_v44  ;;  %v8014_v46 = vpop.f32.mrb[1].mxu0 }
 0x287   : > { %v10517_v38 = vadd.f32 %v8014_v46, %v3837_v41 }
 0x288   : > { %v8117_v0 = vmul.f32 %v10516_v50, %v13783_v35 }
 0x289   : > { %v10495_v24 = vpop.f32.mrb[2].mxu0  ;;  %v8116_v56 = vmul.f32 %v10517_v38, %v13783_v35 }
 0x28a   : > { %v10518_v14 = vadd.f32 %v10495_v24, %v10131_v47  ;;  %v8024_v12 = vpop.f32.mrb[3].mxu0  ;;  %v8140_v29 = vadd.f32 %v13788_v51, %v8117_v0 }
 0x28b   : > { %v10519_v59 = vadd.f32 %v8024_v12, %v3847_v39  ;;  %v8139_v13 = vadd.f32 %v13788_v51, %v8116_v56 }
 0x28c   : > { %v8119_v8 = vmul.f32 %v10518_v14, %v13783_v35  ;;  %v8156_v18 = vmax.f32 %v8140_v29, 0.0 }
 0x28d   : > { %v8118_v2 = vmul.f32 %v10519_v59, %v13783_v35  ;;  %v10498_v52 = vpop.f32.mrb[4].mxu0  ;;  %v8155_v22 = vmax.f32 %v8139_v13, 0.0 }
 0x28e   : > { %v10520_v61 = vadd.f32 %v10498_v52, %v10134_v19  ;;  %v8034_v40 = vpop.f32.mrb[5].mxu0  ;;  %v8142_v37 = vadd.f32 %v13788_v51, %v8119_v8 }
 0x28f   : > { %v10521_v45 = vadd.f32 %v8034_v40, %v3857_v53  ;;  %8171 = vxpose.xlu0.b32.start [1/16] (narrow) %v8155_v22, 8  ;;  %v8141_v21 = vadd.f32 %v13788_v51, %v8118_v2 }
 0x290   : > { %v8121_v11 = vmul.f32 %v10520_v61, %v13783_v35  ;;  %v8158_v48 = vmax.f32 %v8142_v37, 0.0 }
 0x291   : > { %v10501_v62 = vpop.f32.mrb[6].mxu0  ;;  %v8120_v5 = vmul.f32 %v10521_v45, %v13783_v35  ;;  %v8157_v3 = vmax.f32 %v8141_v21, 0.0 }
 0x292   : > { %v10522_v31 = vadd.f32 %v10501_v62, %v10137_v7  ;;  %v8044_v54 = vpop.f32.mrb[7].mxu0  ;;  %v8144_v32 = vadd.f32 %v13788_v51, %v8121_v11 }
 0x293   : > { %v10523_v27 = vadd.f32 %v8044_v54, %v3867_v28  ;;  %8172 = vxpose.xlu0.b32.cont [2/16] (narrow) %v8156_v18, 8  ;;  %v8143_v10 = vadd.f32 %v13788_v51, %v8120_v5 }
 0x294   : > { %v8123_v43 = vmul.f32 %v10522_v31, %v13783_v35  ;;  %v8160_v47 = vmax.f32 %v8144_v32, 0.0 }
 0x295   : > { %v10166_v23 = vpop.f32.mrb[8].mxu1  ;;  %v10504_v6 = vpop.f32.mrb[8].mxu0  ;;  %v8122_v55 = vmul.f32 %v10523_v27, %v13783_v35  ;;  %v8159_v17 = vmax.f32 %v8143_v10, 0.0 }
 0x296   : > { %v4219_v9 = vpop.f32.mrb[9].mxu1  ;;  %v10524_v26 = vadd.f32 %v10504_v6, %v10166_v23  ;;  %v8054_v15 = vpop.f32.mrb[9].mxu0  ;;  %v8146_v50 = vadd.f32 %v13788_v51, %v8123_v43 }
 0x297   : > { %v10525_v16 = vadd.f32 %v8054_v15, %v4219_v9  ;;  %8173 = vxpose.xlu0.b32.cont [3/16] (narrow) %v8157_v3, 8  ;;  %v8145_v39 = vadd.f32 %v13788_v51, %v8122_v55 }
 0x298   : > { %v8125_v46 = vmul.f32 %v10524_v26, %v13783_v35  ;;  %v8162_v38 = vmax.f32 %v8146_v50, 0.0 }
 0x299   : > { %v10169_v36 = vpop.f32.mrb[10].mxu1  ;;  %v10507_v25 = vpop.f32.mrb[10].mxu0  ;;  %v8124_v28 = vmul.f32 %v10525_v16, %v13783_v35  ;;  %v8161_v42 = vmax.f32 %v8145_v39, 0.0 }
 0x29a   : > { %v4229_v58 = vpop.f32.mrb[11].mxu1  ;;  %v10526_v63 = vadd.f32 %v10507_v25, %v10169_v36  ;;  %v8064_v30 = vpop.f32.mrb[11].mxu0  ;;  %v8148_v14 = vadd.f32 %v13788_v51, %v8125_v46 }
 0x29b   : > { %v10527_v4 = vadd.f32 %v8064_v30, %v4229_v58  ;;  %8174 = vxpose.xlu0.b32.cont [4/16] (narrow) %v8158_v48, 8  ;;  %v8147_v0 = vadd.f32 %v13788_v51, %v8124_v28 }
 0x29c   : > { %v8127_v12 = vmul.f32 %v10526_v63, %v13783_v35  ;;  %v8164_v59 = vmax.f32 %v8148_v14, 0.0 }
 0x29d   : > { %v10172_v34 = vpop.f32.mrb[12].mxu1  ;;  %v10510_v1 = vpop.f32.mrb[12].mxu0  ;;  %v8126_v24 = vmul.f32 %v10527_v4, %v13783_v35  ;;  %v8163_v56 = vmax.f32 %v8147_v0, 0.0 }
 0x29e   : > { %v4239_v57 = vpop.f32.mrb[13].mxu1  ;;  %v10528_v60 = vadd.f32 %v10510_v1, %v10172_v34  ;;  %v8074_v49 = vpop.f32.mrb[13].mxu0  ;;  %v8150_v22 = vadd.f32 %v13788_v51, %v8127_v12 }
 0x29f   : > { %v10529_v20 = vadd.f32 %v8074_v49, %v4239_v57  ;;  %8175 = vxpose.xlu0.b32.cont [5/16] (narrow) %v8159_v17, 8  ;;  %v8149_v13 = vadd.f32 %v13788_v51, %v8126_v24 }
 0x2a0   : > { %v8129_v29 = vmul.f32 %v10528_v60, %v13783_v35  ;;  %v8166_v61 = vmax.f32 %v8150_v22, 0.0 }
 0x2a1   : > { %v10175_v33 = vpop.f32.mrb[14].mxu1  ;;  %v10513_v44 = vpop.f32.mrb[14].mxu0  ;;  %v8128_v2 = vmul.f32 %v10529_v20, %v13783_v35  ;;  %v8165_v52 = vmax.f32 %v8149_v13, 0.0 }
 0x2a2   : > { %v4249_v41 = vpop.f32.mrb[15].mxu1  ;;  %v10530_v19 = vadd.f32 %v10513_v44, %v10175_v33  ;;  %v8084_v53 = vpop.f32.mrb[15].mxu0  ;;  %v8152_v62 = vadd.f32 %v13788_v51, %v8129_v29 }
 0x2a3   : > { %v10531_v7 = vadd.f32 %v8084_v53, %v4249_v41  ;;  %8176 = vxpose.xlu0.b32.cont [6/16] (narrow) %v8160_v47, 8  ;;  %v8151_v40 = vadd.f32 %v13788_v51, %v8128_v2 }
 0x2a4   : > { %v8131_v18 = vmul.f32 %v10530_v19, %v13783_v35  ;;  %v8168_v21 = vmax.f32 %v8152_v62, 0.0 }
 0x2a5   : > { %v8130_v45 = vmul.f32 %v10531_v7, %v13783_v35  ;;  %v8167_v8 = vmax.f32 %v8151_v40, 0.0 }
 0x2a6   : > { %v8154_v27 = vadd.f32 %v13788_v51, %v8131_v18 }
 0x2a7   : > { %8177 = vxpose.xlu0.b32.cont [7/16] (narrow) %v8161_v42, 8  ;;  %v8153_v31 = vadd.f32 %v13788_v51, %v8130_v45 }
 0x2a8   : > { %v8170_v23 = vmax.f32 %v8154_v27, 0.0 }
 0x2a9   : > { %v8169_v54 = vmax.f32 %v8153_v31, 0.0 }
 0x2ab   : > { %8178 = vxpose.xlu0.b32.cont [8/16] (narrow) %v8162_v38, 8 }
 0x2af   : > { %8179 = vxpose.xlu0.b32.cont [9/16] (narrow) %v8163_v56, 8 }
 0x2b3   : > { %8180 = vxpose.xlu0.b32.cont [10/16] (narrow) %v8164_v59, 8 }
 0x2b7   : > { %8181 = vxpose.xlu0.b32.cont [11/16] (narrow) %v8165_v52, 8 }
 0x2bb   : > { %8182 = vxpose.xlu0.b32.cont [12/16] (narrow) %v8166_v61, 8 }
 0x2bf   : > { %8183 = vxpose.xlu0.b32.cont [13/16] (narrow) %v8167_v8, 8 }
 0x2c3   : > { %8184 = vxpose.xlu0.b32.cont [14/16] (narrow) %v8168_v21, 8 }
 0x2c7   : > { %8185 = vxpose.xlu0.b32.cont [15/16] (narrow) %v8169_v54, 8 }
 0x2cb   : > { %8186 = vxpose.xlu0.b32.end [16/16] (narrow) %v8170_v23, 8 }
 0x30f   : > { %v8187_v35 = vpop.trf.xlu0 }
 0x310   : > { %8203 = vst [vmem:[%s217_s12] sm:$0xff] %v8187_v35 }
 0x311 PF: > { %s14_s19 = sadd.s32 1, %s11012_s19   ;;  %s13922_s15 = smov %s11004_s17 }
 0x312   : > { %p11_p7 = scmp.ge.s32.totalorder %s14_s19, 6   ;;  %s13923_s16 = smov %s11008_s18 }
 0x313   : > { %s13924_s17 = smov %s13927_s20  ;;  %s13925_s18 = smov %s13931_s21 }
 0x314   :  { %13 = sbr.rel (!%p11_p7) target bundleno = 3 (0x3), region = 101 }

</bundles_post_ra>
